<compile_context>
chip_gen: v6e
topology: v6e:2x2x1
jax: 0.10.0
libtpu: 0.0.40
codegen_flags: <defaults>
</compile_context>

<pallas_src>
import math
import jax
import jax.numpy as jnp
from jax.experimental import pallas as pl
from jax.experimental.pallas import tpu as pltpu

# ---- small, forward-consistent shapes ----
B, L, H = 2, 16, 32                  # batch, seq len, hidden
BL = B * L                           # 32 flattened rows
HEADS = 4
HD = H // HEADS                      # 8
FILTERS = 8                          # conv filters (small stand-in for 128)
KERNELS = (3, 4, 5)
CH = FILTERS * len(KERNELS)          # 24  (SpatialSE channels)
CR = CH // 8                         # 3   (SE reduction r=8)
NUM_CLASSES = 16
OUT_DIM = CH + 3 * H                 # 120 (textcnn out_dim)
LN_EPS = 1e-5
LANES = 128
NEG_INF = -1e9

# ---- weight-slab row offsets (all multiples of 8 -> aligned sublane slices) ----
WQ = 0                        # per-head Wq blocks  [HEADS*H, HD]
WK = WQ + HEADS * H           # 128
WV = WK + HEADS * H           # 256
WO = WV + HEADS * H           # 384   out_proj [H, H]
W3 = WO + H                   # 416   conv k=3 taps, each [H, F]
W4 = W3 + 3 * H               # 512
W5 = W4 + 4 * H               # 640
W1 = W5 + 5 * H               # 800   SE fc1 [CH, CR]
W2 = W1 + CH                  # 824   SE fc2 [CR, CH] (block padded to 8 rows)
WC = W2 + 8                   # 832   classifier [OUT_DIM, 128] (zero-padded lanes)
WROWS = WC + OUT_DIM          # 952

# ---- bias-slab rows (each bias stored as one 128-lane zero-padded row) ----
BQ, BK, BV = 0, HEADS, 2 * HEADS      # per-head q/k/v bias rows
BO, LNG, LNB = 12, 13, 14
B3R, B4R, B5R = 15, 16, 17
B1R, B2R, BCR = 18, 19, 20
BROWS = 24


def mbti_kernel(x_ref, abias_ref, w_ref, b_ref, out_ref):
    x = x_ref[...]                      # [BL, H]   both batch rows stacked
    abias = abias_ref[...]              # [BL, BL]  block-diag(batch) + key-padding bias
    scale = 1.0 / math.sqrt(HD)

    # ---------------- TemporalAttn: MHA + residual + LayerNorm ----------------
    head_outs = []
    for h in range(HEADS):              # per-head weights -> no lane extraction of qkv
        q = (jnp.dot(x, w_ref[WQ + h * H:WQ + (h + 1) * H, 0:HD],
                     preferred_element_type=jnp.float32)
             + b_ref[BQ + h:BQ + h + 1, 0:HD])
        k = (jnp.dot(x, w_ref[WK + h * H:WK + (h + 1) * H, 0:HD],
                     preferred_element_type=jnp.float32)
             + b_ref[BK + h:BK + h + 1, 0:HD])
        v = (jnp.dot(x, w_ref[WV + h * H:WV + (h + 1) * H, 0:HD],
                     preferred_element_type=jnp.float32)
             + b_ref[BV + h:BV + h + 1, 0:HD])
        s = jnp.dot(q, k.T, preferred_element_type=jnp.float32) * scale + abias
        p = jax.nn.softmax(s, axis=-1)
        head_outs.append(jnp.dot(p, v, preferred_element_type=jnp.float32))   # [BL, HD]
    # single output projection (no per-head K=8 accumulate)
    o_cat = jnp.concatenate(head_outs, axis=-1)                               # [BL, H]
    attn = (jnp.dot(o_cat, w_ref[WO:WO + H, 0:H], preferred_element_type=jnp.float32)
            + b_ref[BO:BO + 1, 0:H])

    y = x + attn
    mu = jnp.mean(y, axis=-1, keepdims=True)
    var = jnp.mean(jnp.square(y - mu), axis=-1, keepdims=True)
    yn = ((y - mu) * jax.lax.rsqrt(var + LN_EPS) * b_ref[LNG:LNG + 1, 0:H]
          + b_ref[LNB:LNB + 1, 0:H])                                          # [BL, H]

    # ---------------- TextCNNBlock global features (per batch segment) ----------------
    def per_batch(fn):
        return jnp.concatenate(
            [fn(yn[b * L:(b + 1) * L, :]) for b in range(B)], axis=0)

    cls_g = per_batch(lambda t: t[0:1, :])                                    # seq[:, 0]
    mean_g = per_batch(lambda t: jnp.mean(t, axis=0, keepdims=True))          # seq.mean(1)
    max_g = per_batch(lambda t: jnp.max(t, axis=0, keepdims=True))            # seq.max(1)

    # ---------------- Conv1d branches: full-length taps + roll + mask ----------------
    local_pos = jnp.bitwise_and(
        jax.lax.broadcasted_iota(jnp.int32, (BL, 1), 0), L - 1)               # pos in batch

    def conv_branch(w_row0, b_row, ksize):
        acc = jnp.zeros((BL, FILTERS), jnp.float32)
        for dk in range(ksize):
            tap = jnp.dot(yn, w_ref[w_row0 + dk * H:w_row0 + (dk + 1) * H, 0:FILTERS],
                          preferred_element_type=jnp.float32)                 # [BL, F]
            if dk:
                tap = pltpu.roll(tap, BL - dk, axis=0)    # tap[r] <- tap[r + dk]
            acc = acc + tap
        acc = jnp.maximum(acc + b_ref[b_row:b_row + 1, 0:FILTERS], 0.0)       # relu
        valid = (local_pos <= (L - ksize)).astype(jnp.float32)                # kill tail rows
        acc = acc * valid
        return jnp.concatenate(                                                # max-over-time
            [jnp.max(acc[b * L:(b + 1) * L, :], axis=0, keepdims=True) for b in range(B)],
            axis=0)                                                           # [B, F]

    f3 = conv_branch(W3, B3R, 3)
    f4 = conv_branch(W4, B4R, 4)
    f5 = conv_branch(W5, B5R, 5)

    # ---------------- SpatialSE ----------------
    fcat = jnp.concatenate([f3, f4, f5], axis=-1)                             # [B, CH]
    z = jnp.maximum(
        jnp.dot(fcat, w_ref[W1:W1 + CH, 0:CR], preferred_element_type=jnp.float32)
        + b_ref[B1R:B1R + 1, 0:CR], 0.0)
    w_se = jax.nn.sigmoid(
        jnp.dot(z, w_ref[W2:W2 + CR, 0:CH], preferred_element_type=jnp.float32)
        + b_ref[B2R:B2R + 1, 0:CH])
    scat = fcat * w_se                                                        # [B, CH]

    # ---- MCMSDropClassifier (eval: mean of n identical fc == fc); lane-dense [B,128] ----
    logits = (
        jnp.dot(scat, w_ref[WC:WC + CH, :], preferred_element_type=jnp.float32)
        + jnp.dot(cls_g, w_ref[WC + CH:WC + CH + H, :],
                  preferred_element_type=jnp.float32)
        + jnp.dot(mean_g, w_ref[WC + CH + H:WC + CH + 2 * H, :],
                  preferred_element_type=jnp.float32)
        + jnp.dot(max_g, w_ref[WC + CH + 2 * H:WC + CH + 3 * H, :],
                  preferred_element_type=jnp.float32)
        + b_ref[BCR:BCR + 1, :])                                              # [B, 128]
    out_ref[...] = logits


def pack_params(p):
    """Pack the 18 per-module tensors into one weight slab and one bias slab."""
    def put(slab, r0, mat):
        r, c = mat.shape
        return slab.at[r0:r0 + r, 0:c].set(mat)

    w = jnp.zeros((WROWS, LANES), jnp.float32)
    wq, wk, wv = (p["wqkv"][:, 0:H], p["wqkv"][:, H:2 * H], p["wqkv"][:, 2 * H:3 * H])
    for h in range(HEADS):
        cols = slice(h * HD, (h + 1) * HD)
        w = put(w, WQ + h * H, wq[:, cols])
        w = put(w, WK + h * H, wk[:, cols])
        w = put(w, WV + h * H, wv[:, cols])
    w = put(w, WO, p["wo"])
    for dk in range(3):
        w = put(w, W3 + dk * H, p["w3"][dk])
    for dk in range(4):
        w = put(w, W4 + dk * H, p["w4"][dk])
    for dk in range(5):
        w = put(w, W5 + dk * H, p["w5"][dk])
    w = put(w, W1, p["w1"])
    w = put(w, W2, p["w2"])
    w = put(w, WC, p["wc"])

    b = jnp.zeros((BROWS, LANES), jnp.float32)
    bq, bk, bv = (p["bqkv"][:, 0:H], p["bqkv"][:, H:2 * H], p["bqkv"][:, 2 * H:3 * H])
    for h in range(HEADS):
        cols = slice(h * HD, (h + 1) * HD)
        b = put(b, BQ + h, bq[:, cols])
        b = put(b, BK + h, bk[:, cols])
        b = put(b, BV + h, bv[:, cols])
    for row, name in ((BO, "bo"), (LNG, "ln_g"), (LNB, "ln_b"), (B3R, "b3"),
                      (B4R, "b4"), (B5R, "b5"), (B1R, "b1"), (B2R, "b2"), (BCR, "bc")):
        b = put(b, row, p[name])
    return w, b


@jax.jit
def mbti_forward(seq, mask, wslab, bslab):
    x2d = seq.reshape(BL, H)
    mflat = mask.reshape(BL)
    # additive attention bias: same-batch block-diagonal AND key not padded
    bidx = jnp.arange(BL) // L
    allowed = (bidx[:, None] == bidx[None, :]) & (mflat[None, :] > 0.5)
    abias = jnp.where(allowed, 0.0, NEG_INF).astype(jnp.float32)              # [BL, BL]

    out = pl.pallas_call(
        mbti_kernel,
        out_shape=jax.ShapeDtypeStruct((B, LANES), jnp.float32),              # lane-dense
    )(x2d, abias, wslab, bslab)
    return out[:, :NUM_CLASSES]


def init_params(key):
    ks = jax.random.split(key, 16)

    def rnd(k, shape, scale=0.05):
        return scale * jax.random.normal(k, shape, jnp.float32)

    return {
        # MultiheadAttention (weights stored pre-transposed for x @ W)
        "wqkv": rnd(ks[0], (H, 3 * H)),          # in_proj_weight.T
        "bqkv": rnd(ks[1], (1, 3 * H)),
        "wo":   rnd(ks[2], (H, H)),              # out_proj.weight.T
        "bo":   rnd(ks[3], (1, H)),
        "ln_g": jnp.ones((1, H), jnp.float32),
        "ln_b": jnp.zeros((1, H), jnp.float32),
        # Conv1d weights, tap-major + transposed: [k, H, FILTERS]
        "w3": rnd(ks[4], (3, H, FILTERS)),
        "b3": rnd(ks[5], (1, FILTERS)),
        "w4": rnd(ks[6], (4, H, FILTERS)),
        "b4": rnd(ks[7], (1, FILTERS)),
        "w5": rnd(ks[8], (5, H, FILTERS)),
        "b5": rnd(ks[9], (1, FILTERS)),
        # SpatialSE (fc1.weight.T, fc2.weight.T)
        "w1": rnd(ks[10], (CH, CR)),
        "b1": rnd(ks[11], (1, CR)),
        "w2": rnd(ks[12], (CR, CH)),
        "b2": rnd(ks[13], (1, CH)),
        # MCMSDropClassifier fc (weight.T); feature order = [conv_cat, cls, mean, max]
        "wc": rnd(ks[14], (OUT_DIM, NUM_CLASSES)),
        "bc": rnd(ks[15], (1, NUM_CLASSES)),
    }


if __name__ == "__main__":
    key = jax.random.PRNGKey(0)
    k_seq, k_par = jax.random.split(key)

    # `seq` stands in for encoder(ids, mask).last_hidden_state  (see TODO above)
    seq = jax.random.normal(k_seq, (B, L, H), jnp.float32)
    # attention mask: first 12 tokens valid, last 4 are padding
    mask = jnp.concatenate(
        [jnp.ones((B, 12), jnp.float32), jnp.zeros((B, 4), jnp.float32)], axis=1)

    params = init_params(k_par)
    wslab, bslab = pack_params(params)

    logits = mbti_forward(seq, mask, wslab, bslab)
    jax.block_until_ready(logits)

    assert logits.shape == (B, NUM_CLASSES)
    assert bool(jnp.all(jnp.isfinite(logits)))
    print("KERNEL_OK")
</pallas_src>

<mosaic_0001>
module attributes {stable_mosaic.version = 11 : i64} {
  func.func @mbti_kernel(%arg0: memref<32x32xf32, #tpu.memory_space<vmem>>, %arg1: memref<32x32xf32, #tpu.memory_space<vmem>>, %arg2: memref<952x128xf32, #tpu.memory_space<vmem>>, %arg3: memref<24x128xf32, #tpu.memory_space<vmem>>, %arg4: memref<2x128xf32, #tpu.memory_space<vmem>>) attributes {dimension_semantics = [], scalar_prefetch = 0 : i64, scratch_operands = 0 : i64, tpu.core_type = #tpu.core_type<tc>} {
    %c0 = arith.constant 0 : index
    %c0_0 = arith.constant 0 : index
    %0 = vector.load %arg0[%c0, %c0_0] : memref<32x32xf32, #tpu.memory_space<vmem>>, vector<32x32xf32>
    %c0_1 = arith.constant 0 : index
    %c0_2 = arith.constant 0 : index
    %1 = vector.load %arg1[%c0_1, %c0_2] : memref<32x32xf32, #tpu.memory_space<vmem>>, vector<32x32xf32>
    %c0_3 = arith.constant 0 : index
    %c0_4 = arith.constant 0 : index
    %2 = vector.load %arg2[%c0_3, %c0_4] : memref<952x128xf32, #tpu.memory_space<vmem>>, vector<32x8xf32>
    %cst = arith.constant dense<0.000000e+00> : vector<32x8xf32>
    %3 = tpu.matmul %0, %2, %cst {dimension_numbers = #tpu.dot_dimension_numbers<[1], [0], [0], [1], [0, 0, 1, 1], [], []>} : vector<32x32xf32>, vector<32x8xf32>, vector<32x8xf32> -> vector<32x8xf32>
    %c0_5 = arith.constant 0 : index
    %c0_6 = arith.constant 0 : index
    %4 = vector.load %arg3[%c0_5, %c0_6] : memref<24x128xf32, #tpu.memory_space<vmem>>, vector<1x8xf32>
    %5 = vector.broadcast %4 : vector<1x8xf32> to vector<32x8xf32>
    %6 = arith.addf %3, %5 : vector<32x8xf32>
    %c128 = arith.constant 128 : index
    %c0_7 = arith.constant 0 : index
    %7 = vector.load %arg2[%c128, %c0_7] : memref<952x128xf32, #tpu.memory_space<vmem>>, vector<32x8xf32>
    %cst_8 = arith.constant dense<0.000000e+00> : vector<32x8xf32>
    %8 = tpu.matmul %0, %7, %cst_8 {dimension_numbers = #tpu.dot_dimension_numbers<[1], [0], [0], [1], [0, 0, 1, 1], [], []>} : vector<32x32xf32>, vector<32x8xf32>, vector<32x8xf32> -> vector<32x8xf32>
    %c4 = arith.constant 4 : index
    %c0_9 = arith.constant 0 : index
    %9 = vector.load %arg3[%c4, %c0_9] : memref<24x128xf32, #tpu.memory_space<vmem>>, vector<1x8xf32>
    %10 = vector.broadcast %9 : vector<1x8xf32> to vector<32x8xf32>
    %11 = arith.addf %8, %10 : vector<32x8xf32>
    %c256 = arith.constant 256 : index
    %c0_10 = arith.constant 0 : index
    %12 = vector.load %arg2[%c256, %c0_10] : memref<952x128xf32, #tpu.memory_space<vmem>>, vector<32x8xf32>
    %cst_11 = arith.constant dense<0.000000e+00> : vector<32x8xf32>
    %13 = tpu.matmul %0, %12, %cst_11 {dimension_numbers = #tpu.dot_dimension_numbers<[1], [0], [0], [1], [0, 0, 1, 1], [], []>} : vector<32x32xf32>, vector<32x8xf32>, vector<32x8xf32> -> vector<32x8xf32>
    %c8 = arith.constant 8 : index
    %c0_12 = arith.constant 0 : index
    %14 = vector.load %arg3[%c8, %c0_12] : memref<24x128xf32, #tpu.memory_space<vmem>>, vector<1x8xf32>
    %15 = vector.broadcast %14 : vector<1x8xf32> to vector<32x8xf32>
    %16 = arith.addf %13, %15 : vector<32x8xf32>
    %17 = tpu.transpose %11, [1, 0] : vector<32x8xf32> -> vector<8x32xf32>
    %cst_13 = arith.constant dense<0.000000e+00> : vector<32x32xf32>
    %18 = tpu.matmul %6, %17, %cst_13 {dimension_numbers = #tpu.dot_dimension_numbers<[1], [0], [0], [1], [0, 0, 1, 1], [], []>} : vector<32x8xf32>, vector<8x32xf32>, vector<32x32xf32> -> vector<32x32xf32>
    %cst_14 = arith.constant 0.353553385 : f32
    %19 = vector.broadcast %cst_14 : f32 to vector<32x32xf32>
    %20 = arith.mulf %18, %19 : vector<32x32xf32>
    %21 = arith.addf %20, %1 : vector<32x32xf32>
    %cst_15 = arith.constant dense<0xFF800000> : vector<32xf32>
    %22 = vector.multi_reduction <maximumf>, %21, %cst_15 [1] : vector<32x32xf32> to vector<32xf32>
    %cst_16 = arith.constant 0xFF800000 : f32
    %23 = vector.broadcast %cst_16 : f32 to vector<32xf32>
    %24 = arith.maximumf %23, %22 : vector<32xf32>
    %25 = vector.shape_cast %24 : vector<32xf32> to vector<32x1xf32>
    %26 = vector.broadcast %25 : vector<32x1xf32> to vector<32x32xf32>
    %27 = arith.subf %21, %26 : vector<32x32xf32>
    %28 = math.exp %27 : vector<32x32xf32>
    %cst_17 = arith.constant dense<0.000000e+00> : vector<32xf32>
    %29 = vector.multi_reduction <add>, %28, %cst_17 [1] : vector<32x32xf32> to vector<32xf32>
    %30 = vector.shape_cast %29 : vector<32xf32> to vector<32x1xf32>
    %31 = vector.broadcast %30 : vector<32x1xf32> to vector<32x32xf32>
    %32 = arith.divf %28, %31 : vector<32x32xf32>
    %cst_18 = arith.constant dense<0.000000e+00> : vector<32x8xf32>
    %33 = tpu.matmul %32, %16, %cst_18 {dimension_numbers = #tpu.dot_dimension_numbers<[1], [0], [0], [1], [0, 0, 1, 1], [], []>} : vector<32x32xf32>, vector<32x8xf32>, vector<32x8xf32> -> vector<32x8xf32>
    %c32 = arith.constant 32 : index
    %c0_19 = arith.constant 0 : index
    %34 = vector.load %arg2[%c32, %c0_19] : memref<952x128xf32, #tpu.memory_space<vmem>>, vector<32x8xf32>
    %cst_20 = arith.constant dense<0.000000e+00> : vector<32x8xf32>
    %35 = tpu.matmul %0, %34, %cst_20 {dimension_numbers = #tpu.dot_dimension_numbers<[1], [0], [0], [1], [0, 0, 1, 1], [], []>} : vector<32x32xf32>, vector<32x8xf32>, vector<32x8xf32> -> vector<32x8xf32>
    %c1 = arith.constant 1 : index
    %c0_21 = arith.constant 0 : index
    %36 = vector.load %arg3[%c1, %c0_21] : memref<24x128xf32, #tpu.memory_space<vmem>>, vector<1x8xf32>
    %37 = vector.broadcast %36 : vector<1x8xf32> to vector<32x8xf32>
    %38 = arith.addf %35, %37 : vector<32x8xf32>
    %c160 = arith.constant 160 : index
    %c0_22 = arith.constant 0 : index
    %39 = vector.load %arg2[%c160, %c0_22] : memref<952x128xf32, #tpu.memory_space<vmem>>, vector<32x8xf32>
    %cst_23 = arith.constant dense<0.000000e+00> : vector<32x8xf32>
    %40 = tpu.matmul %0, %39, %cst_23 {dimension_numbers = #tpu.dot_dimension_numbers<[1], [0], [0], [1], [0, 0, 1, 1], [], []>} : vector<32x32xf32>, vector<32x8xf32>, vector<32x8xf32> -> vector<32x8xf32>
    %c5 = arith.constant 5 : index
    %c0_24 = arith.constant 0 : index
    %41 = vector.load %arg3[%c5, %c0_24] : memref<24x128xf32, #tpu.memory_space<vmem>>, vector<1x8xf32>
    %42 = vector.broadcast %41 : vector<1x8xf32> to vector<32x8xf32>
    %43 = arith.addf %40, %42 : vector<32x8xf32>
    %c288 = arith.constant 288 : index
    %c0_25 = arith.constant 0 : index
    %44 = vector.load %arg2[%c288, %c0_25] : memref<952x128xf32, #tpu.memory_space<vmem>>, vector<32x8xf32>
    %cst_26 = arith.constant dense<0.000000e+00> : vector<32x8xf32>
    %45 = tpu.matmul %0, %44, %cst_26 {dimension_numbers = #tpu.dot_dimension_numbers<[1], [0], [0], [1], [0, 0, 1, 1], [], []>} : vector<32x32xf32>, vector<32x8xf32>, vector<32x8xf32> -> vector<32x8xf32>
    %c9 = arith.constant 9 : index
    %c0_27 = arith.constant 0 : index
    %46 = vector.load %arg3[%c9, %c0_27] : memref<24x128xf32, #tpu.memory_space<vmem>>, vector<1x8xf32>
    %47 = vector.broadcast %46 : vector<1x8xf32> to vector<32x8xf32>
    %48 = arith.addf %45, %47 : vector<32x8xf32>
    %49 = tpu.transpose %43, [1, 0] : vector<32x8xf32> -> vector<8x32xf32>
    %cst_28 = arith.constant dense<0.000000e+00> : vector<32x32xf32>
    %50 = tpu.matmul %38, %49, %cst_28 {dimension_numbers = #tpu.dot_dimension_numbers<[1], [0], [0], [1], [0, 0, 1, 1], [], []>} : vector<32x8xf32>, vector<8x32xf32>, vector<32x32xf32> -> vector<32x32xf32>
    %cst_29 = arith.constant 0.353553385 : f32
    %51 = vector.broadcast %cst_29 : f32 to vector<32x32xf32>
    %52 = arith.mulf %50, %51 : vector<32x32xf32>
    %53 = arith.addf %52, %1 : vector<32x32xf32>
    %cst_30 = arith.constant dense<0xFF800000> : vector<32xf32>
    %54 = vector.multi_reduction <maximumf>, %53, %cst_30 [1] : vector<32x32xf32> to vector<32xf32>
    %cst_31 = arith.constant 0xFF800000 : f32
    %55 = vector.broadcast %cst_31 : f32 to vector<32xf32>
    %56 = arith.maximumf %55, %54 : vector<32xf32>
    %57 = vector.shape_cast %56 : vector<32xf32> to vector<32x1xf32>
    %58 = vector.broadcast %57 : vector<32x1xf32> to vector<32x32xf32>
    %59 = arith.subf %53, %58 : vector<32x32xf32>
    %60 = math.exp %59 : vector<32x32xf32>
    %cst_32 = arith.constant dense<0.000000e+00> : vector<32xf32>
    %61 = vector.multi_reduction <add>, %60, %cst_32 [1] : vector<32x32xf32> to vector<32xf32>
    %62 = vector.shape_cast %61 : vector<32xf32> to vector<32x1xf32>
    %63 = vector.broadcast %62 : vector<32x1xf32> to vector<32x32xf32>
    %64 = arith.divf %60, %63 : vector<32x32xf32>
    %cst_33 = arith.constant dense<0.000000e+00> : vector<32x8xf32>
    %65 = tpu.matmul %64, %48, %cst_33 {dimension_numbers = #tpu.dot_dimension_numbers<[1], [0], [0], [1], [0, 0, 1, 1], [], []>} : vector<32x32xf32>, vector<32x8xf32>, vector<32x8xf32> -> vector<32x8xf32>
    %c64 = arith.constant 64 : index
    %c0_34 = arith.constant 0 : index
    %66 = vector.load %arg2[%c64, %c0_34] : memref<952x128xf32, #tpu.memory_space<vmem>>, vector<32x8xf32>
    %cst_35 = arith.constant dense<0.000000e+00> : vector<32x8xf32>
    %67 = tpu.matmul %0, %66, %cst_35 {dimension_numbers = #tpu.dot_dimension_numbers<[1], [0], [0], [1], [0, 0, 1, 1], [], []>} : vector<32x32xf32>, vector<32x8xf32>, vector<32x8xf32> -> vector<32x8xf32>
    %c2 = arith.constant 2 : index
    %c0_36 = arith.constant 0 : index
    %68 = vector.load %arg3[%c2, %c0_36] : memref<24x128xf32, #tpu.memory_space<vmem>>, vector<1x8xf32>
    %69 = vector.broadcast %68 : vector<1x8xf32> to vector<32x8xf32>
    %70 = arith.addf %67, %69 : vector<32x8xf32>
    %c192 = arith.constant 192 : index
    %c0_37 = arith.constant 0 : index
    %71 = vector.load %arg2[%c192, %c0_37] : memref<952x128xf32, #tpu.memory_space<vmem>>, vector<32x8xf32>
    %cst_38 = arith.constant dense<0.000000e+00> : vector<32x8xf32>
    %72 = tpu.matmul %0, %71, %cst_38 {dimension_numbers = #tpu.dot_dimension_numbers<[1], [0], [0], [1], [0, 0, 1, 1], [], []>} : vector<32x32xf32>, vector<32x8xf32>, vector<32x8xf32> -> vector<32x8xf32>
    %c6 = arith.constant 6 : index
    %c0_39 = arith.constant 0 : index
    %73 = vector.load %arg3[%c6, %c0_39] : memref<24x128xf32, #tpu.memory_space<vmem>>, vector<1x8xf32>
    %74 = vector.broadcast %73 : vector<1x8xf32> to vector<32x8xf32>
    %75 = arith.addf %72, %74 : vector<32x8xf32>
    %c320 = arith.constant 320 : index
    %c0_40 = arith.constant 0 : index
    %76 = vector.load %arg2[%c320, %c0_40] : memref<952x128xf32, #tpu.memory_space<vmem>>, vector<32x8xf32>
    %cst_41 = arith.constant dense<0.000000e+00> : vector<32x8xf32>
    %77 = tpu.matmul %0, %76, %cst_41 {dimension_numbers = #tpu.dot_dimension_numbers<[1], [0], [0], [1], [0, 0, 1, 1], [], []>} : vector<32x32xf32>, vector<32x8xf32>, vector<32x8xf32> -> vector<32x8xf32>
    %c10 = arith.constant 10 : index
    %c0_42 = arith.constant 0 : index
    %78 = vector.load %arg3[%c10, %c0_42] : memref<24x128xf32, #tpu.memory_space<vmem>>, vector<1x8xf32>
    %79 = vector.broadcast %78 : vector<1x8xf32> to vector<32x8xf32>
    %80 = arith.addf %77, %79 : vector<32x8xf32>
    %81 = tpu.transpose %75, [1, 0] : vector<32x8xf32> -> vector<8x32xf32>
    %cst_43 = arith.constant dense<0.000000e+00> : vector<32x32xf32>
    %82 = tpu.matmul %70, %81, %cst_43 {dimension_numbers = #tpu.dot_dimension_numbers<[1], [0], [0], [1], [0, 0, 1, 1], [], []>} : vector<32x8xf32>, vector<8x32xf32>, vector<32x32xf32> -> vector<32x32xf32>
    %cst_44 = arith.constant 0.353553385 : f32
    %83 = vector.broadcast %cst_44 : f32 to vector<32x32xf32>
    %84 = arith.mulf %82, %83 : vector<32x32xf32>
    %85 = arith.addf %84, %1 : vector<32x32xf32>
    %cst_45 = arith.constant dense<0xFF800000> : vector<32xf32>
    %86 = vector.multi_reduction <maximumf>, %85, %cst_45 [1] : vector<32x32xf32> to vector<32xf32>
    %cst_46 = arith.constant 0xFF800000 : f32
    %87 = vector.broadcast %cst_46 : f32 to vector<32xf32>
    %88 = arith.maximumf %87, %86 : vector<32xf32>
    %89 = vector.shape_cast %88 : vector<32xf32> to vector<32x1xf32>
    %90 = vector.broadcast %89 : vector<32x1xf32> to vector<32x32xf32>
    %91 = arith.subf %85, %90 : vector<32x32xf32>
    %92 = math.exp %91 : vector<32x32xf32>
    %cst_47 = arith.constant dense<0.000000e+00> : vector<32xf32>
    %93 = vector.multi_reduction <add>, %92, %cst_47 [1] : vector<32x32xf32> to vector<32xf32>
    %94 = vector.shape_cast %93 : vector<32xf32> to vector<32x1xf32>
    %95 = vector.broadcast %94 : vector<32x1xf32> to vector<32x32xf32>
    %96 = arith.divf %92, %95 : vector<32x32xf32>
    %cst_48 = arith.constant dense<0.000000e+00> : vector<32x8xf32>
    %97 = tpu.matmul %96, %80, %cst_48 {dimension_numbers = #tpu.dot_dimension_numbers<[1], [0], [0], [1], [0, 0, 1, 1], [], []>} : vector<32x32xf32>, vector<32x8xf32>, vector<32x8xf32> -> vector<32x8xf32>
    %c96 = arith.constant 96 : index
    %c0_49 = arith.constant 0 : index
    %98 = vector.load %arg2[%c96, %c0_49] : memref<952x128xf32, #tpu.memory_space<vmem>>, vector<32x8xf32>
    %cst_50 = arith.constant dense<0.000000e+00> : vector<32x8xf32>
    %99 = tpu.matmul %0, %98, %cst_50 {dimension_numbers = #tpu.dot_dimension_numbers<[1], [0], [0], [1], [0, 0, 1, 1], [], []>} : vector<32x32xf32>, vector<32x8xf32>, vector<32x8xf32> -> vector<32x8xf32>
    %c3 = arith.constant 3 : index
    %c0_51 = arith.constant 0 : index
    %100 = vector.load %arg3[%c3, %c0_51] : memref<24x128xf32, #tpu.memory_space<vmem>>, vector<1x8xf32>
    %101 = vector.broadcast %100 : vector<1x8xf32> to vector<32x8xf32>
    %102 = arith.addf %99, %101 : vector<32x8xf32>
    %c224 = arith.constant 224 : index
    %c0_52 = arith.constant 0 : index
    %103 = vector.load %arg2[%c224, %c0_52] : memref<952x128xf32, #tpu.memory_space<vmem>>, vector<32x8xf32>
    %cst_53 = arith.constant dense<0.000000e+00> : vector<32x8xf32>
    %104 = tpu.matmul %0, %103, %cst_53 {dimension_numbers = #tpu.dot_dimension_numbers<[1], [0], [0], [1], [0, 0, 1, 1], [], []>} : vector<32x32xf32>, vector<32x8xf32>, vector<32x8xf32> -> vector<32x8xf32>
    %c7 = arith.constant 7 : index
    %c0_54 = arith.constant 0 : index
    %105 = vector.load %arg3[%c7, %c0_54] : memref<24x128xf32, #tpu.memory_space<vmem>>, vector<1x8xf32>
    %106 = vector.broadcast %105 : vector<1x8xf32> to vector<32x8xf32>
    %107 = arith.addf %104, %106 : vector<32x8xf32>
    %c352 = arith.constant 352 : index
    %c0_55 = arith.constant 0 : index
    %108 = vector.load %arg2[%c352, %c0_55] : memref<952x128xf32, #tpu.memory_space<vmem>>, vector<32x8xf32>
    %cst_56 = arith.constant dense<0.000000e+00> : vector<32x8xf32>
    %109 = tpu.matmul %0, %108, %cst_56 {dimension_numbers = #tpu.dot_dimension_numbers<[1], [0], [0], [1], [0, 0, 1, 1], [], []>} : vector<32x32xf32>, vector<32x8xf32>, vector<32x8xf32> -> vector<32x8xf32>
    %c11 = arith.constant 11 : index
    %c0_57 = arith.constant 0 : index
    %110 = vector.load %arg3[%c11, %c0_57] : memref<24x128xf32, #tpu.memory_space<vmem>>, vector<1x8xf32>
    %111 = vector.broadcast %110 : vector<1x8xf32> to vector<32x8xf32>
    %112 = arith.addf %109, %111 : vector<32x8xf32>
    %113 = tpu.transpose %107, [1, 0] : vector<32x8xf32> -> vector<8x32xf32>
    %cst_58 = arith.constant dense<0.000000e+00> : vector<32x32xf32>
    %114 = tpu.matmul %102, %113, %cst_58 {dimension_numbers = #tpu.dot_dimension_numbers<[1], [0], [0], [1], [0, 0, 1, 1], [], []>} : vector<32x8xf32>, vector<8x32xf32>, vector<32x32xf32> -> vector<32x32xf32>
    %cst_59 = arith.constant 0.353553385 : f32
    %115 = vector.broadcast %cst_59 : f32 to vector<32x32xf32>
    %116 = arith.mulf %114, %115 : vector<32x32xf32>
    %117 = arith.addf %116, %1 : vector<32x32xf32>
    %cst_60 = arith.constant dense<0xFF800000> : vector<32xf32>
    %118 = vector.multi_reduction <maximumf>, %117, %cst_60 [1] : vector<32x32xf32> to vector<32xf32>
    %cst_61 = arith.constant 0xFF800000 : f32
    %119 = vector.broadcast %cst_61 : f32 to vector<32xf32>
    %120 = arith.maximumf %119, %118 : vector<32xf32>
    %121 = vector.shape_cast %120 : vector<32xf32> to vector<32x1xf32>
    %122 = vector.broadcast %121 : vector<32x1xf32> to vector<32x32xf32>
    %123 = arith.subf %117, %122 : vector<32x32xf32>
    %124 = math.exp %123 : vector<32x32xf32>
    %cst_62 = arith.constant dense<0.000000e+00> : vector<32xf32>
    %125 = vector.multi_reduction <add>, %124, %cst_62 [1] : vector<32x32xf32> to vector<32xf32>
    %126 = vector.shape_cast %125 : vector<32xf32> to vector<32x1xf32>
    %127 = vector.broadcast %126 : vector<32x1xf32> to vector<32x32xf32>
    %128 = arith.divf %124, %127 : vector<32x32xf32>
    %cst_63 = arith.constant dense<0.000000e+00> : vector<32x8xf32>
    %129 = tpu.matmul %128, %112, %cst_63 {dimension_numbers = #tpu.dot_dimension_numbers<[1], [0], [0], [1], [0, 0, 1, 1], [], []>} : vector<32x32xf32>, vector<32x8xf32>, vector<32x8xf32> -> vector<32x8xf32>
    %130 = tpu.concatenate %33, %65, %97, %129 in 1 : vector<32x8xf32>, vector<32x8xf32>, vector<32x8xf32>, vector<32x8xf32> -> vector<32x32xf32>
    %c384 = arith.constant 384 : index
    %c0_64 = arith.constant 0 : index
    %131 = vector.load %arg2[%c384, %c0_64] : memref<952x128xf32, #tpu.memory_space<vmem>>, vector<32x32xf32>
    %cst_65 = arith.constant dense<0.000000e+00> : vector<32x32xf32>
    %132 = tpu.matmul %130, %131, %cst_65 {dimension_numbers = #tpu.dot_dimension_numbers<[1], [0], [0], [1], [0, 0, 1, 1], [], []>} : vector<32x32xf32>, vector<32x32xf32>, vector<32x32xf32> -> vector<32x32xf32>
    %c12 = arith.constant 12 : index
    %c0_66 = arith.constant 0 : index
    %133 = vector.load %arg3[%c12, %c0_66] : memref<24x128xf32, #tpu.memory_space<vmem>>, vector<1x32xf32>
    %134 = vector.broadcast %133 : vector<1x32xf32> to vector<32x32xf32>
    %135 = arith.addf %132, %134 : vector<32x32xf32>
    %136 = arith.addf %0, %135 : vector<32x32xf32>
    %cst_67 = arith.constant dense<0.000000e+00> : vector<32xf32>
    %137 = vector.multi_reduction <add>, %136, %cst_67 [1] : vector<32x32xf32> to vector<32xf32>
    %138 = vector.shape_cast %137 : vector<32xf32> to vector<32x1xf32>
    %cst_68 = arith.constant 3.200000e+01 : f32
    %139 = vector.broadcast %cst_68 : f32 to vector<32x1xf32>
    %140 = arith.divf %138, %139 : vector<32x1xf32>
    %141 = vector.broadcast %140 : vector<32x1xf32> to vector<32x32xf32>
    %142 = arith.subf %136, %141 : vector<32x32xf32>
    %143 = arith.mulf %142, %142 : vector<32x32xf32>
    %cst_69 = arith.constant dense<0.000000e+00> : vector<32xf32>
    %144 = vector.multi_reduction <add>, %143, %cst_69 [1] : vector<32x32xf32> to vector<32xf32>
    %145 = vector.shape_cast %144 : vector<32xf32> to vector<32x1xf32>
    %cst_70 = arith.constant 3.200000e+01 : f32
    %146 = vector.broadcast %cst_70 : f32 to vector<32x1xf32>
    %147 = arith.divf %145, %146 : vector<32x1xf32>
    %148 = vector.broadcast %140 : vector<32x1xf32> to vector<32x32xf32>
    %149 = arith.subf %136, %148 : vector<32x32xf32>
    %cst_71 = arith.constant 9.99999974E-6 : f32
    %150 = vector.broadcast %cst_71 : f32 to vector<32x1xf32>
    %151 = arith.addf %147, %150 : vector<32x1xf32>
    %152 = math.rsqrt %151 : vector<32x1xf32>
    %153 = vector.broadcast %152 : vector<32x1xf32> to vector<32x32xf32>
    %154 = arith.mulf %149, %153 : vector<32x32xf32>
    %c13 = arith.constant 13 : index
    %c0_72 = arith.constant 0 : index
    %155 = vector.load %arg3[%c13, %c0_72] : memref<24x128xf32, #tpu.memory_space<vmem>>, vector<1x32xf32>
    %156 = vector.broadcast %155 : vector<1x32xf32> to vector<32x32xf32>
    %157 = arith.mulf %154, %156 : vector<32x32xf32>
    %c14 = arith.constant 14 : index
    %c0_73 = arith.constant 0 : index
    %158 = vector.load %arg3[%c14, %c0_73] : memref<24x128xf32, #tpu.memory_space<vmem>>, vector<1x32xf32>
    %159 = vector.broadcast %158 : vector<1x32xf32> to vector<32x32xf32>
    %160 = arith.addf %157, %159 : vector<32x32xf32>
    %161 = vector.extract_strided_slice %160 {offsets = [0, 0], sizes = [16, 32], strides = [1, 1]} : vector<32x32xf32> to vector<16x32xf32>
    %162 = vector.extract_strided_slice %161 {offsets = [0, 0], sizes = [1, 32], strides = [1, 1]} : vector<16x32xf32> to vector<1x32xf32>
    %163 = vector.extract_strided_slice %160 {offsets = [16, 0], sizes = [16, 32], strides = [1, 1]} : vector<32x32xf32> to vector<16x32xf32>
    %164 = vector.extract_strided_slice %163 {offsets = [0, 0], sizes = [1, 32], strides = [1, 1]} : vector<16x32xf32> to vector<1x32xf32>
    %165 = tpu.concatenate %162, %164 in 0 : vector<1x32xf32>, vector<1x32xf32> -> vector<2x32xf32>
    %166 = vector.extract_strided_slice %160 {offsets = [0, 0], sizes = [16, 32], strides = [1, 1]} : vector<32x32xf32> to vector<16x32xf32>
    %cst_74 = arith.constant dense<0.000000e+00> : vector<32xf32>
    %167 = vector.multi_reduction <add>, %166, %cst_74 [0] : vector<16x32xf32> to vector<32xf32>
    %168 = vector.shape_cast %167 : vector<32xf32> to vector<1x32xf32>
    %cst_75 = arith.constant 1.600000e+01 : f32
    %169 = vector.broadcast %cst_75 : f32 to vector<1x32xf32>
    %170 = arith.divf %168, %169 : vector<1x32xf32>
    %171 = vector.extract_strided_slice %160 {offsets = [16, 0], sizes = [16, 32], strides = [1, 1]} : vector<32x32xf32> to vector<16x32xf32>
    %cst_76 = arith.constant dense<0.000000e+00> : vector<32xf32>
    %172 = vector.multi_reduction <add>, %171, %cst_76 [0] : vector<16x32xf32> to vector<32xf32>
    %173 = vector.shape_cast %172 : vector<32xf32> to vector<1x32xf32>
    %cst_77 = arith.constant 1.600000e+01 : f32
    %174 = vector.broadcast %cst_77 : f32 to vector<1x32xf32>
    %175 = arith.divf %173, %174 : vector<1x32xf32>
    %176 = tpu.concatenate %170, %175 in 0 : vector<1x32xf32>, vector<1x32xf32> -> vector<2x32xf32>
    %177 = vector.extract_strided_slice %160 {offsets = [0, 0], sizes = [16, 32], strides = [1, 1]} : vector<32x32xf32> to vector<16x32xf32>
    %cst_78 = arith.constant dense<0xFF800000> : vector<32xf32>
    %178 = vector.multi_reduction <maximumf>, %177, %cst_78 [0] : vector<16x32xf32> to vector<32xf32>
    %179 = vector.shape_cast %178 : vector<32xf32> to vector<1x32xf32>
    %180 = vector.extract_strided_slice %160 {offsets = [16, 0], sizes = [16, 32], strides = [1, 1]} : vector<32x32xf32> to vector<16x32xf32>
    %cst_79 = arith.constant dense<0xFF800000> : vector<32xf32>
    %181 = vector.multi_reduction <maximumf>, %180, %cst_79 [0] : vector<16x32xf32> to vector<32xf32>
    %182 = vector.shape_cast %181 : vector<32xf32> to vector<1x32xf32>
    %183 = tpu.concatenate %179, %182 in 0 : vector<1x32xf32>, vector<1x32xf32> -> vector<2x32xf32>
    %184 = tpu.iota {dimensions = array<i32: 0>} : vector<32x1xi32>
    %c15_i32 = arith.constant 15 : i32
    %185 = vector.broadcast %c15_i32 : i32 to vector<32x1xi32>
    %186 = arith.andi %184, %185 : vector<32x1xi32>
    %cst_80 = arith.constant 0.000000e+00 : f32
    %187 = vector.broadcast %cst_80 : f32 to vector<32x8xf32>
    %c416 = arith.constant 416 : index
    %c0_81 = arith.constant 0 : index
    %188 = vector.load %arg2[%c416, %c0_81] : memref<952x128xf32, #tpu.memory_space<vmem>>, vector<32x8xf32>
    %cst_82 = arith.constant dense<0.000000e+00> : vector<32x8xf32>
    %189 = tpu.matmul %160, %188, %cst_82 {dimension_numbers = #tpu.dot_dimension_numbers<[1], [0], [0], [1], [0, 0, 1, 1], [], []>} : vector<32x32xf32>, vector<32x8xf32>, vector<32x8xf32> -> vector<32x8xf32>
    %190 = arith.addf %187, %189 : vector<32x8xf32>
    %c448 = arith.constant 448 : index
    %c0_83 = arith.constant 0 : index
    %191 = vector.load %arg2[%c448, %c0_83] : memref<952x128xf32, #tpu.memory_space<vmem>>, vector<32x8xf32>
    %cst_84 = arith.constant dense<0.000000e+00> : vector<32x8xf32>
    %192 = tpu.matmul %160, %191, %cst_84 {dimension_numbers = #tpu.dot_dimension_numbers<[1], [0], [0], [1], [0, 0, 1, 1], [], []>} : vector<32x32xf32>, vector<32x8xf32>, vector<32x8xf32> -> vector<32x8xf32>
    %c31_i32 = arith.constant 31 : i32
    %193 = tpu.dynamic_rotate %192 by %c31_i32 dim 0 : vector<32x8xf32>, i32 -> vector<32x8xf32>
    %194 = arith.addf %190, %193 : vector<32x8xf32>
    %c480 = arith.constant 480 : index
    %c0_85 = arith.constant 0 : index
    %195 = vector.load %arg2[%c480, %c0_85] : memref<952x128xf32, #tpu.memory_space<vmem>>, vector<32x8xf32>
    %cst_86 = arith.constant dense<0.000000e+00> : vector<32x8xf32>
    %196 = tpu.matmul %160, %195, %cst_86 {dimension_numbers = #tpu.dot_dimension_numbers<[1], [0], [0], [1], [0, 0, 1, 1], [], []>} : vector<32x32xf32>, vector<32x8xf32>, vector<32x8xf32> -> vector<32x8xf32>
    %c30_i32 = arith.constant 30 : i32
    %197 = tpu.dynamic_rotate %196 by %c30_i32 dim 0 : vector<32x8xf32>, i32 -> vector<32x8xf32>
    %198 = arith.addf %194, %197 : vector<32x8xf32>
    %c15 = arith.constant 15 : index
    %c0_87 = arith.constant 0 : index
    %199 = vector.load %arg3[%c15, %c0_87] : memref<24x128xf32, #tpu.memory_space<vmem>>, vector<1x8xf32>
    %200 = vector.broadcast %199 : vector<1x8xf32> to vector<32x8xf32>
    %201 = arith.addf %198, %200 : vector<32x8xf32>
    %cst_88 = arith.constant 0.000000e+00 : f32
    %202 = vector.broadcast %cst_88 : f32 to vector<32x8xf32>
    %203 = arith.maximumf %201, %202 : vector<32x8xf32>
    %c13_i32 = arith.constant 13 : i32
    %204 = vector.broadcast %c13_i32 : i32 to vector<32x1xi32>
    %205 = arith.cmpi sle, %186, %204 : vector<32x1xi32>
    %206 = arith.extui %205 : vector<32x1xi1> to vector<32x1xi32>
    %207 = arith.sitofp %206 : vector<32x1xi32> to vector<32x1xf32>
    %208 = vector.broadcast %207 : vector<32x1xf32> to vector<32x8xf32>
    %209 = arith.mulf %203, %208 : vector<32x8xf32>
    %210 = vector.extract_strided_slice %209 {offsets = [0, 0], sizes = [16, 8], strides = [1, 1]} : vector<32x8xf32> to vector<16x8xf32>
    %cst_89 = arith.constant dense<0xFF800000> : vector<8xf32>
    %211 = vector.multi_reduction <maximumf>, %210, %cst_89 [0] : vector<16x8xf32> to vector<8xf32>
    %212 = vector.shape_cast %211 : vector<8xf32> to vector<1x8xf32>
    %213 = vector.extract_strided_slice %209 {offsets = [16, 0], sizes = [16, 8], strides = [1, 1]} : vector<32x8xf32> to vector<16x8xf32>
    %cst_90 = arith.constant dense<0xFF800000> : vector<8xf32>
    %214 = vector.multi_reduction <maximumf>, %213, %cst_90 [0] : vector<16x8xf32> to vector<8xf32>
    %215 = vector.shape_cast %214 : vector<8xf32> to vector<1x8xf32>
    %216 = tpu.concatenate %212, %215 in 0 : vector<1x8xf32>, vector<1x8xf32> -> vector<2x8xf32>
    %cst_91 = arith.constant 0.000000e+00 : f32
    %217 = vector.broadcast %cst_91 : f32 to vector<32x8xf32>
    %c512 = arith.constant 512 : index
    %c0_92 = arith.constant 0 : index
    %218 = vector.load %arg2[%c512, %c0_92] : memref<952x128xf32, #tpu.memory_space<vmem>>, vector<32x8xf32>
    %cst_93 = arith.constant dense<0.000000e+00> : vector<32x8xf32>
    %219 = tpu.matmul %160, %218, %cst_93 {dimension_numbers = #tpu.dot_dimension_numbers<[1], [0], [0], [1], [0, 0, 1, 1], [], []>} : vector<32x32xf32>, vector<32x8xf32>, vector<32x8xf32> -> vector<32x8xf32>
    %220 = arith.addf %217, %219 : vector<32x8xf32>
    %c544 = arith.constant 544 : index
    %c0_94 = arith.constant 0 : index
    %221 = vector.load %arg2[%c544, %c0_94] : memref<952x128xf32, #tpu.memory_space<vmem>>, vector<32x8xf32>
    %cst_95 = arith.constant dense<0.000000e+00> : vector<32x8xf32>
    %222 = tpu.matmul %160, %221, %cst_95 {dimension_numbers = #tpu.dot_dimension_numbers<[1], [0], [0], [1], [0, 0, 1, 1], [], []>} : vector<32x32xf32>, vector<32x8xf32>, vector<32x8xf32> -> vector<32x8xf32>
    %c31_i32_96 = arith.constant 31 : i32
    %223 = tpu.dynamic_rotate %222 by %c31_i32_96 dim 0 : vector<32x8xf32>, i32 -> vector<32x8xf32>
    %224 = arith.addf %220, %223 : vector<32x8xf32>
    %c576 = arith.constant 576 : index
    %c0_97 = arith.constant 0 : index
    %225 = vector.load %arg2[%c576, %c0_97] : memref<952x128xf32, #tpu.memory_space<vmem>>, vector<32x8xf32>
    %cst_98 = arith.constant dense<0.000000e+00> : vector<32x8xf32>
    %226 = tpu.matmul %160, %225, %cst_98 {dimension_numbers = #tpu.dot_dimension_numbers<[1], [0], [0], [1], [0, 0, 1, 1], [], []>} : vector<32x32xf32>, vector<32x8xf32>, vector<32x8xf32> -> vector<32x8xf32>
    %c30_i32_99 = arith.constant 30 : i32
    %227 = tpu.dynamic_rotate %226 by %c30_i32_99 dim 0 : vector<32x8xf32>, i32 -> vector<32x8xf32>
    %228 = arith.addf %224, %227 : vector<32x8xf32>
    %c608 = arith.constant 608 : index
    %c0_100 = arith.constant 0 : index
    %229 = vector.load %arg2[%c608, %c0_100] : memref<952x128xf32, #tpu.memory_space<vmem>>, vector<32x8xf32>
    %cst_101 = arith.constant dense<0.000000e+00> : vector<32x8xf32>
    %230 = tpu.matmul %160, %229, %cst_101 {dimension_numbers = #tpu.dot_dimension_numbers<[1], [0], [0], [1], [0, 0, 1, 1], [], []>} : vector<32x32xf32>, vector<32x8xf32>, vector<32x8xf32> -> vector<32x8xf32>
    %c29_i32 = arith.constant 29 : i32
    %231 = tpu.dynamic_rotate %230 by %c29_i32 dim 0 : vector<32x8xf32>, i32 -> vector<32x8xf32>
    %232 = arith.addf %228, %231 : vector<32x8xf32>
    %c16 = arith.constant 16 : index
    %c0_102 = arith.constant 0 : index
    %233 = vector.load %arg3[%c16, %c0_102] : memref<24x128xf32, #tpu.memory_space<vmem>>, vector<1x8xf32>
    %234 = vector.broadcast %233 : vector<1x8xf32> to vector<32x8xf32>
    %235 = arith.addf %232, %234 : vector<32x8xf32>
    %cst_103 = arith.constant 0.000000e+00 : f32
    %236 = vector.broadcast %cst_103 : f32 to vector<32x8xf32>
    %237 = arith.maximumf %235, %236 : vector<32x8xf32>
    %c12_i32 = arith.constant 12 : i32
    %238 = vector.broadcast %c12_i32 : i32 to vector<32x1xi32>
    %239 = arith.cmpi sle, %186, %238 : vector<32x1xi32>
    %240 = arith.extui %239 : vector<32x1xi1> to vector<32x1xi32>
    %241 = arith.sitofp %240 : vector<32x1xi32> to vector<32x1xf32>
    %242 = vector.broadcast %241 : vector<32x1xf32> to vector<32x8xf32>
    %243 = arith.mulf %237, %242 : vector<32x8xf32>
    %244 = vector.extract_strided_slice %243 {offsets = [0, 0], sizes = [16, 8], strides = [1, 1]} : vector<32x8xf32> to vector<16x8xf32>
    %cst_104 = arith.constant dense<0xFF800000> : vector<8xf32>
    %245 = vector.multi_reduction <maximumf>, %244, %cst_104 [0] : vector<16x8xf32> to vector<8xf32>
    %246 = vector.shape_cast %245 : vector<8xf32> to vector<1x8xf32>
    %247 = vector.extract_strided_slice %243 {offsets = [16, 0], sizes = [16, 8], strides = [1, 1]} : vector<32x8xf32> to vector<16x8xf32>
    %cst_105 = arith.constant dense<0xFF800000> : vector<8xf32>
    %248 = vector.multi_reduction <maximumf>, %247, %cst_105 [0] : vector<16x8xf32> to vector<8xf32>
    %249 = vector.shape_cast %248 : vector<8xf32> to vector<1x8xf32>
    %250 = tpu.concatenate %246, %249 in 0 : vector<1x8xf32>, vector<1x8xf32> -> vector<2x8xf32>
    %cst_106 = arith.constant 0.000000e+00 : f32
    %251 = vector.broadcast %cst_106 : f32 to vector<32x8xf32>
    %c640 = arith.constant 640 : index
    %c0_107 = arith.constant 0 : index
    %252 = vector.load %arg2[%c640, %c0_107] : memref<952x128xf32, #tpu.memory_space<vmem>>, vector<32x8xf32>
    %cst_108 = arith.constant dense<0.000000e+00> : vector<32x8xf32>
    %253 = tpu.matmul %160, %252, %cst_108 {dimension_numbers = #tpu.dot_dimension_numbers<[1], [0], [0], [1], [0, 0, 1, 1], [], []>} : vector<32x32xf32>, vector<32x8xf32>, vector<32x8xf32> -> vector<32x8xf32>
    %254 = arith.addf %251, %253 : vector<32x8xf32>
    %c672 = arith.constant 672 : index
    %c0_109 = arith.constant 0 : index
    %255 = vector.load %arg2[%c672, %c0_109] : memref<952x128xf32, #tpu.memory_space<vmem>>, vector<32x8xf32>
    %cst_110 = arith.constant dense<0.000000e+00> : vector<32x8xf32>
    %256 = tpu.matmul %160, %255, %cst_110 {dimension_numbers = #tpu.dot_dimension_numbers<[1], [0], [0], [1], [0, 0, 1, 1], [], []>} : vector<32x32xf32>, vector<32x8xf32>, vector<32x8xf32> -> vector<32x8xf32>
    %c31_i32_111 = arith.constant 31 : i32
    %257 = tpu.dynamic_rotate %256 by %c31_i32_111 dim 0 : vector<32x8xf32>, i32 -> vector<32x8xf32>
    %258 = arith.addf %254, %257 : vector<32x8xf32>
    %c704 = arith.constant 704 : index
    %c0_112 = arith.constant 0 : index
    %259 = vector.load %arg2[%c704, %c0_112] : memref<952x128xf32, #tpu.memory_space<vmem>>, vector<32x8xf32>
    %cst_113 = arith.constant dense<0.000000e+00> : vector<32x8xf32>
    %260 = tpu.matmul %160, %259, %cst_113 {dimension_numbers = #tpu.dot_dimension_numbers<[1], [0], [0], [1], [0, 0, 1, 1], [], []>} : vector<32x32xf32>, vector<32x8xf32>, vector<32x8xf32> -> vector<32x8xf32>
    %c30_i32_114 = arith.constant 30 : i32
    %261 = tpu.dynamic_rotate %260 by %c30_i32_114 dim 0 : vector<32x8xf32>, i32 -> vector<32x8xf32>
    %262 = arith.addf %258, %261 : vector<32x8xf32>
    %c736 = arith.constant 736 : index
    %c0_115 = arith.constant 0 : index
    %263 = vector.load %arg2[%c736, %c0_115] : memref<952x128xf32, #tpu.memory_space<vmem>>, vector<32x8xf32>
    %cst_116 = arith.constant dense<0.000000e+00> : vector<32x8xf32>
    %264 = tpu.matmul %160, %263, %cst_116 {dimension_numbers = #tpu.dot_dimension_numbers<[1], [0], [0], [1], [0, 0, 1, 1], [], []>} : vector<32x32xf32>, vector<32x8xf32>, vector<32x8xf32> -> vector<32x8xf32>
    %c29_i32_117 = arith.constant 29 : i32
    %265 = tpu.dynamic_rotate %264 by %c29_i32_117 dim 0 : vector<32x8xf32>, i32 -> vector<32x8xf32>
    %266 = arith.addf %262, %265 : vector<32x8xf32>
    %c768 = arith.constant 768 : index
    %c0_118 = arith.constant 0 : index
    %267 = vector.load %arg2[%c768, %c0_118] : memref<952x128xf32, #tpu.memory_space<vmem>>, vector<32x8xf32>
    %cst_119 = arith.constant dense<0.000000e+00> : vector<32x8xf32>
    %268 = tpu.matmul %160, %267, %cst_119 {dimension_numbers = #tpu.dot_dimension_numbers<[1], [0], [0], [1], [0, 0, 1, 1], [], []>} : vector<32x32xf32>, vector<32x8xf32>, vector<32x8xf32> -> vector<32x8xf32>
    %c28_i32 = arith.constant 28 : i32
    %269 = tpu.dynamic_rotate %268 by %c28_i32 dim 0 : vector<32x8xf32>, i32 -> vector<32x8xf32>
    %270 = arith.addf %266, %269 : vector<32x8xf32>
    %c17 = arith.constant 17 : index
    %c0_120 = arith.constant 0 : index
    %271 = vector.load %arg3[%c17, %c0_120] : memref<24x128xf32, #tpu.memory_space<vmem>>, vector<1x8xf32>
    %272 = vector.broadcast %271 : vector<1x8xf32> to vector<32x8xf32>
    %273 = arith.addf %270, %272 : vector<32x8xf32>
    %cst_121 = arith.constant 0.000000e+00 : f32
    %274 = vector.broadcast %cst_121 : f32 to vector<32x8xf32>
    %275 = arith.maximumf %273, %274 : vector<32x8xf32>
    %c11_i32 = arith.constant 11 : i32
    %276 = vector.broadcast %c11_i32 : i32 to vector<32x1xi32>
    %277 = arith.cmpi sle, %186, %276 : vector<32x1xi32>
    %278 = arith.extui %277 : vector<32x1xi1> to vector<32x1xi32>
    %279 = arith.sitofp %278 : vector<32x1xi32> to vector<32x1xf32>
    %280 = vector.broadcast %279 : vector<32x1xf32> to vector<32x8xf32>
    %281 = arith.mulf %275, %280 : vector<32x8xf32>
    %282 = vector.extract_strided_slice %281 {offsets = [0, 0], sizes = [16, 8], strides = [1, 1]} : vector<32x8xf32> to vector<16x8xf32>
    %cst_122 = arith.constant dense<0xFF800000> : vector<8xf32>
    %283 = vector.multi_reduction <maximumf>, %282, %cst_122 [0] : vector<16x8xf32> to vector<8xf32>
    %284 = vector.shape_cast %283 : vector<8xf32> to vector<1x8xf32>
    %285 = vector.extract_strided_slice %281 {offsets = [16, 0], sizes = [16, 8], strides = [1, 1]} : vector<32x8xf32> to vector<16x8xf32>
    %cst_123 = arith.constant dense<0xFF800000> : vector<8xf32>
    %286 = vector.multi_reduction <maximumf>, %285, %cst_123 [0] : vector<16x8xf32> to vector<8xf32>
    %287 = vector.shape_cast %286 : vector<8xf32> to vector<1x8xf32>
    %288 = tpu.concatenate %284, %287 in 0 : vector<1x8xf32>, vector<1x8xf32> -> vector<2x8xf32>
    %289 = tpu.concatenate %216, %250, %288 in 1 : vector<2x8xf32>, vector<2x8xf32>, vector<2x8xf32> -> vector<2x24xf32>
    %c800 = arith.constant 800 : index
    %c0_124 = arith.constant 0 : index
    %290 = vector.load %arg2[%c800, %c0_124] : memref<952x128xf32, #tpu.memory_space<vmem>>, vector<24x3xf32>
    %cst_125 = arith.constant dense<0.000000e+00> : vector<2x3xf32>
    %291 = tpu.matmul %289, %290, %cst_125 {dimension_numbers = #tpu.dot_dimension_numbers<[1], [0], [0], [1], [0, 0, 1, 1], [], []>} : vector<2x24xf32>, vector<24x3xf32>, vector<2x3xf32> -> vector<2x3xf32>
    %c18 = arith.constant 18 : index
    %c0_126 = arith.constant 0 : index
    %292 = vector.load %arg3[%c18, %c0_126] : memref<24x128xf32, #tpu.memory_space<vmem>>, vector<1x3xf32>
    %293 = vector.broadcast %292 : vector<1x3xf32> to vector<2x3xf32>
    %294 = arith.addf %291, %293 : vector<2x3xf32>
    %cst_127 = arith.constant 0.000000e+00 : f32
    %295 = vector.broadcast %cst_127 : f32 to vector<2x3xf32>
    %296 = arith.maximumf %294, %295 : vector<2x3xf32>
    %c824 = arith.constant 824 : index
    %c0_128 = arith.constant 0 : index
    %297 = vector.load %arg2[%c824, %c0_128] : memref<952x128xf32, #tpu.memory_space<vmem>>, vector<3x24xf32>
    %cst_129 = arith.constant dense<0.000000e+00> : vector<2x24xf32>
    %298 = tpu.matmul %296, %297, %cst_129 {dimension_numbers = #tpu.dot_dimension_numbers<[1], [0], [0], [1], [0, 0, 1, 1], [], []>} : vector<2x3xf32>, vector<3x24xf32>, vector<2x24xf32> -> vector<2x24xf32>
    %c19 = arith.constant 19 : index
    %c0_130 = arith.constant 0 : index
    %299 = vector.load %arg3[%c19, %c0_130] : memref<24x128xf32, #tpu.memory_space<vmem>>, vector<1x24xf32>
    %300 = vector.broadcast %299 : vector<1x24xf32> to vector<2x24xf32>
    %301 = arith.addf %298, %300 : vector<2x24xf32>
    %302 = arith.negf %301 : vector<2x24xf32>
    %303 = math.exp %302 : vector<2x24xf32>
    %cst_131 = arith.constant 1.000000e+00 : f32
    %304 = vector.broadcast %cst_131 : f32 to vector<2x24xf32>
    %305 = arith.addf %304, %303 : vector<2x24xf32>
    %306 = arith.divf %304, %305 : vector<2x24xf32>
    %307 = arith.mulf %289, %306 : vector<2x24xf32>
    %c832 = arith.constant 832 : index
    %c0_132 = arith.constant 0 : index
    %308 = vector.load %arg2[%c832, %c0_132] : memref<952x128xf32, #tpu.memory_space<vmem>>, vector<24x128xf32>
    %cst_133 = arith.constant dense<0.000000e+00> : vector<2x128xf32>
    %309 = tpu.matmul %307, %308, %cst_133 {dimension_numbers = #tpu.dot_dimension_numbers<[1], [0], [0], [1], [0, 0, 1, 1], [], []>} : vector<2x24xf32>, vector<24x128xf32>, vector<2x128xf32> -> vector<2x128xf32>
    %c856 = arith.constant 856 : index
    %c0_134 = arith.constant 0 : index
    %310 = vector.load %arg2[%c856, %c0_134] : memref<952x128xf32, #tpu.memory_space<vmem>>, vector<32x128xf32>
    %cst_135 = arith.constant dense<0.000000e+00> : vector<2x128xf32>
    %311 = tpu.matmul %165, %310, %cst_135 {dimension_numbers = #tpu.dot_dimension_numbers<[1], [0], [0], [1], [0, 0, 1, 1], [], []>} : vector<2x32xf32>, vector<32x128xf32>, vector<2x128xf32> -> vector<2x128xf32>
    %312 = arith.addf %309, %311 : vector<2x128xf32>
    %c888 = arith.constant 888 : index
    %c0_136 = arith.constant 0 : index
    %313 = vector.load %arg2[%c888, %c0_136] : memref<952x128xf32, #tpu.memory_space<vmem>>, vector<32x128xf32>
    %cst_137 = arith.constant dense<0.000000e+00> : vector<2x128xf32>
    %314 = tpu.matmul %176, %313, %cst_137 {dimension_numbers = #tpu.dot_dimension_numbers<[1], [0], [0], [1], [0, 0, 1, 1], [], []>} : vector<2x32xf32>, vector<32x128xf32>, vector<2x128xf32> -> vector<2x128xf32>
    %315 = arith.addf %312, %314 : vector<2x128xf32>
    %c920 = arith.constant 920 : index
    %c0_138 = arith.constant 0 : index
    %316 = vector.load %arg2[%c920, %c0_138] : memref<952x128xf32, #tpu.memory_space<vmem>>, vector<32x128xf32>
    %cst_139 = arith.constant dense<0.000000e+00> : vector<2x128xf32>
    %317 = tpu.matmul %183, %316, %cst_139 {dimension_numbers = #tpu.dot_dimension_numbers<[1], [0], [0], [1], [0, 0, 1, 1], [], []>} : vector<2x32xf32>, vector<32x128xf32>, vector<2x128xf32> -> vector<2x128xf32>
    %318 = arith.addf %315, %317 : vector<2x128xf32>
    %c20 = arith.constant 20 : index
    %c0_140 = arith.constant 0 : index
    %319 = vector.load %arg3[%c20, %c0_140] : memref<24x128xf32, #tpu.memory_space<vmem>>, vector<1x128xf32>
    %320 = vector.broadcast %319 : vector<1x128xf32> to vector<2x128xf32>
    %321 = arith.addf %318, %320 : vector<2x128xf32>
    %c0_141 = arith.constant 0 : index
    %c0_142 = arith.constant 0 : index
    %322 = vector.load %arg4[%c0_141, %c0_142] : memref<2x128xf32, #tpu.memory_space<vmem>>, vector<2x128xf32>
    tpu.vector_store %arg4[%c0_141, %c0_142], %321 {strides = array<i32>} : memref<2x128xf32, #tpu.memory_space<vmem>>, vector<2x128xf32>,
    return
  }
}

</mosaic_0001>

<bundles_post_ra>
// kernel: mbti_forward.1
= control target key start
LH: loop header
LB: loop body
LE: loop exit
PB: predicated region body
PF: predicated region fallthrough
CT: control target
= control target key end

     0   :  { %9 = vsyncpa [#allocation3], 0  ;;  %s6237_s0 = inlined_call_operand.vmem [shape: f32[32,32], index: 0, kind: input, shape index: {}]   ;;  %s6238_s1 = inlined_call_operand.vmem [shape: f32[32,32], index: 1, kind: input, shape index: {}]   ;;  %s6239_s2 = inlined_call_operand.hbm [shape: f32[952,128], index: 2, kind: input, shape index: {}]   ;;  %s6240_s3 = inlined_call_operand.hbm [shape: f32[24,128], index: 3, kind: input, shape index: {}]   ;;  %s6241_s4 = inlined_call_operand.hbm [shape: f32[2,128], index: 4, kind: output, shape index: {}]  }
   0x1   :  { %10 = vsyncpa [#allocation6], 0 }
   0x2   :  { %11 = vsyncpa [#allocation4], 0  ;;  %s5509_s15 = smov [#allocation2]  }
   0x3   :  { %s21_s16 = sshll.u32 %s5509_s15, 4  ;;  %s22_s16 = int_to_ptr.vmem [resolvable:$true] %s21_s16 }
   0x4   :  { %s5451_s17 = scalar_lea.vmem %s22_s16, 15232  ;;  %p5456_p1 = scmp.lt.s32.totalorder %s22_s16, %s22_s16 }
   0x5   :  { %p5452_p0 = scmp.ne.s32.totalorder %s22_s16, %s5451_s17  ;;  %p5457_p2 = scmp.lt.s32.totalorder %s5451_s17, %s5451_s17 }
   0x7   :  { %p5458_p3 = por %p5457_p2, %p5456_p1 }
   0x9   :  { %p5459_p4 = pnand %p5458_p3, %p5452_p0 }
   0xb   :  { %5462 = shalt.err (!%p5459_p4)
}
   0xc   :  { %s5510_s18 = smov 128   ;;  %s5511_s19 = smov 8  }
   0xd   :  { %27 = dma.hbm_to_vmem [thread:$0]  %s6239_s2, 15232, %s22_s16, [#allocation3], %s5510_s18, %s5510_s18, %s5511_s19  }
   0xe   :  { %s5512_s22 = smov [#allocation5]  }
   0xf   :  { %s33_s23 = sshll.u32 %s5512_s22, 4  ;;  %s34_s23 = int_to_ptr.vmem [resolvable:$true] %s33_s23 }
  0x10   :  { %s5471_s24 = scalar_lea.vmem %s34_s23, 384  ;;  %p5476_p6 = scmp.lt.s32.totalorder %s34_s23, %s34_s23 }
  0x11   :  { %p5472_p5 = scmp.ne.s32.totalorder %s34_s23, %s5471_s24  ;;  %p5477_p7 = scmp.lt.s32.totalorder %s5471_s24, %s5471_s24 }
  0x13   :  { %p5478_p8 = por %p5477_p7, %p5476_p6 }
  0x15   :  { %p5479_p9 = pnand %p5478_p8, %p5472_p5 }
  0x17   :  { %5482 = shalt.err (!%p5479_p9)
}
  0x18   :  { %39 = dma.hbm_to_vmem [thread:$0]  %s6240_s3, 384, %s34_s23, [#allocation6], %s5510_s18, %s5510_s18, %s5511_s19  }
  0x19   :  { %5503 = dma.done.wait [#allocation3], 15232  }
  0x1a   :  { %5504 = vsyncadd [#allocation3], 4294952064 }
  0x1b   :  { %5505 = dma.done.wait [#allocation6], 384  }
  0x1c   :  { %5506 = vsyncadd [#allocation6], 4294966912  ;;  %vm63_vm0 = vcmask 261120   ;;  %v164_v0 = vld [vmem:[#allocation2 + $0x98] sm:$0xff]  ;;  %v163_v1 = vld [vmem:[#allocation2 + $0x90] sm:$0xff]  ;;  %vm349_vm1 = vcmask 64512  }
  0x1d   :  { %4850 = vmatprep.subr.mxu1 %v164_v0  ;;  %v5554_v2 = vld [vmem:[%s6237_s0] sm:$0xff]  ;;  %v162_v3 = vld [vmem:[#allocation2 + $0x88] sm:$0xff]  ;;  %v57_v4 = vld [vmem:[#allocation2 + $0x18] sm:$0xff]  ;;  %s5514_s23 = smov 24   ;;  %vm2280_vm2 = vcmask 130048   ;;  %vm2285_vm3 = vcmask 195584  }
  0x1e   :  { %4851 = vmatpush3.msra.mxu1 %v164_v0  ;;  %4858 = vmatprep.mubr.msk.f32.mxu1 %vm63_vm0, %v5554_v2  ;;  %v56_v5 = vld [vmem:[#allocation2 + $0x10] sm:$0xff]  ;;  %v161_v6 = vld [vmem:[#allocation2 + $0x80] sm:$0xff]  ;;  %v55_v7 = vld [vmem:[#allocation2 + $0x8] sm:$0xff]  ;;  %vm2474_vm4 = vcmask 1040384   ;;  %vm5516_vm5 = vmmov 0  }
  0x1f   :  { %4852 = vmatprep.subr.mxu1 %v163_v1  ;;  %4836 = vmatprep.subr.mxu0 %v57_v4  ;;  %v5561_v8 = vld [vmem:[%s6237_s0 + $0x8] sm:$0xff]  ;;  %v54_v9 = vld [vmem:[#allocation2] sm:$0xff]  ;;  %v5566_v10 = vld [vmem:[%s6237_s0 + $0x10] sm:$0xff] }
  0x20   :  { %4853 = vmatpush3.msra.mxu1 %v163_v1  ;;  %4837 = vmatpush3.msra.mxu0 %v57_v4  ;;  %v5575_v11 = vld [vmem:[%s6237_s0 + $0x18] sm:$0xff]  ;;  %v257_v31 = vld [vmem:[#allocation2 + $0x110] sm:$0xff]  ;;  %v256_v32 = vld [vmem:[#allocation2 + $0x108] sm:$0xff] }
  0x21   :  { %4854 = vmatprep.subr.mxu1 %v162_v3  ;;  %4838 = vmatprep.subr.mxu0 %v56_v5  ;;  %v4364_v15 = vld [vmem:[#allocation5] ss:$0 sm:$0xff]  ;;  %v4369_v16 = vld [vmem:[#allocation5 + $0x4] ss:$0 sm:$0xff]  ;;  %v255_v33 = vld [vmem:[#allocation2 + $0x100] sm:$0xff] }
  0x22   :  { %4855 = vmatpush3.msra.mxu1 %v162_v3  ;;  %4839 = vmatpush3.msra.mxu0 %v56_v5  ;;  %v258_v30 = vld [vmem:[#allocation2 + $0x118] sm:$0xff]  ;;  %v5612_v36 = vld [vmem:[%s6238_s1] sm:$0xff]  ;;  %v5617_v40 = vld [vmem:[%s6238_s1 + $0x8] sm:$0xff] }
  0x23   :  { %4856 = vmatprep.subr.mxu1 %v161_v6  ;;  %4840 = vmatprep.subr.mxu0 %v55_v7  ;;  %v5623_v43 = vld [vmem:[%s6238_s1 + $0x10] sm:$0xff]  ;;  %v5630_v48 = vld [vmem:[%s6238_s1 + $0x18] sm:$0xff]  ;;  %v703_v56 = vld [vmem:[#allocation2 + $0xa8] sm:$0xff] }
  0x24   :  { %4857 = vmatpush3.msra.mxu1 %v161_v6  ;;  %4841 = vmatpush3.msra.mxu0 %v55_v7  ;;  %v705_v54 = vld [vmem:[#allocation2 + $0xb8] sm:$0xff]  ;;  %v704_v55 = vld [vmem:[#allocation2 + $0xb0] sm:$0xff]  ;;  %v702_v57 = vld [vmem:[#allocation2 + $0xa0] sm:$0xff] }
  0x25   :  { %4859 = vmatmul.mubr.msk.f32.vlgmr.msra.gmra.mxu1 %vm63_vm0, %v5561_v8  ;;  %4842 = vmatprep.subr.mxu0 %v54_v9  ;;  %v4374_v59 = vld [vmem:[#allocation5 + $0x8] ss:$0 sm:$0xff] }
  0x26   :  { %4861 = vmatprep.mubr.msk.f32.mxu1 %vm63_vm0, %v5566_v10  ;;  %4843 = vmatpush3.msra.mxu0 %v54_v9 }
  0x27   :  { %4844 = vmatprep.mubr.msk.f32.mxu0 %vm63_vm0, %v5554_v2  ;;  %4864 = vmatprep.subr.mxu0 %v258_v30 }
  0x28   :  { %4845 = vmatmul.mubr.msk.f32.vlgmr.msra.gmra.mxu0 %vm63_vm0, %v5561_v8 }
  0x29   :  { %4862 = vmatmul.mubr.msk.f32.gmra.mxu1 %vm63_vm0, %v5575_v11  ;;  %4847 = vmatprep.mubr.msk.f32.mxu0 %vm63_vm0, %v5566_v10 }
  0x2a   :  { %4865 = vmatpush3.msra.mxu0 %v258_v30 }
  0x2b   :  { %4866 = vmatprep.subr.mxu0 %v257_v31 }
  0x2c   :  { %4848 = vmatmul.mubr.msk.f32.gmra.mxu0 %vm63_vm0, %v5575_v11 }
  0x2d   :  { %4872 = vmatprep.mubr.msk.f32.mxu0 %vm63_vm0, %v5554_v2  ;;  %4867 = vmatpush3.msra.mxu0 %v257_v31 }
  0x2e   :  { %4868 = vmatprep.subr.mxu0 %v256_v32 }
  0x2f   :  { %4869 = vmatpush3.msra.mxu0 %v256_v32 }
  0x30   :  { %4870 = vmatprep.subr.mxu0 %v255_v33 }
  0x31   :  { %4871 = vmatpush3.msra.mxu0 %v255_v33 }
  0x32   :  { %4873 = vmatmul.mubr.msk.f32.vlgmr.msra.gmra.mxu0 %vm63_vm0, %v5561_v8 }
  0x33   :  { %4875 = vmatprep.mubr.msk.f32.mxu0 %vm63_vm0, %v5566_v10 }
  0x36   :  { %4876 = vmatmul.mubr.msk.f32.gmra.mxu0 %vm63_vm0, %v5575_v11 }
  0xe5   :  { %v4860_v12 = vpop.f32.mrf.mxu1 }
  0xe6   :  { %v242_v23 = vadd.f32 %v4860_v12, %v4369_v16 }
  0xe7   :  { %v236_v13 = vpop.f32.mrf.mxu1 }
  0xe8   :  { %v4846_v14 = vpop.f32.mrf.mxu0  ;;  %v237_v25 = vadd.f32 %v4369_v16, %v236_v13 }
  0xe9   :  { %v4863_v17 = vpop.f32.mrf.mxu1  ;;  %v148_v28 = vadd.f32 %v4846_v14, %v4364_v15 }
  0xea   :  { %v252_v18 = vadd.f32 %v4863_v17, %v4369_v16  ;;  %v142_v19 = vpop.f32.mrf.mxu0 }
  0xeb   :  { %v246_v20 = vpop.f32.mrf.mxu1  ;;  %v143_v21 = vadd.f32 %v4364_v15, %v142_v19 }
  0xec   :  { %v247_v22 = vadd.f32 %v4369_v16, %v246_v20  ;;  %4878 = vmatprep.subr.msk.mxu1 %vm349_vm1, %v252_v18  ;;  %v4849_v24 = vpop.f32.mrf.mxu0 }
  0xed   :  { %4879 = vmatpush3.xpose.msk.msra.mxu1 %vm349_vm1, %v252_v18  ;;  %4886 = vmatprep.mubr.msk.f32.mxu1 %vm349_vm1, %v143_v21  ;;  %v158_v29 = vadd.f32 %v4849_v24, %v4364_v15 }
  0xee   :  { %4880 = vmatprep.subr.msk.mxu1 %vm349_vm1, %v247_v22  ;;  %v152_v26 = vpop.f32.mrf.mxu0 }
  0xef   :  { %v153_v27 = vadd.f32 %v4364_v15, %v152_v26 }
  0xf1   :  { %4881 = vmatpush3.xpose.msk.msra.mxu1 %vm349_vm1, %v247_v22 }
  0xf2   :  { %4882 = vmatprep.subr.msk.mxu1 %vm349_vm1, %v242_v23  ;;  %v4874_v58 = vpop.f32.mrf.mxu0 }
  0xf3   :  { %v336_v0 = vadd.f32 %v4874_v58, %v4374_v59 }
  0xf4   :  { %v330_v60 = vpop.f32.mrf.mxu0 }
  0xf5   :  { %4883 = vmatpush3.xpose.msk.msra.mxu1 %vm349_vm1, %v242_v23  ;;  %v331_v3 = vadd.f32 %v4374_v59, %v330_v60 }
  0xf6   :  { %4884 = vmatprep.subr.msk.mxu1 %vm349_vm1, %v237_v25  ;;  %v4877_v61 = vpop.f32.mrf.mxu0 }
  0xf7   :  { %v346_v62 = vadd.f32 %v4877_v61, %v4374_v59  ;;  %v4391_v61 = vld [vmem:[#allocation5 + $0x1] ss:$0 sm:$0xff] }
  0xf8   :  { %v340_v63 = vpop.f32.mrf.mxu0 }
  0xf9   :  { %4885 = vmatpush3.xpose.msk.msra.mxu1 %vm349_vm1, %v237_v25  ;;  %v341_v1 = vadd.f32 %v4374_v59, %v340_v63  ;;  %4892 = vmatprep.subr.mxu0 %v346_v62 }
  0xfa   :  { %4920 = vmatprep.subr.mxu1 %v705_v54  ;;  %4893 = vmatpush3.msra.mxu0 %v346_v62 }
  0xfb   :  { %4894 = vmatprep.subr.mxu0 %v341_v1 }
  0xfc   :  { %4887 = vmatmul.mubr.msk.f32.vlgmr.msra.gmra.mxu1 %vm349_vm1, %v148_v28  ;;  %4895 = vmatpush3.msra.mxu0 %v341_v1 }
  0xfd   :  { %4889 = vmatprep.mubr.msk.f32.mxu1 %vm349_vm1, %v153_v27  ;;  %4921 = vmatpush3.msra.mxu1 %v705_v54  ;;  %v611_v27 = vld [vmem:[#allocation2 + $0x38] sm:$0xff] }
  0xfe   :  { %4922 = vmatprep.subr.mxu1 %v704_v55  ;;  %4896 = vmatprep.subr.mxu0 %v336_v0 }
  0xff   :  { %4923 = vmatpush3.msra.mxu1 %v704_v55  ;;  %4897 = vmatpush3.msra.mxu0 %v336_v0  ;;  %v608_v55 = vld [vmem:[#allocation2 + $0x20] sm:$0xff] }
 0x100   :  { %4890 = vmatmul.mubr.msk.f32.gmra.mxu1 %vm349_vm1, %v158_v29  ;;  %4924 = vmatprep.subr.mxu1 %v703_v56  ;;  %v4396_v29 = vld [vmem:[#allocation5 + $0x5] ss:$0 sm:$0xff] }
 0x101   :  { %4928 = vmatprep.mubr.msk.f32.mxu1 %vm63_vm0, %v5554_v2  ;;  %4925 = vmatpush3.msra.mxu1 %v703_v56 }
 0x102   :  { %4926 = vmatprep.subr.mxu1 %v702_v57  ;;  %4898 = vmatprep.subr.mxu0 %v331_v3 }
 0x103   :  { %4927 = vmatpush3.msra.mxu1 %v702_v57  ;;  %4899 = vmatpush3.msra.mxu0 %v331_v3 }
 0x104   :  { %4929 = vmatmul.mubr.msk.f32.vlgmr.msra.gmra.mxu1 %vm63_vm0, %v5561_v8  ;;  %4906 = vmatprep.subr.mxu0 %v611_v27 }
 0x105   :  { %4931 = vmatprep.mubr.msk.f32.mxu1 %vm63_vm0, %v5566_v10 }
 0x108   :  { %4932 = vmatmul.mubr.msk.f32.gmra.mxu1 %vm63_vm0, %v5575_v11 }
 0x1bc   :  { %v4888_v34 = vpop.f32.mrf.mxu1 }
 0x1bd   :  { %v460_v37 = vmul.f32 0.35355338, %v4888_v34 }
 0x1be   :  { %v440_v35 = vpop.f32.mrf.mxu1 }
 0x1bf   :  { %v459_v38 = vmul.f32 0.35355338, %v440_v35  ;;  %v464_v47 = vadd.f32 %v460_v37, %v5617_v40 }
 0x1c0   :  { %v4891_v39 = vpop.f32.mrf.mxu1 }
 0x1c1   :  { %v463_v41 = vadd.f32 %v459_v38, %v5612_v36  ;;  %v462_v44 = vmul.f32 0.35355338, %v4891_v39  ;;  %v470_v50 = vsel %vm63_vm0, %v464_v47, -inf }
 0x1c2   :  { %v450_v42 = vpop.f32.mrf.mxu1 }
 0x1c3   :  { %v461_v45 = vmul.f32 0.35355338, %v450_v42  ;;  %v467_v46 = vsel %vm63_vm0, %v463_v41, -inf  ;;  %v466_v52 = vadd.f32 %v462_v44, %v5630_v48 }
 0x1c4   :  { %468 = vmax.xlane.f32.xlu0 %v467_v46  ;;  %v4930_v28 = vpop.f32.mrf.mxu1 }
 0x1c5   :  { %v465_v49 = vadd.f32 %v461_v45, %v5623_v43  ;;  %v476_v53 = vsel %vm63_vm0, %v466_v52, -inf  ;;  %v783_v35 = vadd.f32 %v4930_v28, %v4396_v29 }
 0x1c6   :  { %v777_v30 = vpop.f32.mrf.mxu1 }
 0x1c7   :  { %v473_v51 = vsel %vm63_vm0, %v465_v49, -inf  ;;  %v778_v37 = vadd.f32 %v4396_v29, %v777_v30  ;;  %v1244_v30 = vld [vmem:[#allocation2 + $0xd0] sm:$0xff] }
 0x1c8   :  { %471 = vmax.xlane.f32.xlu0 %v470_v50  ;;  %474 = vmax.xlane.f32.xlu1 %v473_v51  ;;  %v4933_v31 = vpop.f32.mrf.mxu1  ;;  %v610_v51 = vld [vmem:[#allocation2 + $0x30] sm:$0xff] }
 0x1c9   :  { %v793_v32 = vadd.f32 %v4933_v31, %v4396_v29  ;;  %v1243_v31 = vld [vmem:[#allocation2 + $0xc8] sm:$0xff] }
 0x1ca   :  { %v787_v33 = vpop.f32.mrf.mxu1 }
 0x1cb   :  { %4948 = vmatprep.subr.msk.mxu1 %vm349_vm1, %v793_v32  ;;  %v788_v34 = vadd.f32 %v4396_v29, %v787_v33  ;;  %v1245_v29 = vld [vmem:[#allocation2 + $0xd8] sm:$0xff] }
 0x1cc   :  { %477 = vmax.xlane.f32.xlu1 %v476_v53  ;;  %4949 = vmatpush3.xpose.msk.msra.mxu1 %vm349_vm1, %v793_v32  ;;  %v609_v53 = vld [vmem:[#allocation2 + $0x28] sm:$0xff]  ;;  %v1242_v32 = vld [vmem:[#allocation2 + $0xc0] sm:$0xff] }
 0x1cd   :  { %4950 = vmatprep.subr.msk.mxu1 %vm349_vm1, %v788_v34 }
 0x1d0   :  { %4951 = vmatpush3.xpose.msk.msra.mxu1 %vm349_vm1, %v788_v34  ;;  %v4401_v34 = vld [vmem:[#allocation5 + $0x9] ss:$0 sm:$0xff] }
 0x1d1   :  { %4952 = vmatprep.subr.msk.mxu1 %vm349_vm1, %v783_v35 }
 0x1d4   :  { %4953 = vmatpush3.xpose.msk.msra.mxu1 %vm349_vm1, %v783_v35 }
 0x1d5   :  { %4954 = vmatprep.subr.msk.mxu1 %vm349_vm1, %v778_v37 }
 0x1d8   :  { %4955 = vmatpush3.xpose.msk.msra.mxu1 %vm349_vm1, %v778_v37 }
 0x1d9   :  { %4990 = vmatprep.subr.mxu1 %v1245_v29 }
 0x24d   :  { %v469_v4 = vpop.xlane.xlu0 %468 }
 0x24e   :  { %v479_v5 = vsub.f32 %v463_v41, %v469_v4 }
 0x250   :  { %v483_v6 = vmul.f32 1.442695, %v479_v5 }
 0x251   :  { %v472_v7 = vpop.xlane.xlu0 %471  ;;  %v475_v9 = vpop.xlane.xlu1 %474 }
 0x252   :  { %5363 = vpow2.f32 %v483_v6  ;;  %v480_v12 = vsub.f32 %v464_v47, %v472_v7  ;;  %v481_v13 = vsub.f32 %v465_v49, %v475_v9  ;;  %v799_v6 = vld [vmem:[#allocation2 + $0x138] sm:$0xff]  ;;  %v798_v7 = vld [vmem:[#allocation2 + $0x130] sm:$0xff]  ;;  %v797_v9 = vld [vmem:[#allocation2 + $0x128] sm:$0xff] }
 0x254   :  { %v485_v14 = vmul.f32 1.442695, %v480_v12  ;;  %v487_v15 = vmul.f32 1.442695, %v481_v13  ;;  %v796_v12 = vld [vmem:[#allocation2 + $0x120] sm:$0xff] }
 0x255   :  { %v478_v16 = vpop.xlane.xlu1 %477 }
 0x256   :  { %5365 = vpow2.f32 %v485_v14  ;;  %v482_v17 = vsub.f32 %v466_v52, %v478_v16 }
 0x257   :  { %5367 = vpow2.f32 %v487_v15 }
 0x258   :  { %v489_v18 = vmul.f32 1.442695, %v482_v17 }
 0x25a   :  { %5369 = vpow2.f32 %v489_v18 }
 0x25f   :  { %v5364_v19 = vpop.eup %5363 }
 0x260   :  { %v491_v20 = vsel %vm63_vm0, %v5364_v19, 0.0 }
 0x261   :  { %492 = vadd.xlane.f32.xlu0 %v491_v20 }
 0x263   :  { %v5366_v21 = vpop.eup %5365 }
 0x264   :  { %v5368_v22 = vpop.eup %5367  ;;  %v494_v23 = vsel %vm63_vm0, %v5366_v21, 0.0 }
 0x265   :  { %495 = vadd.xlane.f32.xlu1 %v494_v23  ;;  %v497_v24 = vsel %vm63_vm0, %v5368_v22, 0.0 }
 0x266   :  { %498 = vadd.xlane.f32.xlu0 %v497_v24 }
 0x267   :  { %v5370_v25 = vpop.eup %5369 }
 0x268   :  { %v500_v26 = vsel %vm63_vm0, %v5370_v25, 0.0 }
 0x269   :  { %501 = vadd.xlane.f32.xlu1 %v500_v26 }
 0x2ea   :  { %v493_v38 = vpop.xlane.xlu0 %492 }
 0x2eb   :  { %5371 = vrcp.f32 %v493_v38 }
 0x2ee   :  { %v496_v39 = vpop.xlane.xlu1 %495 }
 0x2ef   :  { %v499_v41 = vpop.xlane.xlu0 %498  ;;  %5373 = vrcp.f32 %v496_v39 }
 0x2f0   :  { %5375 = vrcp.f32 %v499_v41 }
 0x2f2   :  { %v502_v42 = vpop.xlane.xlu1 %501 }
 0x2f3   :  { %5377 = vrcp.f32 %v502_v42 }
 0x2f8   :  { %v5372_v44 = vpop.eup %5371 }
 0x2f9   :  { %v504_v45 = vmul.f32 %v5372_v44, %v5364_v19 }
 0x2fb   :  { %4900 = vmatprep.mubr.msk.f32.mxu0 %vm63_vm0, %v504_v45 }
 0x2fc   :  { %v5374_v46 = vpop.eup %5373 }
 0x2fd   :  { %v5376_v47 = vpop.eup %5375  ;;  %v506_v49 = vmul.f32 %v5374_v46, %v5366_v21 }
 0x2fe   :  { %v508_v50 = vmul.f32 %v5376_v47, %v5368_v22 }
 0x2ff   :  { %4901 = vmatmul.mubr.msk.f32.vlgmr.msra.gmra.mxu0 %vm63_vm0, %v506_v49 }
 0x300   :  { %v5378_v52 = vpop.eup %5377  ;;  %4907 = vmatpush3.msra.mxu0 %v611_v27  ;;  %4903 = vmatprep.mubr.msk.f32.mxu0 %vm63_vm0, %v508_v50 }
 0x301   :  { %4908 = vmatprep.subr.mxu0 %v610_v51  ;;  %v510_v54 = vmul.f32 %v5378_v52, %v5370_v25 }
 0x302   :  { %4909 = vmatpush3.msra.mxu0 %v610_v51 }
 0x303   :  { %4910 = vmatprep.subr.mxu0 %v609_v53  ;;  %4904 = vmatmul.mubr.msk.f32.gmra.mxu0 %vm63_vm0, %v510_v54 }
 0x304   :  { %4911 = vmatpush3.msra.mxu0 %v609_v53  ;;  %4914 = vmatprep.mubr.msk.f32.mxu0 %vm63_vm0, %v5554_v2 }
 0x305   :  { %4912 = vmatprep.subr.mxu0 %v608_v55 }
 0x306   :  { %4913 = vmatpush3.msra.mxu0 %v608_v55 }
 0x307   :  { %4915 = vmatmul.mubr.msk.f32.vlgmr.msra.gmra.mxu0 %vm63_vm0, %v5561_v8  ;;  %4934 = vmatprep.subr.mxu0 %v799_v6 }
 0x308   :  { %4917 = vmatprep.mubr.msk.f32.mxu0 %vm63_vm0, %v5566_v10  ;;  %4935 = vmatpush3.msra.mxu0 %v799_v6 }
 0x309   :  { %4936 = vmatprep.subr.mxu0 %v798_v7 }
 0x30a   :  { %4937 = vmatpush3.msra.mxu0 %v798_v7  ;;  %v1151_v7 = vld [vmem:[#allocation2 + $0x58] sm:$0xff] }
 0x30b   :  { %4918 = vmatmul.mubr.msk.f32.gmra.mxu0 %vm63_vm0, %v5575_v11  ;;  %4938 = vmatprep.subr.mxu0 %v797_v9 }
 0x30c   :  { %4942 = vmatprep.mubr.msk.f32.mxu0 %vm63_vm0, %v5554_v2  ;;  %4939 = vmatpush3.msra.mxu0 %v797_v9 }
 0x30d   :  { %4940 = vmatprep.subr.mxu0 %v796_v12 }
 0x30e   :  { %4941 = vmatpush3.msra.mxu0 %v796_v12  ;;  %v4423_v12 = vld [vmem:[#allocation5 + $0x6] ss:$0 sm:$0xff] }
 0x30f   :  { %4943 = vmatmul.mubr.msk.f32.vlgmr.msra.gmra.mxu0 %vm63_vm0, %v5561_v8 }
 0x310   :  { %4945 = vmatprep.mubr.msk.f32.mxu0 %vm63_vm0, %v5566_v10 }
 0x313   :  { %4946 = vmatmul.mubr.msk.f32.gmra.mxu0 %vm63_vm0, %v5575_v11 }
 0x3bf   :  { %v5669_v56 = vpop.f32.mrf.mxu0 }
 0x3c1   :  { %v5671_v57 = vpop.f32.mrf.mxu0 }
 0x3c3   :  { %v5673_v58 = vpop.f32.mrf.mxu0 }
 0x3c5   :  { %v5675_v59 = vpop.f32.mrf.mxu0 }
 0x3c7   :  { %v4916_v60 = vpop.f32.mrf.mxu0 }
 0x3c8   :  { %v689_v0 = vadd.f32 %v4916_v60, %v4391_v61 }
 0x3c9   :  { %v683_v62 = vpop.f32.mrf.mxu0 }
 0x3ca   :  { %v684_v63 = vadd.f32 %v4391_v61, %v683_v62 }
 0x3cb   :  { %v4919_v1 = vpop.f32.mrf.mxu0 }
 0x3cc   :  { %4956 = vmatprep.mubr.msk.f32.mxu1 %vm349_vm1, %v684_v63  ;;  %v699_v5 = vadd.f32 %v4919_v1, %v4391_v61 }
 0x3cd   :  { %v693_v3 = vpop.f32.mrf.mxu0  ;;  %4957 = vmatmul.mubr.msk.f32.vlgmr.msra.gmra.mxu1 %vm349_vm1, %v689_v0 }
 0x3ce   :  { %v694_v4 = vadd.f32 %v4391_v61, %v693_v3  ;;  %4991 = vmatpush3.msra.mxu1 %v1245_v29  ;;  %v1150_v29 = vld [vmem:[#allocation2 + $0x50] sm:$0xff] }
 0x3cf   :  { %4992 = vmatprep.subr.mxu1 %v1244_v30  ;;  %v4944_v33 = vpop.f32.mrf.mxu0 }
 0x3d0   :  { %4959 = vmatprep.mubr.msk.f32.mxu1 %vm349_vm1, %v694_v4  ;;  %4993 = vmatpush3.msra.mxu1 %v1244_v30  ;;  %v877_v41 = vadd.f32 %v4944_v33, %v4401_v34 }
 0x3d1   :  { %4960 = vmatmul.mubr.msk.f32.gmra.mxu1 %vm349_vm1, %v699_v5  ;;  %4994 = vmatprep.subr.mxu1 %v1243_v31  ;;  %v871_v35 = vpop.f32.mrf.mxu0 }
 0x3d2   :  { %4998 = vmatprep.mubr.msk.f32.mxu1 %vm63_vm0, %v5554_v2  ;;  %4995 = vmatpush3.msra.mxu1 %v1243_v31  ;;  %v872_v44 = vadd.f32 %v4401_v34, %v871_v35 }
 0x3d3   :  { %4996 = vmatprep.subr.mxu1 %v1242_v32  ;;  %v4947_v37 = vpop.f32.mrf.mxu0 }
 0x3d4   :  { %4997 = vmatpush3.msra.mxu1 %v1242_v32  ;;  %v887_v38 = vadd.f32 %v4947_v37, %v4401_v34  ;;  %v1149_v32 = vld [vmem:[#allocation2 + $0x48] sm:$0xff] }
 0x3d5   :  { %4999 = vmatmul.mubr.msk.f32.vlgmr.msra.gmra.mxu1 %vm63_vm0, %v5561_v8  ;;  %v881_v39 = vpop.f32.mrf.mxu0 }
 0x3d6   :  { %5001 = vmatprep.mubr.msk.f32.mxu1 %vm63_vm0, %v5566_v10  ;;  %v882_v42 = vadd.f32 %v4401_v34, %v881_v39  ;;  %4962 = vmatprep.subr.mxu0 %v887_v38  ;;  %v1148_v34 = vld [vmem:[#allocation2 + $0x40] sm:$0xff] }
 0x3d7   :  { %4963 = vmatpush3.msra.mxu0 %v887_v38 }
 0x3d8   :  { %4964 = vmatprep.subr.mxu0 %v882_v42 }
 0x3d9   :  { %5002 = vmatmul.mubr.msk.f32.gmra.mxu1 %vm63_vm0, %v5575_v11  ;;  %4965 = vmatpush3.msra.mxu0 %v882_v42  ;;  %v4418_v42 = vld [vmem:[#allocation5 + $0x2] ss:$0 sm:$0xff] }
 0x3da   :  { %4966 = vmatprep.subr.mxu0 %v877_v41 }
 0x3db   :  { %4967 = vmatpush3.msra.mxu0 %v877_v41 }
 0x3dc   :  { %4968 = vmatprep.subr.mxu0 %v872_v44 }
 0x3dd   :  { %4969 = vmatpush3.msra.mxu0 %v872_v44 }
 0x3de   :  { %4976 = vmatprep.subr.mxu0 %v1151_v7 }
 0x48d   :  { %v4958_v13 = vpop.f32.mrf.mxu1 }
 0x48e   :  { %v1000_v14 = vmul.f32 0.35355338, %v4958_v13 }
 0x48f   :  { %v980_v15 = vpop.f32.mrf.mxu1 }
 0x490   :  { %v999_v16 = vmul.f32 0.35355338, %v980_v15  ;;  %v1004_v17 = vadd.f32 %v1000_v14, %v5617_v40 }
 0x491   :  { %v4961_v18 = vpop.f32.mrf.mxu1 }
 0x492   :  { %v1002_v19 = vmul.f32 0.35355338, %v4961_v18  ;;  %v1010_v20 = vsel %vm63_vm0, %v1004_v17, -inf  ;;  %v1003_v21 = vadd.f32 %v999_v16, %v5612_v36 }
 0x493   :  { %1011 = vmax.xlane.f32.xlu1 %v1010_v20  ;;  %v990_v22 = vpop.f32.mrf.mxu1 }
 0x494   :  { %v1001_v23 = vmul.f32 0.35355338, %v990_v22  ;;  %v1007_v24 = vsel %vm63_vm0, %v1003_v21, -inf  ;;  %v1006_v25 = vadd.f32 %v1002_v19, %v5630_v48 }
 0x495   :  { %1008 = vmax.xlane.f32.xlu0 %v1007_v24  ;;  %v5000_v9 = vpop.f32.mrf.mxu1 }
 0x496   :  { %v1016_v26 = vsel %vm63_vm0, %v1006_v25, -inf  ;;  %v1005_v27 = vadd.f32 %v1001_v23, %v5623_v43  ;;  %v1323_v18 = vadd.f32 %v5000_v9, %v4423_v12 }
 0x497   :  { %1017 = vmax.xlane.f32.xlu1 %v1016_v26  ;;  %v1317_v13 = vpop.f32.mrf.mxu1 }
 0x498   :  { %v1013_v28 = vsel %vm63_vm0, %v1005_v27, -inf  ;;  %v1318_v19 = vadd.f32 %v4423_v12, %v1317_v13 }
 0x499   :  { %1014 = vmax.xlane.f32.xlu0 %v1013_v28  ;;  %v5003_v14 = vpop.f32.mrf.mxu1 }
 0x49a   :  { %v1333_v15 = vadd.f32 %v5003_v14, %v4423_v12 }
 0x49b   :  { %v1327_v16 = vpop.f32.mrf.mxu1 }
 0x49c   :  { %5018 = vmatprep.subr.msk.mxu1 %vm349_vm1, %v1333_v15 }
 0x49d   :  { %5019 = vmatpush3.xpose.msk.msra.mxu1 %vm349_vm1, %v1333_v15  ;;  %v1785_v15 = vld [vmem:[#allocation2 + $0xf8] sm:$0xff] }
 0x51c   :  { %v1012_v45 = vpop.xlane.xlu1 %1011 }
 0x51d   :  { %v1020_v46 = vsub.f32 %v1004_v17, %v1012_v45  ;;  %v1328_v17 = vadd.f32 %v4423_v12, %v1327_v16  ;;  %v1784_v16 = vld [vmem:[#allocation2 + $0xf0] sm:$0xff] }
 0x51e   :  { %v1009_v47 = vpop.xlane.xlu0 %1008 }
 0x51f   :  { %v1025_v49 = vmul.f32 1.442695, %v1020_v46  ;;  %v1019_v50 = vsub.f32 %v1003_v21, %v1009_v47  ;;  %5020 = vmatprep.subr.msk.mxu1 %vm349_vm1, %v1328_v17 }
 0x520   :  { %v1018_v51 = vpop.xlane.xlu1 %1017  ;;  %5021 = vmatpush3.xpose.msk.msra.mxu1 %vm349_vm1, %v1328_v17  ;;  %v1783_v17 = vld [vmem:[#allocation2 + $0xe8] sm:$0xff] }
 0x521   :  { %5379 = vpow2.f32 %v1025_v49  ;;  %v1023_v52 = vmul.f32 1.442695, %v1019_v50  ;;  %v1022_v53 = vsub.f32 %v1006_v25, %v1018_v51  ;;  %5022 = vmatprep.subr.msk.mxu1 %vm349_vm1, %v1323_v18 }
 0x522   :  { %v1015_v54 = vpop.xlane.xlu0 %1014 }
 0x523   :  { %5381 = vpow2.f32 %v1023_v52  ;;  %v1029_v55 = vmul.f32 1.442695, %v1022_v53  ;;  %v1021_v60 = vsub.f32 %v1005_v27, %v1015_v54  ;;  %v1339_v52 = vld [vmem:[#allocation2 + $0x158] sm:$0xff]  ;;  %v1338_v53 = vld [vmem:[#allocation2 + $0x150] sm:$0xff]  ;;  %v1337_v54 = vld [vmem:[#allocation2 + $0x148] sm:$0xff] }
 0x524   :  { %5023 = vmatpush3.xpose.msk.msra.mxu1 %vm349_vm1, %v1323_v18  ;;  %v1782_v18 = vld [vmem:[#allocation2 + $0xe0] sm:$0xff] }
 0x525   :  { %5383 = vpow2.f32 %v1029_v55  ;;  %v1027_v61 = vmul.f32 1.442695, %v1021_v60  ;;  %5024 = vmatprep.subr.msk.mxu1 %vm349_vm1, %v1318_v19  ;;  %v1336_v55 = vld [vmem:[#allocation2 + $0x140] sm:$0xff] }
 0x527   :  { %5385 = vpow2.f32 %v1027_v61 }
 0x528   :  { %5025 = vmatpush3.xpose.msk.msra.mxu1 %vm349_vm1, %v1318_v19 }
 0x529   :  { %5060 = vmatprep.subr.mxu1 %v1785_v15 }
 0x52e   :  { %v5380_v62 = vpop.eup %5379 }
 0x52f   :  { %v1034_v63 = vsel %vm63_vm0, %v5380_v62, 0.0 }
 0x530   :  { %v5382_v0 = vpop.eup %5381  ;;  %1035 = vadd.xlane.f32.xlu1 %v1034_v63 }
 0x531   :  { %v1031_v1 = vsel %vm63_vm0, %v5382_v0, 0.0 }
 0x532   :  { %v5384_v3 = vpop.eup %5383  ;;  %1032 = vadd.xlane.f32.xlu0 %v1031_v1 }
 0x533   :  { %v1040_v4 = vsel %vm63_vm0, %v5384_v3, 0.0 }
 0x534   :  { %v5386_v5 = vpop.eup %5385  ;;  %1041 = vadd.xlane.f32.xlu1 %v1040_v4 }
 0x535   :  { %v1037_v6 = vsel %vm63_vm0, %v5386_v5, 0.0 }
 0x536   :  { %1038 = vadd.xlane.f32.xlu0 %v1037_v6 }
 0x5b9   :  { %v1036_v20 = vpop.xlane.xlu1 %1035 }
 0x5ba   :  { %5387 = vrcp.f32 %v1036_v20  ;;  %v4428_v20 = vld [vmem:[#allocation5 + $0xa] ss:$0 sm:$0xff] }
 0x5bb   :  { %v1033_v21 = vpop.xlane.xlu0 %1032 }
 0x5bc   :  { %5389 = vrcp.f32 %v1033_v21 }
 0x5bd   :  { %v1042_v22 = vpop.xlane.xlu1 %1041 }
 0x5be   :  { %5391 = vrcp.f32 %v1042_v22 }
 0x5bf   :  { %v1039_v23 = vpop.xlane.xlu0 %1038 }
 0x5c0   :  { %5393 = vrcp.f32 %v1039_v23 }
 0x5c7   :  { %v5388_v24 = vpop.eup %5387 }
 0x5c8   :  { %v1046_v27 = vmul.f32 %v5388_v24, %v5380_v62 }
 0x5c9   :  { %v5390_v25 = vpop.eup %5389 }
 0x5ca   :  { %v1044_v26 = vmul.f32 %v5390_v25, %v5382_v0 }
 0x5cb   :  { %v5392_v28 = vpop.eup %5391 }
 0x5cc   :  { %4970 = vmatprep.mubr.msk.f32.mxu0 %vm63_vm0, %v1044_v26  ;;  %v1050_v33 = vmul.f32 %v5392_v28, %v5384_v3 }
 0x5cd   :  { %v5394_v30 = vpop.eup %5393  ;;  %4971 = vmatmul.mubr.msk.f32.vlgmr.msra.gmra.mxu0 %vm63_vm0, %v1046_v27 }
 0x5ce   :  { %4977 = vmatpush3.msra.mxu0 %v1151_v7  ;;  %v1048_v31 = vmul.f32 %v5394_v30, %v5386_v5 }
 0x5cf   :  { %4978 = vmatprep.subr.mxu0 %v1150_v29 }
 0x5d0   :  { %4979 = vmatpush3.msra.mxu0 %v1150_v29  ;;  %4973 = vmatprep.mubr.msk.f32.mxu0 %vm63_vm0, %v1048_v31 }
 0x5d1   :  { %4980 = vmatprep.subr.mxu0 %v1149_v32  ;;  %4974 = vmatmul.mubr.msk.f32.gmra.mxu0 %vm63_vm0, %v1050_v33 }
 0x5d2   :  { %4981 = vmatpush3.msra.mxu0 %v1149_v32  ;;  %4984 = vmatprep.mubr.msk.f32.mxu0 %vm63_vm0, %v5554_v2 }
 0x5d3   :  { %4982 = vmatprep.subr.mxu0 %v1148_v34 }
 0x5d4   :  { %4983 = vmatpush3.msra.mxu0 %v1148_v34 }
 0x5d5   :  { %4985 = vmatmul.mubr.msk.f32.vlgmr.msra.gmra.mxu0 %vm63_vm0, %v5561_v8  ;;  %5004 = vmatprep.subr.mxu0 %v1339_v52 }
 0x5d6   :  { %4987 = vmatprep.mubr.msk.f32.mxu0 %vm63_vm0, %v5566_v10  ;;  %5005 = vmatpush3.msra.mxu0 %v1339_v52 }
 0x5d7   :  { %5006 = vmatprep.subr.mxu0 %v1338_v53 }
 0x5d8   :  { %5007 = vmatpush3.msra.mxu0 %v1338_v53  ;;  %v1691_v53 = vld [vmem:[#allocation2 + $0x78] sm:$0xff] }
 0x5d9   :  { %4988 = vmatmul.mubr.msk.f32.gmra.mxu0 %vm63_vm0, %v5575_v11  ;;  %5008 = vmatprep.subr.mxu0 %v1337_v54 }
 0x5da   :  { %5012 = vmatprep.mubr.msk.f32.mxu0 %vm63_vm0, %v5554_v2  ;;  %5009 = vmatpush3.msra.mxu0 %v1337_v54 }
 0x5db   :  { %5010 = vmatprep.subr.mxu0 %v1336_v55 }
 0x5dc   :  { %5011 = vmatpush3.msra.mxu0 %v1336_v55  ;;  %v4450_v55 = vld [vmem:[#allocation5 + $0x7] ss:$0 sm:$0xff] }
 0x5dd   :  { %5013 = vmatmul.mubr.msk.f32.vlgmr.msra.gmra.mxu0 %vm63_vm0, %v5561_v8 }
 0x5de   :  { %5015 = vmatprep.mubr.msk.f32.mxu0 %vm63_vm0, %v5566_v10 }
 0x5e1   :  { %5016 = vmatmul.mubr.msk.f32.gmra.mxu0 %vm63_vm0, %v5575_v11 }
 0x68d   :  { %v5729_v35 = vpop.f32.mrf.mxu0 }
 0x68f   :  { %v5731_v37 = vpop.f32.mrf.mxu0 }
 0x691   :  { %v5733_v38 = vpop.f32.mrf.mxu0 }
 0x693   :  { %v5735_v39 = vpop.f32.mrf.mxu0 }
 0x695   :  { %v4986_v41 = vpop.f32.mrf.mxu0 }
 0x696   :  { %v1229_v46 = vadd.f32 %v4986_v41, %v4418_v42 }
 0x697   :  { %v1223_v44 = vpop.f32.mrf.mxu0 }
 0x698   :  { %v1224_v45 = vadd.f32 %v4418_v42, %v1223_v44 }
 0x699   :  { %v4989_v47 = vpop.f32.mrf.mxu0 }
 0x69a   :  { %5026 = vmatprep.mubr.msk.f32.mxu1 %vm349_vm1, %v1224_v45  ;;  %v1239_v51 = vadd.f32 %v4989_v47, %v4418_v42 }
 0x69b   :  { %v1233_v49 = vpop.f32.mrf.mxu0  ;;  %5027 = vmatmul.mubr.msk.f32.vlgmr.msra.gmra.mxu1 %vm349_vm1, %v1229_v46 }
 0x69c   :  { %v1234_v50 = vadd.f32 %v4418_v42, %v1233_v49  ;;  %5061 = vmatpush3.msra.mxu1 %v1785_v15  ;;  %v1690_v15 = vld [vmem:[#allocation2 + $0x70] sm:$0xff] }
 0x69d   :  { %5062 = vmatprep.subr.mxu1 %v1784_v16  ;;  %v5014_v19 = vpop.f32.mrf.mxu0 }
 0x69e   :  { %5029 = vmatprep.mubr.msk.f32.mxu1 %vm349_vm1, %v1234_v50  ;;  %5063 = vmatpush3.msra.mxu1 %v1784_v16  ;;  %v1417_v25 = vadd.f32 %v5014_v19, %v4428_v20 }
 0x69f   :  { %5030 = vmatmul.mubr.msk.f32.gmra.mxu1 %vm349_vm1, %v1239_v51  ;;  %5064 = vmatprep.subr.mxu1 %v1783_v17  ;;  %v1411_v21 = vpop.f32.mrf.mxu0 }
 0x6a0   :  { %5068 = vmatprep.mubr.msk.f32.mxu1 %vm63_vm0, %v5554_v2  ;;  %5065 = vmatpush3.msra.mxu1 %v1783_v17  ;;  %v1412_v27 = vadd.f32 %v4428_v20, %v1411_v21  ;;  %v5782_v21 = vld [vmem:[%s6237_s0] sm:$0xff] }
 0x6a1   :  { %5066 = vmatprep.subr.mxu1 %v1782_v18  ;;  %v5017_v22 = vpop.f32.mrf.mxu0 }
 0x6a2   :  { %5067 = vmatpush3.msra.mxu1 %v1782_v18  ;;  %v1427_v23 = vadd.f32 %v5017_v22, %v4428_v20  ;;  %v1689_v18 = vld [vmem:[#allocation2 + $0x68] sm:$0xff] }
 0x6a3   :  { %5069 = vmatmul.mubr.msk.f32.vlgmr.msra.gmra.mxu1 %vm63_vm0, %v5561_v8  ;;  %v1421_v24 = vpop.f32.mrf.mxu0  ;;  %v5789_v22 = vld [vmem:[%s6237_s0 + $0x8] sm:$0xff] }
 0x6a4   :  { %5071 = vmatprep.mubr.msk.f32.mxu1 %vm63_vm0, %v5566_v10  ;;  %v1422_v26 = vadd.f32 %v4428_v20, %v1421_v24  ;;  %5032 = vmatprep.subr.mxu0 %v1427_v23  ;;  %v1688_v20 = vld [vmem:[#allocation2 + $0x60] sm:$0xff]  ;;  %v5803_v24 = vld [vmem:[%s6237_s0 + $0x18] sm:$0xff] }
 0x6a5   :  { %5033 = vmatpush3.msra.mxu0 %v1427_v23  ;;  %v5796_v23 = vld [vmem:[%s6237_s0 + $0x10] sm:$0xff]  ;;  %s5513_s0 = smov 16  }
 0x6a6   :  { %5034 = vmatprep.subr.mxu0 %v1422_v26 }
 0x6a7   :  { %5072 = vmatmul.mubr.msk.f32.gmra.mxu1 %vm63_vm0, %v5575_v11  ;;  %5035 = vmatpush3.msra.mxu0 %v1422_v26 }
 0x6a8   :  { %5036 = vmatprep.subr.mxu0 %v1417_v25 }
 0x6a9   :  { %5037 = vmatpush3.msra.mxu0 %v1417_v25 }
 0x6aa   :  { %5038 = vmatprep.subr.mxu0 %v1412_v27 }
 0x6ab   :  { %5039 = vmatpush3.msra.mxu0 %v1412_v27 }
 0x6ac   :  { %5046 = vmatprep.subr.mxu0 %v1691_v53 }
 0x75b   :  { %v5028_v2 = vpop.f32.mrf.mxu1 }
 0x75c   :  { %v1540_v60 = vmul.f32 0.35355338, %v5028_v2 }
 0x75d   :  { %v1520_v61 = vpop.f32.mrf.mxu1 }
 0x75e   :  { %v1539_v62 = vmul.f32 0.35355338, %v1520_v61  ;;  %v1544_v63 = vadd.f32 %v1540_v60, %v5617_v40 }
 0x75f   :  { %v5031_v0 = vpop.f32.mrf.mxu1 }
 0x760   :  { %v1542_v1 = vmul.f32 0.35355338, %v5031_v0  ;;  %v1550_v3 = vsel %vm63_vm0, %v1544_v63, -inf  ;;  %v1543_v4 = vadd.f32 %v1539_v62, %v5612_v36 }
 0x761   :  { %1551 = vmax.xlane.f32.xlu1 %v1550_v3  ;;  %v1530_v5 = vpop.f32.mrf.mxu1 }
 0x762   :  { %v1541_v6 = vmul.f32 0.35355338, %v1530_v5  ;;  %v1547_v7 = vsel %vm63_vm0, %v1543_v4, -inf  ;;  %v1546_v9 = vadd.f32 %v1542_v1, %v5630_v48 }
 0x763   :  { %1548 = vmax.xlane.f32.xlu0 %v1547_v7  ;;  %v5070_v54 = vpop.f32.mrf.mxu1 }
 0x764   :  { %v1556_v12 = vsel %vm63_vm0, %v1546_v9, -inf  ;;  %v1545_v13 = vadd.f32 %v1541_v6, %v5623_v43  ;;  %v1863_v0 = vadd.f32 %v5070_v54, %v4450_v55 }
 0x765   :  { %1557 = vmax.xlane.f32.xlu1 %v1556_v12  ;;  %v1857_v2 = vpop.f32.mrf.mxu1 }
 0x766   :  { %v1553_v14 = vsel %vm63_vm0, %v1545_v13, -inf  ;;  %v1858_v1 = vadd.f32 %v4450_v55, %v1857_v2 }
 0x767   :  { %1554 = vmax.xlane.f32.xlu0 %v1553_v14  ;;  %v5073_v60 = vpop.f32.mrf.mxu1 }
 0x768   :  { %v1873_v61 = vadd.f32 %v5073_v60, %v4450_v55 }
 0x769   :  { %v1867_v62 = vpop.f32.mrf.mxu1 }
 0x76a   :  { %5088 = vmatprep.subr.msk.mxu1 %vm349_vm1, %v1873_v61 }
 0x76b   :  { %5089 = vmatpush3.xpose.msk.msra.mxu1 %vm349_vm1, %v1873_v61 }
 0x7ea   :  { %v1552_v8 = vpop.xlane.xlu1 %1551 }
 0x7eb   :  { %v1560_v10 = vsub.f32 %v1544_v63, %v1552_v8  ;;  %v1868_v63 = vadd.f32 %v4450_v55, %v1867_v62 }
 0x7ec   :  { %v1549_v11 = vpop.xlane.xlu0 %1548 }
 0x7ed   :  { %v1565_v28 = vmul.f32 1.442695, %v1560_v10  ;;  %v1559_v29 = vsub.f32 %v1543_v4, %v1549_v11  ;;  %5090 = vmatprep.subr.msk.mxu1 %vm349_vm1, %v1868_v63  ;;  %v4445_v11 = vld [vmem:[#allocation5 + $0x3] ss:$0 sm:$0xff] }
 0x7ee   :  { %v1558_v30 = vpop.xlane.xlu1 %1557  ;;  %5091 = vmatpush3.xpose.msk.msra.mxu1 %vm349_vm1, %v1868_v63 }
 0x7ef   :  { %5395 = vpow2.f32 %v1565_v28  ;;  %v1563_v31 = vmul.f32 1.442695, %v1559_v29  ;;  %v1562_v32 = vsub.f32 %v1546_v9, %v1558_v30  ;;  %5092 = vmatprep.subr.msk.mxu1 %vm349_vm1, %v1863_v0 }
 0x7f0   :  { %v1555_v33 = vpop.xlane.xlu0 %1554 }
 0x7f1   :  { %5397 = vpow2.f32 %v1563_v31  ;;  %v1569_v34 = vmul.f32 1.442695, %v1562_v32  ;;  %v1561_v41 = vsub.f32 %v1545_v13, %v1555_v33 }
 0x7f2   :  { %5093 = vmatpush3.xpose.msk.msra.mxu1 %vm349_vm1, %v1863_v0 }
 0x7f3   :  { %5399 = vpow2.f32 %v1569_v34  ;;  %v1567_v42 = vmul.f32 1.442695, %v1561_v41  ;;  %5094 = vmatprep.subr.msk.mxu1 %vm349_vm1, %v1858_v1  ;;  %v1879_v41 = vld [vmem:[#allocation2 + $0x178] sm:$0xff] }
 0x7f5   :  { %5401 = vpow2.f32 %v1567_v42  ;;  %v1878_v42 = vld [vmem:[#allocation2 + $0x170] sm:$0xff] }
 0x7f6   :  { %5095 = vmatpush3.xpose.msk.msra.mxu1 %vm349_vm1, %v1858_v1 }
 0x7fc   :  { %v5396_v44 = vpop.eup %5395 }
 0x7fd   :  { %v1574_v45 = vsel %vm63_vm0, %v5396_v44, 0.0 }
 0x7fe   :  { %v5398_v46 = vpop.eup %5397  ;;  %1575 = vadd.xlane.f32.xlu1 %v1574_v45  ;;  %v1876_v45 = vld [vmem:[#allocation2 + $0x160] sm:$0xff] }
 0x7ff   :  { %v1571_v47 = vsel %vm63_vm0, %v5398_v46, 0.0 }
 0x800   :  { %v5400_v49 = vpop.eup %5399  ;;  %1572 = vadd.xlane.f32.xlu0 %v1571_v47 }
 0x801   :  { %v1580_v50 = vsel %vm63_vm0, %v5400_v49, 0.0 }
 0x802   :  { %v5402_v51 = vpop.eup %5401  ;;  %1581 = vadd.xlane.f32.xlu1 %v1580_v50 }
 0x803   :  { %v1577_v52 = vsel %vm63_vm0, %v5402_v51, 0.0 }
 0x804   :  { %1578 = vadd.xlane.f32.xlu0 %v1577_v52 }
 0x887   :  { %v1576_v3 = vpop.xlane.xlu1 %1575 }
 0x888   :  { %5403 = vrcp.f32 %v1576_v3  ;;  %v4455_v3 = vld [vmem:[#allocation5 + $0xb] ss:$0 sm:$0xff] }
 0x889   :  { %v1573_v4 = vpop.xlane.xlu0 %1572 }
 0x88a   :  { %5405 = vrcp.f32 %v1573_v4 }
 0x88b   :  { %v1582_v5 = vpop.xlane.xlu1 %1581 }
 0x88c   :  { %5407 = vrcp.f32 %v1582_v5 }
 0x88d   :  { %v1579_v6 = vpop.xlane.xlu0 %1578 }
 0x88e   :  { %5409 = vrcp.f32 %v1579_v6 }
 0x895   :  { %v5404_v7 = vpop.eup %5403 }
 0x896   :  { %v1586_v13 = vmul.f32 %v5404_v7, %v5396_v44  ;;  %v1877_v44 = vld [vmem:[#allocation2 + $0x168] sm:$0xff] }
 0x897   :  { %v5406_v9 = vpop.eup %5405 }
 0x898   :  { %v1584_v12 = vmul.f32 %v5406_v9, %v5398_v46 }
 0x899   :  { %v5408_v14 = vpop.eup %5407 }
 0x89a   :  { %5040 = vmatprep.mubr.msk.f32.mxu0 %vm63_vm0, %v1584_v12  ;;  %v1590_v19 = vmul.f32 %v5408_v14, %v5400_v49 }
 0x89b   :  { %v5410_v16 = vpop.eup %5409  ;;  %5041 = vmatmul.mubr.msk.f32.vlgmr.msra.gmra.mxu0 %vm63_vm0, %v1586_v13 }
 0x89c   :  { %5047 = vmatpush3.msra.mxu0 %v1691_v53  ;;  %v1588_v17 = vmul.f32 %v5410_v16, %v5402_v51 }
 0x89d   :  { %5048 = vmatprep.subr.mxu0 %v1690_v15 }
 0x89e   :  { %5049 = vmatpush3.msra.mxu0 %v1690_v15  ;;  %5043 = vmatprep.mubr.msk.f32.mxu0 %vm63_vm0, %v1588_v17 }
 0x89f   :  { %5050 = vmatprep.subr.mxu0 %v1689_v18  ;;  %5044 = vmatmul.mubr.msk.f32.gmra.mxu0 %vm63_vm0, %v1590_v19 }
 0x8a0   :  { %5051 = vmatpush3.msra.mxu0 %v1689_v18  ;;  %5054 = vmatprep.mubr.msk.f32.mxu0 %vm63_vm0, %v5782_v21 }
 0x8a1   :  { %5052 = vmatprep.subr.mxu0 %v1688_v20 }
 0x8a2   :  { %5053 = vmatpush3.msra.mxu0 %v1688_v20 }
 0x8a3   :  { %5055 = vmatmul.mubr.msk.f32.vlgmr.msra.gmra.mxu0 %vm63_vm0, %v5789_v22  ;;  %5074 = vmatprep.subr.mxu0 %v1879_v41 }
 0x8a4   :  { %5057 = vmatprep.mubr.msk.f32.mxu0 %vm63_vm0, %v5796_v23  ;;  %5075 = vmatpush3.msra.mxu0 %v1879_v41 }
 0x8a5   :  { %5076 = vmatprep.subr.mxu0 %v1878_v42 }
 0x8a6   :  { %5077 = vmatpush3.msra.mxu0 %v1878_v42 }
 0x8a7   :  { %5058 = vmatmul.mubr.msk.f32.gmra.mxu0 %vm63_vm0, %v5803_v24  ;;  %5078 = vmatprep.subr.mxu0 %v1877_v44 }
 0x8a8   :  { %5082 = vmatprep.mubr.msk.f32.mxu0 %vm63_vm0, %v5782_v21  ;;  %5079 = vmatpush3.msra.mxu0 %v1877_v44 }
 0x8a9   :  { %5080 = vmatprep.subr.mxu0 %v1876_v45 }
 0x8aa   :  { %5081 = vmatpush3.msra.mxu0 %v1876_v45 }
 0x8ab   :  { %5083 = vmatmul.mubr.msk.f32.vlgmr.msra.gmra.mxu0 %vm63_vm0, %v5789_v22 }
 0x8ac   :  { %5085 = vmatprep.mubr.msk.f32.mxu0 %vm63_vm0, %v5796_v23 }
 0x8af   :  { %5086 = vmatmul.mubr.msk.f32.gmra.mxu0 %vm63_vm0, %v5803_v24 }
 0x95b   :  { %v5809_v25 = vpop.f32.mrf.mxu0 }
 0x95d   :  { %v5811_v26 = vpop.f32.mrf.mxu0 }
 0x95f   :  { %v5813_v27 = vpop.f32.mrf.mxu0 }
 0x961   :  { %v5815_v8 = vpop.f32.mrf.mxu0 }
 0x963   :  { %v5056_v10 = vpop.f32.mrf.mxu0 }
 0x964   :  { %v1769_v30 = vadd.f32 %v5056_v10, %v4445_v11 }
 0x965   :  { %v1763_v28 = vpop.f32.mrf.mxu0 }
 0x966   :  { %v1764_v29 = vadd.f32 %v4445_v11, %v1763_v28 }
 0x967   :  { %v5059_v31 = vpop.f32.mrf.mxu0 }
 0x968   :  { %5096 = vmatprep.mubr.msk.f32.mxu1 %vm349_vm1, %v1764_v29  ;;  %v1779_v34 = vadd.f32 %v5059_v31, %v4445_v11 }
 0x969   :  { %v1773_v32 = vpop.f32.mrf.mxu0  ;;  %5097 = vmatmul.mubr.msk.f32.vlgmr.msra.gmra.mxu1 %vm349_vm1, %v1769_v30 }
 0x96a   :  { %v1774_v33 = vadd.f32 %v4445_v11, %v1773_v32 }
 0x96b   :  { %v5084_v1 = vpop.f32.mrf.mxu0 }
 0x96c   :  { %5099 = vmatprep.mubr.msk.f32.mxu1 %vm349_vm1, %v1774_v33  ;;  %v1957_v7 = vadd.f32 %v5084_v1, %v4455_v3 }
 0x96d   :  { %5100 = vmatmul.mubr.msk.f32.gmra.mxu1 %vm349_vm1, %v1779_v34  ;;  %v1951_v4 = vpop.f32.mrf.mxu0 }
 0xa29   :  { %v5098_v46 = vpop.f32.mrf.mxu1 }
 0xa2a   :  { %v2080_v47 = vmul.f32 0.35355338, %v5098_v46 }
 0xa2b   :  { %v2060_v49 = vpop.f32.mrf.mxu1 }
 0xa2c   :  { %v2079_v50 = vmul.f32 0.35355338, %v2060_v49  ;;  %v2084_v51 = vadd.f32 %v2080_v47, %v5617_v40  ;;  %v2293_v47 = vld [vmem:[#allocation2 + $0x198] sm:$0xff]  ;;  %v2292_v49 = vld [vmem:[#allocation2 + $0x190] sm:$0xff] }
 0xa2d   :  { %v5101_v52 = vpop.f32.mrf.mxu1 }
 0xa2e   :  { %v2082_v53 = vmul.f32 0.35355338, %v5101_v52  ;;  %v2090_v54 = vsel %vm63_vm0, %v2084_v51, -inf  ;;  %v2083_v55 = vadd.f32 %v2079_v50, %v5612_v36  ;;  %v5087_v36 = vpop.f32.mrf.mxu0  ;;  %v2291_v50 = vld [vmem:[#allocation2 + $0x188] sm:$0xff] }
 0xa2f   :  { %2091 = vmax.xlane.f32.xlu1 %v2090_v54  ;;  %v2070_v2 = vpop.f32.mrf.mxu1  ;;  %v1967_v5 = vadd.f32 %v5087_v36, %v4455_v3 }
 0xa30   :  { %v2081_v60 = vmul.f32 0.35355338, %v2070_v2  ;;  %v2087_v61 = vsel %vm63_vm0, %v2083_v55, -inf  ;;  %v2086_v62 = vadd.f32 %v2082_v53, %v5630_v48  ;;  %v1961_v6 = vpop.f32.mrf.mxu0  ;;  %v1952_v48 = vadd.f32 %v4455_v3, %v1951_v4 }
 0xa31   :  { %2088 = vmax.xlane.f32.xlu0 %v2087_v61  ;;  %v1962_v9 = vadd.f32 %v4455_v3, %v1961_v6  ;;  %5102 = vmatprep.subr.mxu0 %v1967_v5 }
 0xa32   :  { %v2096_v63 = vsel %vm63_vm0, %v2086_v62, -inf  ;;  %v2085_v0 = vadd.f32 %v2081_v60, %v5623_v43  ;;  %5103 = vmatpush3.msra.mxu0 %v1967_v5 }
 0xa33   :  { %2097 = vmax.xlane.f32.xlu1 %v2096_v63  ;;  %5104 = vmatprep.subr.mxu0 %v1962_v9 }
 0xa34   :  { %v2093_v40 = vsel %vm63_vm0, %v2085_v0, -inf  ;;  %5105 = vmatpush3.msra.mxu0 %v1962_v9 }
 0xa35   :  { %2094 = vmax.xlane.f32.xlu0 %v2093_v40  ;;  %5106 = vmatprep.subr.mxu0 %v1957_v7 }
 0xa36   :  { %5107 = vmatpush3.msra.mxu0 %v1957_v7 }
 0xa37   :  { %5108 = vmatprep.subr.mxu0 %v1952_v48 }
 0xa38   :  { %5109 = vmatpush3.msra.mxu0 %v1952_v48 }
 0xa39   :  { %5116 = vmatprep.subr.mxu0 %v2293_v47 }
 0xab8   :  { %v2092_v43 = vpop.xlane.xlu1 %2091 }
 0xab9   :  { %v2100_v12 = vsub.f32 %v2084_v51, %v2092_v43  ;;  %v2290_v51 = vld [vmem:[#allocation2 + $0x180] sm:$0xff] }
 0xaba   :  { %v2089_v13 = vpop.xlane.xlu0 %2088 }
 0xabb   :  { %v2105_v14 = vmul.f32 1.442695, %v2100_v12  ;;  %v2099_v15 = vsub.f32 %v2083_v55, %v2089_v13 }
 0xabc   :  { %v2098_v16 = vpop.xlane.xlu1 %2097 }
 0xabd   :  { %5411 = vpow2.f32 %v2105_v14  ;;  %v2103_v17 = vmul.f32 1.442695, %v2099_v15  ;;  %v2102_v18 = vsub.f32 %v2086_v62, %v2098_v16 }
 0xabe   :  { %v2095_v19 = vpop.xlane.xlu0 %2094 }
 0xabf   :  { %5413 = vpow2.f32 %v2103_v17  ;;  %v2109_v20 = vmul.f32 1.442695, %v2102_v18  ;;  %v2101_v10 = vsub.f32 %v2085_v0, %v2095_v19 }
 0xac1   :  { %5415 = vpow2.f32 %v2109_v20  ;;  %v2107_v11 = vmul.f32 1.442695, %v2101_v10 }
 0xac3   :  { %5417 = vpow2.f32 %v2107_v11 }
 0xaca   :  { %v5412_v28 = vpop.eup %5411 }
 0xacb   :  { %v2114_v29 = vsel %vm63_vm0, %v5412_v28, 0.0 }
 0xacc   :  { %v5414_v30 = vpop.eup %5413  ;;  %2115 = vadd.xlane.f32.xlu1 %v2114_v29 }
 0xacd   :  { %v2111_v31 = vsel %vm63_vm0, %v5414_v30, 0.0 }
 0xace   :  { %v5416_v32 = vpop.eup %5415  ;;  %2112 = vadd.xlane.f32.xlu0 %v2111_v31 }
 0xacf   :  { %v2120_v33 = vsel %vm63_vm0, %v5416_v32, 0.0 }
 0xad0   :  { %v5418_v34 = vpop.eup %5417  ;;  %2121 = vadd.xlane.f32.xlu1 %v2120_v33 }
 0xad1   :  { %v2117_v41 = vsel %vm63_vm0, %v5418_v34, 0.0 }
 0xad2   :  { %2118 = vadd.xlane.f32.xlu0 %v2117_v41 }
 0xae1   :  { %2234 = vrot.lane.b32.xlu1 %v5729_v35, %s5511_s19 }
 0xae5   :  { %2248 = vrot.lane.b32.xlu1 %v5811_v26, %s5513_s0 }
 0xae8   :  { %2232 = vrot.lane.b32.xlu0 %v5731_v37, %s5511_s19 }
 0xae9   :  { %2250 = vrot.lane.b32.xlu1 %v5809_v25, %s5513_s0 }
 0xaec   :  { %2236 = vrot.lane.b32.xlu0 %v5735_v39, %s5511_s19 }
 0xaed   :  { %2238 = vrot.lane.b32.xlu1 %v5733_v38, %s5511_s19 }
 0xaf0   :  { %2252 = vrot.lane.b32.xlu0 %v5815_v8, %s5513_s0 }
 0xaf1   :  { %2254 = vrot.lane.b32.xlu1 %v5813_v27, %s5513_s0 }
 0xb55   :  { %v2116_v35 = vpop.xlane.xlu1 %2115 }
 0xb56   :  { %5419 = vrcp.f32 %v2116_v35 }
 0xb57   :  { %v2113_v26 = vpop.xlane.xlu0 %2112 }
 0xb58   :  { %5421 = vrcp.f32 %v2113_v26 }
 0xb59   :  { %v2122_v37 = vpop.xlane.xlu1 %2121 }
 0xb5a   :  { %5423 = vrcp.f32 %v2122_v37 }
 0xb5b   :  { %v2119_v42 = vpop.xlane.xlu0 %2118 }
 0xb5c   :  { %5425 = vrcp.f32 %v2119_v42 }
 0xb5d   :  { %v2235_v2 = vpop.permute.xlu1 %2234 }
 0xb5e   :  { %v2277_v36 = vsel %vm349_vm1, %v5669_v56, %v2235_v2  ;;  %v2528_v2 = vld [vmem:[#allocation2 + $0x1b0] sm:$0xff] }
 0xb5f   :  { %v2233_v62 = vpop.permute.xlu0 %2232 }
 0xb60   :  { %v2276_v3 = vsel %vm349_vm1, %v5671_v57, %v2233_v62  ;;  %v2530_v62 = vld [vmem:[#allocation2 + $0x1c0] sm:$0xff] }
 0xb61   :  { %v2249_v60 = vpop.permute.xlu1 %2248 }
 0xb62   :  { %v2281_v5 = vsel %vm2280_vm2, %v2276_v3, %v2249_v60  ;;  %v2531_v60 = vld [vmem:[#allocation2 + $0x1c8] sm:$0xff] }
 0xb63   :  { %v5420_v25 = vpop.eup %5419  ;;  %v2237_v0 = vpop.permute.xlu0 %2236 }
 0xb64   :  { %v2126_v45 = vmul.f32 %v5420_v25, %v5412_v28  ;;  %v2278_v57 = vsel %vm349_vm1, %v5675_v59, %v2237_v0  ;;  %v4472_v59 = vld [vmem:[#allocation5 + $0xc] ss:$0 sm:$0xff]  ;;  %v2881_v0 = vld [vmem:[#allocation2 + $0x238] sm:$0xff] }
 0xb65   :  { %v5422_v44 = vpop.eup %5421  ;;  %v2251_v61 = vpop.permute.xlu1 %2250 }
 0xb66   :  { %v2124_v39 = vmul.f32 %v5422_v44, %v5414_v30  ;;  %v2282_v7 = vsel %vm2280_vm2, %v2277_v36, %v2251_v61  ;;  %v2527_v61 = vld [vmem:[#allocation2 + $0x1a8] sm:$0xff] }
 0xb67   :  { %v5424_v46 = vpop.eup %5423  ;;  %v2253_v1 = vpop.permute.xlu0 %2252 }
 0xb68   :  { %5110 = vmatprep.mubr.msk.f32.mxu0 %vm63_vm0, %v2124_v39  ;;  %v2130_v27 = vmul.f32 %v5424_v46, %v5416_v32  ;;  %v2283_v12 = vsel %vm2280_vm2, %v2278_v57, %v2253_v1 }
 0xb69   :  { %v5426_v38 = vpop.eup %5425  ;;  %5111 = vmatmul.mubr.msk.f32.vlgmr.msra.gmra.mxu0 %vm63_vm0, %v2126_v45  ;;  %v2239_v63 = vpop.permute.xlu1 %2238 }
 0xb6a   :  { %v2128_v8 = vmul.f32 %v5426_v38, %v5418_v34  ;;  %5117 = vmatpush3.msra.mxu0 %v2293_v47  ;;  %v2279_v56 = vsel %vm349_vm1, %v5673_v58, %v2239_v63  ;;  %v2526_v63 = vld [vmem:[#allocation2 + $0x1a0] sm:$0xff] }
 0xb6b   :  { %5118 = vmatprep.subr.mxu0 %v2292_v49 }
 0xb6c   :  { %5113 = vmatprep.mubr.msk.f32.mxu0 %vm63_vm0, %v2128_v8  ;;  %5119 = vmatpush3.msra.mxu0 %v2292_v49 }
 0xb6d   :  { %5114 = vmatmul.mubr.msk.f32.gmra.mxu0 %vm63_vm0, %v2130_v27  ;;  %5120 = vmatprep.subr.mxu0 %v2291_v50  ;;  %v2255_v40 = vpop.permute.xlu1 %2254 }
 0xb6e   :  { %5121 = vmatpush3.msra.mxu0 %v2291_v50  ;;  %v2284_v14 = vsel %vm2280_vm2, %v2279_v56, %v2255_v40  ;;  %v2727_v40 = vld [vmem:[#allocation2 + $0x1f8] sm:$0xff] }
 0xb6f   :  { %5122 = vmatprep.subr.mxu0 %v2290_v51 }
 0xb70   :  { %5123 = vmatpush3.msra.mxu0 %v2290_v51 }
 0xc29   :  { %v5112_v52 = vpop.f32.mrf.mxu0 }
 0xc2a   :  { %2266 = vrot.lane.b32.xlu1 %v5112_v52, %s5514_s23 }
 0xc2b   :  { %v2209_v53 = vpop.f32.mrf.mxu0 }
 0xc2c   :  { %2264 = vrot.lane.b32.xlu0 %v2209_v53, %s5514_s23  ;;  %v2533_v53 = vld [vmem:[#allocation2 + $0x1d8] sm:$0xff] }
 0xc2d   :  { %v5115_v54 = vpop.f32.mrf.mxu0  ;;  %5130 = vmatprep.subr.mxu1 %v2533_v53 }
 0xc2e   :  { %2270 = vrot.lane.b32.xlu1 %v5115_v54, %s5514_s23  ;;  %v2529_v54 = vld [vmem:[#allocation2 + $0x1b8] sm:$0xff]  ;;  %5131 = vmatpush3.msra.mxu1 %v2533_v53 }
 0xc2f   :  { %v2219_v55 = vpop.f32.mrf.mxu0  ;;  %5144 = vmatprep.subr.mxu0 %v2529_v54 }
 0xc30   :  { %2268 = vrot.lane.b32.xlu0 %v2219_v55, %s5514_s23  ;;  %v2532_v55 = vld [vmem:[#allocation2 + $0x1d0] sm:$0xff] }
 0xc31   :  { %5132 = vmatprep.subr.mxu1 %v2532_v55 }
 0xc32   :  { %5133 = vmatpush3.msra.mxu1 %v2532_v55 }
 0xc33   :  { %5134 = vmatprep.subr.mxu1 %v2531_v60 }
 0xc34   :  { %5135 = vmatpush3.msra.mxu1 %v2531_v60  ;;  %v3060_v60 = vld [vmem:[#allocation2 + $0x240] sm:$0xff] }
 0xc35   :  { %5136 = vmatprep.subr.mxu1 %v2530_v62 }
 0xc36   :  { %5137 = vmatpush3.msra.mxu1 %v2530_v62  ;;  %v3164_v62 = vld [vmem:[#allocation2 + $0x278] sm:$0xff] }
 0xc37   :  { %5158 = vmatprep.subr.mxu1 %v2727_v40 }
 0xc9c   :  { %v2267_v4 = vpop.permute.xlu1 %2266 }
 0xc9d   :  { %v2287_v48 = vsel %vm2285_vm3, %v2282_v7, %v2267_v4 }
 0xc9e   :  { %v2265_v6 = vpop.permute.xlu0 %2264 }
 0xc9f   :  { %v2286_v9 = vsel %vm2285_vm3, %v2281_v5, %v2265_v6 }
 0xca0   :  { %5124 = vmatprep.mubr.msk.f32.mxu0 %vm63_vm0, %v2286_v9  ;;  %v2271_v43 = vpop.permute.xlu1 %2270 }
 0xca1   :  { %5125 = vmatmul.mubr.msk.f32.vlgmr.msra.gmra.mxu0 %vm63_vm0, %v2287_v48  ;;  %v2289_v16 = vsel %vm2285_vm3, %v2284_v14, %v2271_v43 }
 0xca2   :  { %v2269_v13 = vpop.permute.xlu0 %2268  ;;  %5145 = vmatpush3.msra.mxu0 %v2529_v54  ;;  %v2874_v54 = vld [vmem:[#allocation2 + $0x200] sm:$0xff] }
 0xca3   :  { %v2288_v15 = vsel %vm2285_vm3, %v2283_v12, %v2269_v13  ;;  %5146 = vmatprep.subr.mxu0 %v2528_v2  ;;  %v4477_v13 = vld [vmem:[#allocation5 + $0xd] ss:$0 sm:$0xff] }
 0xca4   :  { %5127 = vmatprep.mubr.msk.f32.mxu0 %vm63_vm0, %v2288_v15  ;;  %5147 = vmatpush3.msra.mxu0 %v2528_v2 }
 0xca5   :  { %5128 = vmatmul.mubr.msk.f32.gmra.mxu0 %vm63_vm0, %v2289_v16  ;;  %5148 = vmatprep.subr.mxu0 %v2527_v61  ;;  %v4478_v16 = vld [vmem:[#allocation5 + $0xe] ss:$0 sm:$0xff] }
 0xca6   :  { %5149 = vmatpush3.msra.mxu0 %v2527_v61 }
 0xca7   :  { %5150 = vmatprep.subr.mxu0 %v2526_v63 }
 0xca8   :  { %5151 = vmatpush3.msra.mxu0 %v2526_v63  ;;  %v3318_v63 = vld [vmem:[#allocation2 + $0x2b8] sm:$0xff] }
 0xca9   :  { %5172 = vmatprep.subr.mxu0 %v2881_v0 }
 0xd61   :  { %v5126_v17 = vpop.f32.mrf.mxu0 }
 0xd62   :  { %v2383_v18 = vadd.f32 %v5126_v17, %v4472_v59 }
 0xd63   :  { %v2377_v19 = vpop.f32.mrf.mxu0 }
 0xd64   :  { %v2378_v20 = vadd.f32 %v4472_v59, %v2377_v19  ;;  %v2397_v10 = vadd.f32 %v5789_v22, %v2383_v18 }
 0xd65   :  { %v5129_v11 = vpop.f32.mrf.mxu0 }
 0xd66   :  { %v2403_v58 = vsel %vm63_vm0, %v2397_v10, 0.0  ;;  %v2396_v28 = vadd.f32 %v5782_v21, %v2378_v20  ;;  %v2393_v30 = vadd.f32 %v5129_v11, %v4472_v59 }
 0xd67   :  { %2404 = vadd.xlane.f32.xlu1 %v2403_v58  ;;  %v2387_v29 = vpop.f32.mrf.mxu0 }
 0xd68   :  { %v2388_v31 = vadd.f32 %v4472_v59, %v2387_v29  ;;  %v2400_v32 = vsel %vm63_vm0, %v2396_v28, 0.0  ;;  %v2399_v41 = vadd.f32 %v5803_v24, %v2393_v30  ;;  %v2880_v29 = vld [vmem:[#allocation2 + $0x230] sm:$0xff] }
 0xd69   :  { %2401 = vadd.xlane.f32.xlu0 %v2400_v32 }
 0xd6a   :  { %v2398_v33 = vadd.f32 %v5796_v23, %v2388_v31  ;;  %v2409_v22 = vsel %vm63_vm0, %v2399_v41, 0.0 }
 0xd6c   :  { %v2406_v34 = vsel %vm63_vm0, %v2398_v33, 0.0 }
 0xd6d   :  { %2407 = vadd.xlane.f32.xlu0 %v2406_v34 }
 0xd71   :  { %2410 = vadd.xlane.f32.xlu0 %v2409_v22  ;;  %v2725_v22 = vld [vmem:[#allocation2 + $0x1e8] sm:$0xff] }
 0xdf0   :  { %v2405_v35 = vpop.xlane.xlu1 %2404 }
 0xdf1   :  { %v2414_v26 = vmul.f32 0.03125, %v2405_v35  ;;  %v2879_v35 = vld [vmem:[#allocation2 + $0x228] sm:$0xff] }
 0xdf2   :  { %v2402_v21 = vpop.xlane.xlu0 %2401 }
 0xdf3   :  { %v5887_v37 = vsub.f32 %v2397_v10, %v2414_v26  ;;  %v2413_v42 = vmul.f32 0.03125, %v2402_v21 }
 0xdf5   :  { %v5889_v25 = vsub.f32 %v2396_v28, %v2413_v42  ;;  %v2422_v44 = vmul.f32 %v5887_v37, %v5887_v37  ;;  %v2726_v28 = vld [vmem:[#allocation2 + $0x1f0] sm:$0xff]  ;;  %v2724_v42 = vld [vmem:[#allocation2 + $0x1e0] sm:$0xff] }
 0xdf6   :  { %v2408_v23 = vpop.xlane.xlu0 %2407 }
 0xdf7   :  { %v2415_v39 = vmul.f32 0.03125, %v2408_v23  ;;  %v2428_v45 = vsel %vm63_vm0, %v2422_v44, 0.0  ;;  %v2421_v24 = vmul.f32 %v5889_v25, %v5889_v25  ;;  %v2878_v44 = vld [vmem:[#allocation2 + $0x220] sm:$0xff] }
 0xdf8   :  { %2429 = vadd.xlane.f32.xlu1 %v2428_v45  ;;  %v3063_v45 = vld [vmem:[#allocation2 + $0x258] sm:$0xff] }
 0xdf9   :  { %v5896_v46 = vsub.f32 %v2398_v33, %v2415_v39  ;;  %v2425_v38 = vsel %vm63_vm0, %v2421_v24, 0.0  ;;  %v2877_v39 = vld [vmem:[#allocation2 + $0x218] sm:$0xff] }
 0xdfa   :  { %2426 = vadd.xlane.f32.xlu0 %v2425_v38  ;;  %v2411_v8 = vpop.xlane.xlu0 %2410 }
 0xdfb   :  { %v2416_v27 = vmul.f32 0.03125, %v2411_v8  ;;  %v2423_v47 = vmul.f32 %v5896_v46, %v5896_v46 }
 0xdfd   :  { %v5901_v49 = vsub.f32 %v2399_v41, %v2416_v27  ;;  %v2431_v50 = vsel %vm63_vm0, %v2423_v47, 0.0  ;;  %v2876_v27 = vld [vmem:[#allocation2 + $0x210] sm:$0xff] }
 0xdfe   :  { %2432 = vadd.xlane.f32.xlu0 %v2431_v50  ;;  %v3062_v47 = vld [vmem:[#allocation2 + $0x250] sm:$0xff] }
 0xdff   :  { %v2424_v51 = vmul.f32 %v5901_v49, %v5901_v49 }
 0xe01   :  { %v2434_v52 = vsel %vm63_vm0, %v2424_v51, 0.0  ;;  %v2875_v51 = vld [vmem:[#allocation2 + $0x208] sm:$0xff] }
 0xe02   :  { %2435 = vadd.xlane.f32.xlu1 %v2434_v52  ;;  %v3061_v52 = vld [vmem:[#allocation2 + $0x248] sm:$0xff] }
 0xe81   :  { %v2430_v1 = vpop.xlane.xlu1 %2429 }
 0xe82   :  { %v2438_v3 = vmul.f32 0.03125, %v2430_v1 }
 0xe83   :  { %v2427_v4 = vpop.xlane.xlu0 %2426 }
 0xe84   :  { %v2442_v36 = vadd.f32 1e-05, %v2438_v3  ;;  %v2437_v5 = vmul.f32 0.03125, %v2427_v4  ;;  %v3163_v3 = vld [vmem:[#allocation2 + $0x270] sm:$0xff] }
 0xe85   :  { %v3317_v4 = vld [vmem:[#allocation2 + $0x2b0] sm:$0xff] }
 0xe86   :  { %5427 = vrsqrt.f32 %v2442_v36  ;;  %v2441_v6 = vadd.f32 1e-05, %v2437_v5  ;;  %v3162_v36 = vld [vmem:[#allocation2 + $0x268] sm:$0xff] }
 0xe87   :  { %v2433_v7 = vpop.xlane.xlu0 %2432  ;;  %v3316_v5 = vld [vmem:[#allocation2 + $0x2a8] sm:$0xff] }
 0xe88   :  { %5429 = vrsqrt.f32 %v2441_v6  ;;  %v2439_v9 = vmul.f32 0.03125, %v2433_v7  ;;  %v3161_v6 = vld [vmem:[#allocation2 + $0x260] sm:$0xff] }
 0xe89   :  { %v3315_v7 = vld [vmem:[#allocation2 + $0x2a0] sm:$0xff] }
 0xe8a   :  { %v2443_v48 = vadd.f32 1e-05, %v2439_v9  ;;  %v3314_v9 = vld [vmem:[#allocation2 + $0x298] sm:$0xff] }
 0xe8b   :  { %v2436_v57 = vpop.xlane.xlu1 %2435 }
 0xe8c   :  { %5431 = vrsqrt.f32 %v2443_v48  ;;  %v2440_v43 = vmul.f32 0.03125, %v2436_v57  ;;  %v3500_v48 = vld [vmem:[#allocation2 + $0x2d8] sm:$0xff]  ;;  %v3313_v57 = vld [vmem:[#allocation2 + $0x290] sm:$0xff] }
 0xe8e   :  { %v2444_v12 = vadd.f32 1e-05, %v2440_v43  ;;  %v3499_v43 = vld [vmem:[#allocation2 + $0x2d0] sm:$0xff] }
 0xe90   :  { %5433 = vrsqrt.f32 %v2444_v12  ;;  %v3312_v12 = vld [vmem:[#allocation2 + $0x288] sm:$0xff] }
 0xe93   :  { %v5428_v56 = vpop.eup %5427 }
 0xe94   :  { %v2450_v14 = vmul.f32 %v5428_v56, %v5887_v37  ;;  %v3498_v56 = vld [vmem:[#allocation2 + $0x2c8] sm:$0xff] }
 0xe95   :  { %v5430_v15 = vpop.eup %5429 }
 0xe96   :  { %v2459_v59 = vmul.f32 %v4477_v13, %v2450_v14  ;;  %v2449_v17 = vmul.f32 %v5430_v15, %v5889_v25  ;;  %v3311_v14 = vld [vmem:[#allocation2 + $0x280] sm:$0xff] }
 0xe97   :  { %v3497_v15 = vld [vmem:[#allocation2 + $0x2c0] sm:$0xff] }
 0xe98   :  { %v5909_v18 = vadd.f32 %v4478_v16, %v2459_v59  ;;  %v2458_v19 = vmul.f32 %v4477_v13, %v2449_v17 }
 0xe99   :  { %v5432_v20 = vpop.eup %5431 }
 0xe9a   :  { %v5911_v10 = vadd.f32 %v4478_v16, %v2458_v19  ;;  %v2451_v11 = vmul.f32 %v5432_v20, %v5896_v46  ;;  %v2499_v31 = vsel %vm63_vm0, %v5909_v18, -inf  ;;  %v3601_v19 = vld [vmem:[#allocation2 + $0x2f8] sm:$0xff] }
 0xe9b   :  { %v3702_v20 = vld [vmem:[#allocation2 + $0x318] sm:$0xff] }
 0xe9c   :  { %v2460_v58 = vmul.f32 %v4477_v13, %v2451_v11  ;;  %5138 = vmatprep.mubr.msk.f32.mxu1 %vm63_vm0, %v5911_v10  ;;  %5152 = vmatprep.mubr.msk.f32.mxu0 %vm63_vm0, %v5911_v10  ;;  %v2498_v30 = vsel %vm63_vm0, %v5911_v10, -inf  ;;  %v2477_v11 = vsel %vm63_vm0, %v5909_v18, 0.0 }
 0xe9d   :  { %v5434_v32 = vpop.eup %5433  ;;  %5139 = vmatmul.mubr.msk.f32.vlgmr.msra.gmra.mxu1 %vm63_vm0, %v5909_v18  ;;  %5153 = vmatmul.mubr.msk.f32.vlgmr.msra.gmra.mxu0 %vm63_vm0, %v5909_v18  ;;  %v2500_v33 = vmax.f32 %v2498_v30, %v2499_v31  ;;  %v3701_v30 = vld [vmem:[#allocation2 + $0x310] sm:$0xff] }
 0xe9e   :  { %v5926_v34 = vadd.f32 %v4478_v16, %v2460_v58  ;;  %v2452_v41 = vmul.f32 %v5434_v32, %v5901_v49  ;;  %5159 = vmatpush3.msra.mxu1 %v2727_v40  ;;  %5173 = vmatpush3.msra.mxu0 %v2881_v0  ;;  %v3599_v32 = vld [vmem:[#allocation2 + $0x2e8] sm:$0xff] }
 0xe9f   :  { %5160 = vmatprep.subr.mxu1 %v2726_v28  ;;  %5174 = vmatprep.subr.mxu0 %v2880_v29  ;;  %v2501_v26 = vrot.slane %v2500_v33, 4 }
 0xea0   :  { %v2461_v21 = vmul.f32 %v4477_v13, %v2452_v41  ;;  %5141 = vmatprep.mubr.msk.f32.mxu1 %vm63_vm0, %v5926_v34  ;;  %5155 = vmatprep.mubr.msk.f32.mxu0 %vm63_vm0, %v5926_v34  ;;  %v2507_v24 = vsel %vm63_vm0, %v5926_v34, -inf  ;;  %v2487_v59 = vsel %vm63_vm0, %v5926_v34, 0.0 }
 0xea1   :  { %5161 = vmatpush3.msra.mxu1 %v2726_v28  ;;  %5175 = vmatpush3.msra.mxu0 %v2880_v29  ;;  %v2502_v25 = vmax.f32 %v2500_v33, %v2501_v26  ;;  %v3600_v29 = vld [vmem:[#allocation2 + $0x2f0] sm:$0xff]  ;;  %v3700_v33 = vld [vmem:[#allocation2 + $0x308] sm:$0xff]  ;;  %v3699_v26 = vld [vmem:[#allocation2 + $0x300] sm:$0xff] }
 0xea2   :  { %v5933_v37 = vadd.f32 %v4478_v16, %v2461_v21  ;;  %5162 = vmatprep.subr.mxu1 %v2725_v22  ;;  %5176 = vmatprep.subr.mxu0 %v2879_v35  ;;  %v2476_v16 = vsel %vm63_vm0, %v5911_v10, 0.0 }
 0xea3   :  { %5163 = vmatpush3.msra.mxu1 %v2725_v22  ;;  %5177 = vmatpush3.msra.mxu0 %v2879_v35  ;;  %v2503_v46 = vrot.slane %v2502_v25, 2  ;;  %v2478_v58 = vadd.f32 %v2477_v11, %v2476_v16  ;;  %v3598_v22 = vld [vmem:[#allocation2 + $0x2e0] sm:$0xff] }
 0xea4   :  { %5142 = vmatmul.mubr.msk.f32.gmra.mxu1 %vm63_vm0, %v5933_v37  ;;  %5156 = vmatmul.mubr.msk.f32.gmra.mxu0 %vm63_vm0, %v5933_v37  ;;  %v2508_v23 = vsel %vm63_vm0, %v5933_v37, -inf  ;;  %v2488_v13 = vsel %vm63_vm0, %v5933_v37, 0.0 }
 0xea5   :  { %5164 = vmatprep.subr.mxu1 %v2724_v42  ;;  %5166 = vmatprep.mubr.msk.f32.mxu1 %vm63_vm0, %v5911_v10  ;;  %v2509_v38 = vmax.f32 %v2507_v24, %v2508_v23  ;;  %v2504_v49 = vmax.f32 %v2502_v25, %v2503_v46  ;;  %v2489_v17 = vadd.f32 %v2488_v13, %v2487_v59  ;;  %v2479_v31 = vrot.slane %v2478_v58, 4  ;;  %v4038_v25 = vld [vmem:[#allocation2 + $0x370] sm:$0xff]  ;;  %v4036_v24 = vld [vmem:[#allocation2 + $0x360] sm:$0xff] }
 0xea6   :  { %5178 = vmatprep.subr.mxu0 %v2878_v44  ;;  %5180 = vmatprep.mubr.msk.f32.mxu0 %vm63_vm0, %v5911_v10 }
 0xea7   :  { %5165 = vmatpush3.msra.mxu1 %v2724_v42  ;;  %5179 = vmatpush3.msra.mxu0 %v2878_v44  ;;  %v2510_v8 = vrot.slane %v2509_v38, 4  ;;  %v2505_v55 = vrot.slane %v2504_v49, 1  ;;  %v2490_v28 = vrot.slane %v2489_v17, 4  ;;  %v2480_v35 = vadd.f32 %v2479_v31, %v2478_v58 }
 0xea8   :  { %5186 = vmatprep.subr.mxu1 %v2877_v39  ;;  %5200 = vmatprep.subr.mxu0 %v3063_v45  ;;  %v5515_v44 = vmov 0.0  }
 0xea9   :  { %5167 = vmatmul.mubr.msk.f32.vlgmr.msra.gmra.mxu1 %vm63_vm0, %v5909_v18  ;;  %5181 = vmatmul.mubr.msk.f32.vlgmr.msra.gmra.mxu0 %vm63_vm0, %v5909_v18  ;;  %v2511_v50 = vmax.f32 %v2509_v38, %v2510_v8  ;;  %v2506_v0 = vmax.f32 %v2504_v49, %v2505_v55  ;;  %v2491_v41 = vadd.f32 %v2490_v28, %v2489_v17  ;;  %v2481_v42 = vrot.slane %v2480_v35, 2  ;;  %v4035_v38 = vld [vmem:[#allocation2 + $0x358] sm:$0xff] }
 0xeaa   :  { %5187 = vmatpush3.msra.mxu1 %v2877_v39  ;;  %5201 = vmatpush3.msra.mxu0 %v3063_v45  ;;  %v4037_v39 = vld [vmem:[#allocation2 + $0x368] sm:$0xff] }
 0xeab   :  { %5169 = vmatprep.mubr.msk.f32.mxu1 %vm63_vm0, %v5926_v34  ;;  %5183 = vmatprep.mubr.msk.f32.mxu0 %vm63_vm0, %v5926_v34  ;;  %v2512_v53 = vrot.slane %v2511_v50, 2  ;;  %v2492_v21 = vrot.slane %v2491_v41, 2  ;;  %v2482_v45 = vadd.f32 %v2481_v42, %v2480_v35  ;;  %v4491_v35 = vld [vmem:[#allocation5 + $0xf] ss:$0 sm:$0xff] }
 0xeac   :  { %5188 = vmatprep.subr.mxu1 %v2876_v27  ;;  %5202 = vmatprep.subr.mxu0 %v3062_v47 }
 0xead   :  { %5189 = vmatpush3.msra.mxu1 %v2876_v27  ;;  %5203 = vmatpush3.msra.mxu0 %v3062_v47  ;;  %v2513_v2 = vmax.f32 %v2511_v50, %v2512_v53  ;;  %v2493_v23 = vadd.f32 %v2492_v21, %v2491_v41  ;;  %v2483_v8 = vrot.slane %v2482_v45, 1  ;;  %v4188_v27 = vld [vmem:[#allocation2 + $0x390] sm:$0xff]  ;;  %v4186_v50 = vld [vmem:[#allocation2 + $0x380] sm:$0xff] }
 0xeae   :  { %5190 = vmatprep.subr.mxu1 %v2875_v51  ;;  %5204 = vmatprep.subr.mxu0 %v3061_v52 }
 0xeaf   :  { %5170 = vmatmul.mubr.msk.f32.gmra.mxu1 %vm63_vm0, %v5933_v37  ;;  %5184 = vmatmul.mubr.msk.f32.gmra.mxu0 %vm63_vm0, %v5933_v37  ;;  %v2514_v61 = vrot.slane %v2513_v2, 1  ;;  %v2494_v46 = vrot.slane %v2493_v23, 1  ;;  %v2484_v49 = vadd.f32 %v2483_v8, %v2482_v45 }
 0xeb0   :  { %5191 = vmatpush3.msra.mxu1 %v2875_v51  ;;  %5205 = vmatpush3.msra.mxu0 %v3061_v52  ;;  %v4185_v52 = vld [vmem:[#allocation2 + $0x378] sm:$0xff] }
 0xeb1   :  { %5192 = vmatprep.subr.mxu1 %v2874_v54  ;;  %5194 = vmatprep.mubr.msk.f32.mxu1 %vm63_vm0, %v5911_v10  ;;  %v2515_v40 = vmax.f32 %v2513_v2, %v2514_v61  ;;  %v2495_v47 = vadd.f32 %v2494_v46, %v2493_v23 }
 0xeb2   :  { %5206 = vmatprep.subr.mxu0 %v3060_v60  ;;  %5208 = vmatprep.mubr.msk.f32.mxu0 %vm63_vm0, %v5911_v10 }
 0xeb3   :  { %5193 = vmatpush3.msra.mxu1 %v2874_v54  ;;  %5207 = vmatpush3.msra.mxu0 %v3060_v60  ;;  %v5964_v1 = vsel %vm2474_vm4, %v2506_v0, %v2515_v40  ;;  %v2496_v51 = vmul.f32 0.0625, %v2495_v47  ;;  %v2517_v54 = vlaneseq }
 0xeb4   :  { %5214 = vmatprep.subr.mxu1 %v3164_v62  ;;  %5228 = vmatprep.subr.mxu0 %v3318_v63 }
 0xeb5   :  { %5195 = vmatmul.mubr.msk.f32.vlgmr.msra.gmra.mxu1 %vm63_vm0, %v5909_v18  ;;  %5209 = vmatmul.mubr.msk.f32.vlgmr.msra.gmra.mxu0 %vm63_vm0, %v5909_v18  ;;  %v6055_v55 = vshrl.u32 %v2517_v54, 7 }
 0xeb6   :  { %5215 = vmatpush3.msra.mxu1 %v3164_v62  ;;  %5229 = vmatpush3.msra.mxu0 %v3318_v63 }
 0xeb7   :  { %5197 = vmatprep.mubr.msk.f32.mxu1 %vm63_vm0, %v5926_v34  ;;  %5211 = vmatprep.mubr.msk.f32.mxu0 %vm63_vm0, %v5926_v34  ;;  %vm2634_vm6 = vcmp.lt.s32.totalorder %v6055_v55, 7  ;;  %vm2817_vm7 = vcmp.lt.s32.totalorder %v6055_v55, 6  ;;  %v2521_v17 = vadd.s32 24, %v6055_v55  ;;  %v2519_v11 = vadd.s32 8, %v6055_v55 }
 0xeb8   :  { %5216 = vmatprep.subr.mxu1 %v3163_v3  ;;  %5230 = vmatprep.subr.mxu0 %v3317_v4  ;;  %vm3254_vm10 = vcmp.lt.s32.totalorder %v6055_v55, 5  ;;  %vm3792_vm13 = vcmp.lt.s32.totalorder %v6055_v55, 4 }
 0xeb9   :  { %5217 = vmatpush3.msra.mxu1 %v3163_v3  ;;  %5231 = vmatpush3.msra.mxu0 %v3317_v4 }
 0xeba   :  { %5218 = vmatprep.subr.mxu1 %v3162_v36  ;;  %5232 = vmatprep.subr.mxu0 %v3316_v5 }
 0xebb   :  { %5198 = vmatmul.mubr.msk.f32.gmra.mxu1 %vm63_vm0, %v5933_v37  ;;  %5212 = vmatmul.mubr.msk.f32.gmra.mxu0 %vm63_vm0, %v5933_v37 }
 0xebc   :  { %5219 = vmatpush3.msra.mxu1 %v3162_v36  ;;  %5233 = vmatpush3.msra.mxu0 %v3316_v5 }
 0xebd   :  { %5220 = vmatprep.subr.mxu1 %v3161_v6  ;;  %5222 = vmatprep.mubr.msk.f32.mxu1 %vm63_vm0, %v5911_v10 }
 0xebe   :  { %5234 = vmatprep.subr.mxu0 %v3315_v7  ;;  %5236 = vmatprep.mubr.msk.f32.mxu0 %vm63_vm0, %v5911_v10 }
 0xebf   :  { %5221 = vmatpush3.msra.mxu1 %v3161_v6  ;;  %5235 = vmatpush3.msra.mxu0 %v3315_v7 }
 0xec0   :  { %5242 = vmatprep.subr.mxu1 %v3314_v9  ;;  %5256 = vmatprep.subr.mxu0 %v3500_v48 }
 0xec1   :  { %5223 = vmatmul.mubr.msk.f32.vlgmr.msra.gmra.mxu1 %vm63_vm0, %v5909_v18  ;;  %5237 = vmatmul.mubr.msk.f32.vlgmr.msra.gmra.mxu0 %vm63_vm0, %v5909_v18 }
 0xec2   :  { %5243 = vmatpush3.msra.mxu1 %v3314_v9  ;;  %5257 = vmatpush3.msra.mxu0 %v3500_v48 }
 0xec3   :  { %5225 = vmatprep.mubr.msk.f32.mxu1 %vm63_vm0, %v5926_v34  ;;  %5239 = vmatprep.mubr.msk.f32.mxu0 %vm63_vm0, %v5926_v34 }
 0xec4   :  { %5244 = vmatprep.subr.mxu1 %v3313_v57  ;;  %5258 = vmatprep.subr.mxu0 %v3499_v43 }
 0xec5   :  { %5245 = vmatpush3.msra.mxu1 %v3313_v57  ;;  %5259 = vmatpush3.msra.mxu0 %v3499_v43 }
 0xec6   :  { %5246 = vmatprep.subr.mxu1 %v3312_v12  ;;  %5260 = vmatprep.subr.mxu0 %v3498_v56 }
 0xec7   :  { %5226 = vmatmul.mubr.msk.f32.gmra.mxu1 %vm63_vm0, %v5933_v37  ;;  %5240 = vmatmul.mubr.msk.f32.gmra.mxu0 %vm63_vm0, %v5933_v37 }
 0xec8   :  { %5247 = vmatpush3.msra.mxu1 %v3312_v12  ;;  %5261 = vmatpush3.msra.mxu0 %v3498_v56 }
 0xec9   :  { %5248 = vmatprep.subr.mxu1 %v3311_v14  ;;  %5250 = vmatprep.mubr.msk.f32.mxu1 %vm63_vm0, %v5911_v10 }
 0xeca   :  { %5262 = vmatprep.subr.mxu0 %v3497_v15  ;;  %5264 = vmatprep.mubr.msk.f32.mxu0 %vm63_vm0, %v5911_v10 }
 0xecb   :  { %5249 = vmatpush3.msra.mxu1 %v3311_v14  ;;  %5263 = vmatpush3.msra.mxu0 %v3497_v15 }
 0xecc   :  { %5270 = vmatprep.subr.mxu1 %v3601_v19  ;;  %5284 = vmatprep.subr.mxu0 %v3702_v20 }
 0xecd   :  { %5251 = vmatmul.mubr.msk.f32.vlgmr.msra.gmra.mxu1 %vm63_vm0, %v5909_v18  ;;  %5265 = vmatmul.mubr.msk.f32.vlgmr.msra.gmra.mxu0 %vm63_vm0, %v5909_v18 }
 0xece   :  { %5271 = vmatpush3.msra.mxu1 %v3601_v19  ;;  %5285 = vmatpush3.msra.mxu0 %v3702_v20 }
 0xecf   :  { %5253 = vmatprep.mubr.msk.f32.mxu1 %vm63_vm0, %v5926_v34  ;;  %5267 = vmatprep.mubr.msk.f32.mxu0 %vm63_vm0, %v5926_v34 }
 0xed0   :  { %5272 = vmatprep.subr.mxu1 %v3600_v29  ;;  %5286 = vmatprep.subr.mxu0 %v3701_v30 }
 0xed1   :  { %5273 = vmatpush3.msra.mxu1 %v3600_v29  ;;  %5287 = vmatpush3.msra.mxu0 %v3701_v30  ;;  %v6075_v29 = vand.u32 15, %v2521_v17 }
 0xed2   :  { %5274 = vmatprep.subr.mxu1 %v3599_v32  ;;  %5288 = vmatprep.subr.mxu0 %v3700_v33 }
 0xed3   :  { %5254 = vmatmul.mubr.msk.f32.gmra.mxu1 %vm63_vm0, %v5933_v37  ;;  %5268 = vmatmul.mubr.msk.f32.gmra.mxu0 %vm63_vm0, %v5933_v37  ;;  %vm2842_vm8 = vcmp.le.s32.totalorder %v6075_v29, 13  ;;  %vm3279_vm11 = vcmp.le.s32.totalorder %v6075_v29, 12  ;;  %vm3817_vm14 = vcmp.le.s32.totalorder %v6075_v29, 11 }
 0xed4   :  { %5275 = vmatpush3.msra.mxu1 %v3599_v32  ;;  %5289 = vmatpush3.msra.mxu0 %v3700_v33  ;;  %v6079_v33 = vand.u32 15, %v2519_v11  ;;  %v4493_v8 = vsel %vm2842_vm8, 1.0, %v5515_v44 }
 0xed5   :  { %5276 = vmatprep.subr.mxu1 %v3598_v22  ;;  %5278 = vmatprep.mubr.msk.f32.mxu1 %vm63_vm0, %v5911_v10 }
 0xed6   :  { %5290 = vmatprep.subr.mxu0 %v3699_v26  ;;  %5292 = vmatprep.mubr.msk.f32.mxu0 %vm63_vm0, %v5911_v10  ;;  %vm2840_vm9 = vcmp.le.s32.totalorder %v6079_v33, 13  ;;  %vm3277_vm12 = vcmp.le.s32.totalorder %v6079_v33, 12  ;;  %vm3815_vm15 = vcmp.le.s32.totalorder %v6079_v33, 11 }
 0xed7   :  { %5277 = vmatpush3.msra.mxu1 %v3598_v22  ;;  %5291 = vmatpush3.msra.mxu0 %v3699_v26  ;;  %v4534_v55 = vsel %vm3815_vm15, 1.0, %v5515_v44 }
 0xed8   :  { %5312 = vmatprep.subr.mxu0 %v5515_v44  ;;  %5279 = vmatmul.mubr.msk.f32.vlgmr.msra.gmra.mxu1 %vm63_vm0, %v5909_v18 }
 0xed9   :  { %5293 = vmatmul.mubr.msk.f32.vlgmr.msra.gmra.mxu0 %vm63_vm0, %v5909_v18  ;;  %5281 = vmatprep.mubr.msk.f32.mxu1 %vm63_vm0, %v5926_v34  ;;  %v2472_v18 = vrot.slane %v5926_v34, 7 }
 0xeda   :  { %5313 = vmatpush3.msra.mxu0 %v4038_v25  ;;  %5295 = vmatprep.mubr.msk.f32.mxu0 %vm63_vm0, %v5926_v34 }
 0xedb   :  { %5314 = vmatprep.subr.mxu0 %v5515_v44  ;;  %5298 = vmatprep.subr.mxu1 %v5515_v44  ;;  %v2475_v34 = vsel %vm2474_vm4, %v5911_v10, %v2472_v18  ;;  %v2486_v10 = vmul.f32 0.0625, %v2484_v49 }
 0xedc   :  { %5315 = vmatpush3.msra.mxu0 %v4037_v39  ;;  %5282 = vmatmul.mubr.msk.f32.gmra.mxu1 %vm63_vm0, %v5933_v37 }
 0xedd   :  { %5316 = vmatprep.subr.mxu0 %v5515_v44  ;;  %5296 = vmatmul.mubr.msk.f32.gmra.mxu0 %vm63_vm0, %v5933_v37  ;;  %v4187_v37 = vld [vmem:[#allocation2 + $0x388] sm:$0xff]  ;;  %v2497_v53 = vsel %vm2474_vm4, %v2486_v10, %v2496_v51 }
 0xede   :  { %5317 = vmatpush3.msra.mxu0 %v4036_v24  ;;  %5320 = vmatprep.mubr.msk.f32.mxu0 %vm5516_vm5, %v5515_v44 }
 0xedf   :  { %5318 = vmatprep.subr.mxu0 %v5515_v44  ;;  %5304 = vmatprep.mubr.msk.f32.mxu1 %vm5516_vm5, %v5515_v44 }
 0xee0   :  { %5319 = vmatpush3.msra.mxu0 %v4035_v38 }
 0xee1   :  { %5332 = vmatprep.subr.mxu0 %v5515_v44  ;;  %5321 = vmatmul.mubr.msk.f32.vlgmr.msra.gmra.mxu0 %vm63_vm0, %v2475_v34 }
 0xee2   :  { %5333 = vmatpush3.msra.mxu0 %v4188_v27  ;;  %5340 = vmatprep.mubr.msk.f32.mxu0 %vm5516_vm5, %v5515_v44 }
 0xee3   :  { %5334 = vmatprep.subr.mxu0 %v5515_v44 }
 0xee4   :  { %5335 = vmatpush3.msra.mxu0 %v4187_v37 }
 0xee5   :  { %5336 = vmatprep.subr.mxu0 %v5515_v44 }
 0xee6   :  { %5337 = vmatpush3.msra.mxu0 %v4186_v50  ;;  %v4492_v50 = vsel %vm2840_vm9, 1.0, %v5515_v44 }
 0xee7   :  { %5338 = vmatprep.subr.mxu0 %v5515_v44 }
 0xee8   :  { %5339 = vmatpush3.msra.mxu0 %v4185_v52 }
 0xee9   :  { %5341 = vmatmul.mubr.msk.f32.vlgmr.msra.gmra.mxu0 %vm63_vm0, %v2497_v53 }
 0xf5d   :  { %v5140_v2 = vpop.f32.mrf.mxu1  ;;  %v5154_v60 = vpop.f32.mrf.mxu0 }
 0xf5e   :  { %v2631_v62 = vrot.slane %v5140_v2, 1 }
 0xf5f   :  { %v2611_v61 = vpop.f32.mrf.mxu1  ;;  %v2705_v40 = vpop.f32.mrf.mxu0 }
 0xf60   :  { %v2630_v63 = vrot.slane %v2611_v61, 1 }
 0xf62   :  { %v2637_v0 = vsel %vm2634_vm6, %v2630_v63, %v2631_v62 }
 0xf63   :  { %v2706_v3 = vadd.f32 %v2705_v40, %v2637_v0 }
 0xf64   :  { %v5143_v4 = vpop.f32.mrf.mxu1  ;;  %v5157_v36 = vpop.f32.mrf.mxu0 }
 0xf65   :  { %v2633_v5 = vrot.slane %v5143_v4, 1 }
 0xf66   :  { %v2621_v6 = vpop.f32.mrf.mxu1  ;;  %v2715_v7 = vpop.f32.mrf.mxu0 }
 0xf67   :  { %v2638_v9 = vsel %vm2634_vm6, %v2633_v5, %v2630_v63  ;;  %v2632_v48 = vrot.slane %v2621_v6, 1 }
 0xf68   :  { %v2721_v57 = vadd.f32 %v5157_v36, %v2638_v9 }
 0xf69   :  { %v2636_v43 = vsel %vm2634_vm6, %v2631_v62, %v2632_v48  ;;  %v2635_v12 = vsel %vm2634_vm6, %v2632_v48, %v2633_v5  ;;  %v5168_v56 = vpop.f32.mrf.mxu1  ;;  %v6066_v13 = vpop.f32.mrf.mxu0 }
 0xf6a   :  { %v2711_v14 = vadd.f32 %v5154_v60, %v2636_v43  ;;  %v2716_v15 = vadd.f32 %v2715_v7, %v2635_v12  ;;  %v2814_v19 = vrot.slane %v5168_v56, 2  ;;  %v2968_v9 = vrot.slane %v6066_v13, 1 }
 0xf6b   :  { %v2794_v16 = vpop.f32.mrf.mxu1  ;;  %v6069_v59 = vpop.f32.mrf.mxu0 }
 0xf6c   :  { %v2813_v20 = vrot.slane %v2794_v16, 2  ;;  %v2967_v36 = vrot.slane %v6069_v59, 1 }
 0xf6e   :  { %v2820_v58 = vsel %vm2817_vm7, %v2813_v20, %v2814_v19  ;;  %v2973_v16 = vsel %vm2634_vm6, %v2967_v36, %v2968_v9 }
 0xf6f   :  { %v2822_v28 = vadd.f32 %v2820_v58, %v2706_v3  ;;  %v5171_v30 = vpop.f32.mrf.mxu1  ;;  %v6077_v31 = vpop.f32.mrf.mxu0 }
 0xf70   :  { %v2816_v32 = vrot.slane %v5171_v30, 2  ;;  %v2970_v7 = vrot.slane %v6077_v31, 1 }
 0xf71   :  { %v2804_v41 = vpop.f32.mrf.mxu1  ;;  %v6081_v22 = vpop.f32.mrf.mxu0  ;;  %v2831_v39 = vadd.f32 %v4491_v35, %v2822_v28 }
 0xf72   :  { %v2821_v26 = vsel %vm2817_vm7, %v2816_v32, %v2813_v20  ;;  %v2815_v21 = vrot.slane %v2804_v41, 2 }
 0xf73   :  { %v2825_v42 = vadd.f32 %v2821_v26, %v2721_v57  ;;  %v2835_v51 = vmax.f32 %v2831_v39, 0.0 }
 0xf74   :  { %v2818_v25 = vsel %vm2817_vm7, %v2815_v21, %v2816_v32  ;;  %v2819_v23 = vsel %vm2817_vm7, %v2814_v19, %v2815_v21  ;;  %v2974_v19 = vsel %vm2634_vm6, %v2970_v7, %v2967_v36 }
 0xf75   :  { %v2834_v45 = vadd.f32 %v4491_v35, %v2825_v42  ;;  %v2823_v24 = vadd.f32 %v2819_v23, %v2711_v14  ;;  %v2824_v18 = vadd.f32 %v2818_v25, %v2716_v15  ;;  %v6091_v46 = vpop.f32.mrf.mxu1  ;;  %v5210_v38 = vpop.f32.mrf.mxu0  ;;  %v2855_v0 = vsel %vm349_vm1, %v2835_v51, -inf }
 0xf76   :  { %v2969_v14 = vrot.slane %v6081_v22, 1  ;;  %v3150_v15 = vrot.slane %v5210_v38, 2 }
 0xf77   :  { %v2838_v27 = vmax.f32 %v2834_v45, 0.0  ;;  %v2832_v34 = vadd.f32 %v4491_v35, %v2823_v24  ;;  %v2833_v47 = vadd.f32 %v4491_v35, %v2824_v18  ;;  %v3041_v37 = vpop.f32.mrf.mxu1  ;;  %v3130_v49 = vpop.f32.mrf.mxu0 }
 0xf78   :  { %v3149_v48 = vrot.slane %v3130_v49, 2  ;;  %v3042_v17 = vadd.f32 %v3041_v37, %v2973_v16  ;;  %v2972_v26 = vsel %vm2634_vm6, %v2968_v9, %v2969_v14  ;;  %v2971_v42 = vsel %vm2634_vm6, %v2969_v14, %v2970_v7 }
 0xf79   :  { %v2854_v52 = vmul.f32 %v4493_v8, %v2838_v27  ;;  %v2836_v10 = vmax.f32 %v2832_v34, 0.0  ;;  %v2837_v53 = vmax.f32 %v2833_v47, 0.0  ;;  %v3047_v47 = vadd.f32 %v6091_v46, %v2972_v26 }
 0xf7a   :  { %v3155_v28 = vsel %vm2817_vm7, %v3149_v48, %v3150_v15  ;;  %v4512_v7 = vsel %vm3279_vm11, 1.0, %v5515_v44  ;;  %v4511_v16 = vsel %vm3277_vm12, 1.0, %v5515_v44 }
 0xf7b   :  { %v2852_v54 = vmul.f32 %v4492_v50, %v2836_v10  ;;  %v2864_v2 = vsel %vm349_vm1, %v2837_v53, -inf  ;;  %v2865_v60 = vsel %vm349_vm1, %v2854_v52, -inf  ;;  %v5199_v61 = vpop.f32.mrf.mxu1  ;;  %v5213_v62 = vpop.f32.mrf.mxu0  ;;  %v3157_v23 = vadd.f32 %v3155_v28, %v3042_v17  ;;  %v4510_v10 = vld [vmem:[#allocation5 + $0x10] ss:$0 sm:$0xff] }
 0xf7c   :  { %v2866_v63 = vmax.f32 %v2864_v2, %v2865_v60  ;;  %v3152_v59 = vrot.slane %v5213_v62, 2  ;;  %v3057_v41 = vadd.f32 %v5199_v61, %v2974_v19 }
 0xf7d   :  { %v2856_v40 = vsel %vm349_vm1, %v2852_v54, -inf  ;;  %v3051_v3 = vpop.f32.mrf.mxu1  ;;  %v3140_v4 = vpop.f32.mrf.mxu0 }
 0xf7e   :  { %v2857_v5 = vmax.f32 %v2855_v0, %v2856_v40  ;;  %v2867_v6 = vrot.slane %v2866_v63, 4  ;;  %v3151_v30 = vrot.slane %v3140_v4, 2  ;;  %v3156_v21 = vsel %vm2817_vm7, %v3152_v59, %v3149_v48 }
 0xf7f   :  { %v3052_v39 = vadd.f32 %v3051_v3, %v2971_v42  ;;  %v3160_v37 = vadd.f32 %v3156_v21, %v3057_v41 }
 0xf80   :  { %v2858_v57 = vrot.slane %v2857_v5, 4  ;;  %v2868_v43 = vmax.f32 %v2866_v63, %v2867_v6  ;;  %v3153_v38 = vsel %vm2817_vm7, %v3151_v30, %v3152_v59  ;;  %v3154_v8 = vsel %vm2817_vm7, %v3150_v15, %v3151_v30 }
 0xf81   :  { %v5224_v12 = vpop.f32.mrf.mxu1  ;;  %v6102_v56 = vpop.f32.mrf.mxu0  ;;  %v3158_v2 = vadd.f32 %v3154_v8, %v3047_v47  ;;  %v3159_v60 = vadd.f32 %v3153_v38, %v3052_v39 }
 0xf82   :  { %v2859_v11 = vmax.f32 %v2857_v5, %v2858_v57  ;;  %v2869_v58 = vrot.slane %v2868_v43, 2  ;;  %v3251_v31 = vrot.slane %v5224_v12, 3 }
 0xf83   :  { %v3231_v13 = vpop.f32.mrf.mxu1  ;;  %v6110_v20 = vpop.f32.mrf.mxu0 }
 0xf84   :  { %v3250_v32 = vrot.slane %v3231_v13, 3  ;;  %v2860_v22 = vrot.slane %v2859_v11, 2  ;;  %v2870_v35 = vmax.f32 %v2868_v43, %v2869_v58  ;;  %v3404_v15 = vrot.slane %v6110_v20, 1 }
 0xf86   :  { %v3257_v25 = vsel %vm3254_vm10, %v3250_v32, %v3251_v31  ;;  %v2861_v18 = vmax.f32 %v2859_v11, %v2860_v22  ;;  %v2871_v34 = vrot.slane %v2870_v35, 1  ;;  %v3405_v11 = vrot.slane %v6102_v56, 1 }
 0xf87   :  { %v5227_v45 = vpop.f32.mrf.mxu1  ;;  %v6122_v24 = vpop.f32.mrf.mxu0  ;;  %v3259_v49 = vadd.f32 %v3257_v25, %v3157_v23 }
 0xf88   :  { %v3253_v27 = vrot.slane %v5227_v45, 3  ;;  %v2862_v52 = vrot.slane %v2861_v18, 1  ;;  %v2872_v0 = vmax.f32 %v2870_v35, %v2871_v34  ;;  %v3407_v58 = vrot.slane %v6122_v24, 1 }
 0xf89   :  { %v3241_v50 = vpop.f32.mrf.mxu1  ;;  %v6129_v51 = vpop.f32.mrf.mxu0  ;;  %v3268_v40 = vadd.f32 %v4510_v10, %v3259_v49  ;;  %v3410_v35 = vsel %vm2634_vm6, %v3404_v15, %v3405_v11 }
 0xf8a   :  { %v3258_v53 = vsel %vm3254_vm10, %v3253_v27, %v3250_v32  ;;  %v3252_v54 = vrot.slane %v3241_v50, 3  ;;  %v2863_v62 = vmax.f32 %v2861_v18, %v2862_v52  ;;  %v3406_v28 = vrot.slane %v6129_v51, 1 }
 0xf8b   :  { %v3262_v61 = vadd.f32 %v3258_v53, %v3160_v37  ;;  %v3272_v59 = vmax.f32 %v3268_v40, 0.0  ;;  %v3411_v24 = vsel %vm2634_vm6, %v3407_v58, %v3404_v15  ;;  %v3861_v53 = vld [vmem:[#allocation2 + $0x330] sm:$0xff] }
 0xf8c   :  { %v3255_v46 = vsel %vm3254_vm10, %v3252_v54, %v3253_v27  ;;  %v3256_v63 = vsel %vm3254_vm10, %v3251_v31, %v3252_v54  ;;  %v6143_v9 = vsel %vm2474_vm4, %v2863_v62, %v2872_v0  ;;  %v3409_v38 = vsel %vm2634_vm6, %v3405_v11, %v3406_v28  ;;  %v3860_v54 = vld [vmem:[#allocation2 + $0x328] sm:$0xff]  ;;  %5299 = vmatpush3.msra.mxu1 %v3861_v53 }
 0xf8d   :  { %v3271_v3 = vadd.f32 %v4510_v10, %v3262_v61  ;;  %v3260_v4 = vadd.f32 %v3256_v63, %v3158_v2  ;;  %v3261_v36 = vadd.f32 %v3255_v46, %v3159_v60  ;;  %v5252_v5 = vpop.f32.mrf.mxu1  ;;  %v5266_v6 = vpop.f32.mrf.mxu0  ;;  %v3292_v21 = vsel %vm349_vm1, %v3272_v59, -inf  ;;  %5300 = vmatprep.subr.mxu1 %v5515_v44 }
 0xf8e   :  { %v3587_v42 = vrot.slane %v5266_v6, 2  ;;  %v3408_v51 = vsel %vm2634_vm6, %v3406_v28, %v3407_v58  ;;  %v3484_v2 = vadd.f32 %v5252_v5, %v3409_v38  ;;  %5301 = vmatpush3.msra.mxu1 %v3860_v54  ;;  %vm3951_vm6 = vcmask 1042432  }
 0xf8f   :  { %v3275_v48 = vmax.f32 %v3271_v3, 0.0  ;;  %v3269_v57 = vadd.f32 %v4510_v10, %v3260_v4  ;;  %v3270_v43 = vadd.f32 %v4510_v10, %v3261_v36  ;;  %v3478_v12 = vpop.f32.mrf.mxu1  ;;  %v3567_v14 = vpop.f32.mrf.mxu0  ;;  %v3859_v36 = vld [vmem:[#allocation2 + $0x320] sm:$0xff]  ;;  %5302 = vmatprep.subr.mxu1 %v5515_v44 }
 0xf90   :  { %v3586_v32 = vrot.slane %v3567_v14, 2  ;;  %v3479_v45 = vadd.f32 %v3478_v12, %v3410_v35  ;;  %5303 = vmatpush3.msra.mxu1 %v3859_v36 }
 0xf91   :  { %v3291_v17 = vmul.f32 %v4512_v7, %v3275_v48  ;;  %v3273_v19 = vmax.f32 %v3269_v57, 0.0  ;;  %v3274_v13 = vmax.f32 %v3270_v43, 0.0  ;;  %5307 = vmatprep.subr.mxu1 %v5515_v44 }
 0xf92   :  { %v3592_v8 = vsel %vm2817_vm7, %v3586_v32, %v3587_v42 }
 0xf93   :  { %v3289_v30 = vmul.f32 %v4511_v16, %v3273_v19  ;;  %v3301_v31 = vsel %vm349_vm1, %v3274_v13, -inf  ;;  %v5255_v41 = vpop.f32.mrf.mxu1  ;;  %v5269_v20 = vpop.f32.mrf.mxu0  ;;  %v3302_v22 = vsel %vm349_vm1, %v3291_v17, -inf  ;;  %v3594_v60 = vadd.f32 %v3592_v8, %v3479_v45 }
 0xf94   :  { %v3303_v26 = vmax.f32 %v3301_v31, %v3302_v22  ;;  %v3589_v56 = vrot.slane %v5269_v20, 2  ;;  %v3494_v47 = vadd.f32 %v5255_v41, %v3411_v24 }
 0xf95   :  { %v3488_v25 = vpop.f32.mrf.mxu1  ;;  %v3577_v23 = vpop.f32.mrf.mxu0  ;;  %v3293_v39 = vsel %vm349_vm1, %v3289_v30, -inf }
 0xf96   :  { %v3294_v18 = vmax.f32 %v3292_v21, %v3293_v39  ;;  %v3588_v27 = vrot.slane %v3577_v23, 2  ;;  %v3304_v34 = vrot.slane %v3303_v26, 4  ;;  %v3593_v50 = vsel %vm2817_vm7, %v3589_v56, %v3586_v32 }
 0xf97   :  { %v3489_v61 = vadd.f32 %v3488_v25, %v3408_v51  ;;  %v3597_v6 = vadd.f32 %v3593_v50, %v3494_v47  ;;  %v4535_v51 = vsel %vm3817_vm14, 1.0, %v5515_v44 }
 0xf98   :  { %v5280_v37 = vpop.f32.mrf.mxu1  ;;  %v3295_v49 = vrot.slane %v3294_v18, 4  ;;  %v3305_v10 = vmax.f32 %v3303_v26, %v3304_v34  ;;  %v3591_v63 = vsel %vm2817_vm7, %v3587_v42, %v3588_v27  ;;  %v3590_v5 = vsel %vm2817_vm7, %v3588_v27, %v3589_v56  ;;  %v4533_v26 = vld [vmem:[#allocation5 + $0x11] ss:$0 sm:$0xff] }
 0xf99   :  { %v5294_v52 = vpop.f32.mrf.mxu0  ;;  %v3688_v0 = vrot.slane %v5280_v37, 3  ;;  %v3595_v59 = vadd.f32 %v3591_v63, %v3484_v2  ;;  %v3596_v41 = vadd.f32 %v3590_v5, %v3489_v61 }
 0xf9a   :  { %v3668_v62 = vpop.f32.mrf.mxu1  ;;  %v3296_v46 = vmax.f32 %v3294_v18, %v3295_v49  ;;  %v3306_v4 = vrot.slane %v3305_v10, 2  ;;  %v3789_v43 = vrot.slane %v5294_v52, 4 }
 0xf9b   :  { %v3687_v40 = vrot.slane %v3668_v62, 3  ;;  %v3769_v3 = vpop.f32.mrf.mxu0 }
 0xf9c   :  { %v3788_v7 = vrot.slane %v3769_v3, 4  ;;  %v5283_v48 = vpop.f32.mrf.mxu1  ;;  %v3297_v57 = vrot.slane %v3296_v46, 2  ;;  %v3307_v16 = vmax.f32 %v3305_v10, %v3306_v4 }
 0xf9d   :  { %v3693_v12 = vsel %vm3254_vm10, %v3687_v40, %v3688_v0  ;;  %v3690_v14 = vrot.slane %v5283_v48, 3  ;;  %v5297_v15 = vpop.f32.mrf.mxu0 }
 0xf9e   :  { %v3695_v17 = vadd.f32 %v3693_v12, %v3594_v60  ;;  %v3791_v19 = vrot.slane %v5297_v15, 4  ;;  %v3678_v13 = vpop.f32.mrf.mxu1  ;;  %v3298_v11 = vmax.f32 %v3296_v46, %v3297_v57  ;;  %v3795_v58 = vsel %vm3792_vm13, %v3788_v7, %v3789_v43 }
 0xf9f   :  { %v3694_v28 = vsel %vm3254_vm10, %v3690_v14, %v3687_v40  ;;  %v3689_v30 = vrot.slane %v3678_v13, 3  ;;  %v3779_v31 = vpop.f32.mrf.mxu0  ;;  %v3308_v32 = vrot.slane %v3307_v16, 1 }
 0xfa0   :  { %v3797_v20 = vadd.f32 %v3795_v58, %v3695_v17  ;;  %v3698_v22 = vadd.f32 %v3694_v28, %v3597_v6  ;;  %v3790_v35 = vrot.slane %v3779_v31, 4  ;;  %v3796_v21 = vsel %vm3792_vm13, %v3791_v19, %v3788_v7  ;;  %v4536_v31 = vld [vmem:[#allocation5 + $0x12] ss:$0 sm:$0xff] }
 0xfa1   :  { %v3691_v42 = vsel %vm3254_vm10, %v3689_v30, %v3690_v14  ;;  %v3692_v56 = vsel %vm3254_vm10, %v3688_v0, %v3689_v30  ;;  %v6189_v25 = vpop.f32.mrf.mxu0  ;;  %v3299_v23 = vrot.slane %v3298_v11, 1  ;;  %v3309_v34 = vmax.f32 %v3307_v16, %v3308_v32  ;;  %v3941_v30 = vld [vmem:[#allocation2 + $0x338] sm:$0x7] }
 0xfa2   :  { %v3800_v39 = vadd.f32 %v3796_v21, %v3698_v22  ;;  %v3696_v45 = vadd.f32 %v3692_v56, %v3595_v59  ;;  %v3697_v24 = vadd.f32 %v3691_v42, %v3596_v41  ;;  %v3793_v18 = vsel %vm3792_vm13, %v3790_v35, %v3791_v19  ;;  %v4538_v21 = vld [vmem:[#allocation5 + $0x13] ss:$0 sm:$0xff] }
 0xfa3   :  { %v3794_v38 = vsel %vm3792_vm13, %v3789_v43, %v3790_v35  ;;  %v5322_v8 = vpop.f32.mrf.mxu0  ;;  %v3300_v27 = vmax.f32 %v3298_v11, %v3299_v23  ;;  %v3806_v47 = vadd.f32 %v4533_v26, %v3797_v20  ;;  %v4033_v35 = vld [vmem:[#allocation2 + $0x348] sm:$0xff] }
 0xfa4   :  { %v3809_v37 = vadd.f32 %v4533_v26, %v3800_v39  ;;  %v3798_v49 = vadd.f32 %v3794_v38, %v3696_v45  ;;  %v3799_v50 = vadd.f32 %v3793_v18, %v3697_v24  ;;  %v4266_v8 = vld [vmem:[#allocation2 + $0x3b0] sm:$0xff] }
 0xfa5   :  { %v3310_v52 = vsel %vm2474_vm4, %v3300_v27, %v3309_v34  ;;  %v3810_v2 = vmax.f32 %v3806_v47, 0.0  ;;  %v4265_v27 = vld [vmem:[#allocation2 + $0x3a8] sm:$0xff]  ;;  %v4264_v34 = vld [vmem:[#allocation2 + $0x3a0] sm:$0xff]  ;;  %v4263_v47 = vld [vmem:[#allocation2 + $0x398] sm:$0xff] }
 0xfa6   :  { %v3813_v10 = vmax.f32 %v3809_v37, 0.0  ;;  %v3807_v53 = vadd.f32 %v4533_v26, %v3798_v49  ;;  %v3808_v54 = vadd.f32 %v4533_v26, %v3799_v50  ;;  %3850 = vrot.lane.b32.xlu0 %v3310_v52, %s5511_s19  ;;  %v4032_v26 = vld [vmem:[#allocation2 + $0x340] sm:$0xff]  ;;  %s5517_s19 = smov [#allocation7]  }
 0xfa7   :  { %v3830_v4 = vsel %vm349_vm1, %v3810_v2, -inf  ;;  %s4354_s24 = sshll.u32 %s5517_s19, 4  ;;  %s4355_s24 = int_to_ptr.vmem [resolvable:$true] %s4354_s24 }
 0xfa8   :  { %v3829_v60 = vmul.f32 %v4535_v51, %v3813_v10  ;;  %v3811_v61 = vmax.f32 %v3807_v53, 0.0  ;;  %v3812_v62 = vmax.f32 %v3808_v54, 0.0  ;;  %v4546_v10 = vld [vmem:[#allocation5 + $0x14] ss:$0 sm:$0xff]  ;;  %s5483_s25 = scalar_lea.vmem %s4355_s24, 32  ;;  %p5488_p11 = scmp.lt.s32.totalorder %s4355_s24, %s4355_s24 }
 0xfa9   :  { %v6204_v46 = vpop.f32.mrf.mxu0  ;;  %p5484_p10 = scmp.ne.s32.totalorder %s4355_s24, %s5483_s25  ;;  %p5489_p12 = scmp.lt.s32.totalorder %s5483_s25, %s5483_s25 }
 0xfaa   :  { %v3827_v63 = vmul.f32 %v4534_v55, %v3811_v61  ;;  %v3839_v29 = vsel %vm349_vm1, %v3812_v62, -inf  ;;  %v3840_v0 = vsel %vm349_vm1, %v3829_v60, -inf }
 0xfab   :  { %v3841_v40 = vmax.f32 %v3839_v29, %v3840_v0  ;;  %v5342_v3 = vpop.f32.mrf.mxu0  ;;  %p5490_p13 = por %p5489_p12, %p5488_p11 }
 0xfac   :  { %v3831_v36 = vsel %vm349_vm1, %v3827_v63, -inf }
 0xfad   :  { %v3832_v6 = vmax.f32 %v3830_v4, %v3831_v36  ;;  %v3842_v33 = vrot.slane %v3841_v40, 4  ;;  %p5491_p0 = pnand %p5490_p13, %p5484_p10 }
 0xfaf   :  { %v3833_v5 = vrot.slane %v3832_v6, 4  ;;  %v3843_v7 = vmax.f32 %v3841_v40, %v3842_v33 }
 0xfb1   :  { %v3834_v48 = vmax.f32 %v3832_v6, %v3833_v5  ;;  %v3844_v57 = vrot.slane %v3843_v7, 2 }
 0xfb3   :  { %v3835_v43 = vrot.slane %v3834_v48, 2  ;;  %v3845_v12 = vmax.f32 %v3843_v7, %v3844_v57 }
 0xfb5   :  { %v3836_v14 = vmax.f32 %v3834_v48, %v3835_v43  ;;  %v3846_v15 = vrot.slane %v3845_v12, 1 }
 0xfb7   :  { %v3837_v16 = vrot.slane %v3836_v14, 1  ;;  %v3847_v17 = vmax.f32 %v3845_v12, %v3846_v15 }
 0xfb9   :  { %v3838_v59 = vmax.f32 %v3836_v14, %v3837_v16 }
 0xfbb   :  { %v3848_v19 = vsel %vm2474_vm4, %v3838_v59, %v3847_v17  ;;  %vm3947_vm4 = vcmask 23552  }
 0xfbc   :  { %3854 = vrot.lane.b32.xlu1 %v3848_v19, %s5513_s0 }
0x1018   :  { %v3851_v13 = vpop.permute.xlu0 %3850 }
0x1019   :  { %v3857_v11 = vsel %vm349_vm1, %v6143_v9, %v3851_v13  ;;  %v4034_v9 = vld [vmem:[#allocation2 + $0x350] sm:$0xff] }
0x102e   :  { %v3855_v58 = vpop.permute.xlu1 %3854 }
0x102f   :  { %v3858_v28 = vsel %vm2280_vm2, %v3857_v11, %v3855_v58 }
0x1030   :  { %5305 = vmatmul.mubr.msk.f32.vlgmr.msra.gmra.mxu1 %vm2285_vm3, %v3858_v28 }
0x1031   :  { %5309 = vmatprep.mubr.msk.f32.mxu1 %vm5516_vm5, %v5515_v44  ;;  %5308 = vmatpush3.msk.msra.mxu1 %vm3951_vm6, %v3941_v30 }
0x1032   :  { %5323 = vmatprep.subr.mxu1 %v5515_v44 }
0x10f0   :  { %v3936_v32 = vpop.f32.mrf.mxu1 }
0x10f1   :  { %v3937_v41 = vadd.f32 %v4536_v31, %v3936_v32 }
0x10f2   :  { %v5306_v20 = vpop.f32.mrf.mxu1 }
0x10f3   :  { %v3940_v22 = vmax.f32 %v3937_v41, 0.0 }
0x10f5   :  { %5310 = vmatmul.mubr.msk.f32.vlgmr.msra.gmra.mxu1 %vm3947_vm4, %v3940_v22 }
0x10f6   :  { %5329 = vmatprep.mubr.msk.f32.mxu1 %vm5516_vm5, %v5515_v44  ;;  %5324 = vmatpush3.msra.mxu1 %v4034_v9 }
0x10f7   :  { %5325 = vmatprep.subr.mxu1 %v5515_v44 }
0x10f8   :  { %5326 = vmatpush3.msra.mxu1 %v4033_v35 }
0x10f9   :  { %5327 = vmatprep.subr.mxu1 %v5515_v44 }
0x10fa   :  { %5328 = vmatpush3.msra.mxu1 %v4032_v26 }
0x10fb   :  { %5343 = vmatprep.subr.mxu1 %v5515_v44 }
0x11b5   :  { %v4021_v42 = vpop.f32.mrf.mxu1 }
0x11b6   :  { %v4022_v56 = vadd.f32 %v4538_v21, %v4021_v42 }
0x11b7   :  { %v5311_v23 = vpop.f32.mrf.mxu1 }
0x11b8   :  { %v4541_v39 = vmul.f32 -1.442695, %v4022_v56 }
0x11ba   :  { %5435 = vpow2.f32 %v4541_v39 }
0x11c7   :  { %v5436_v45 = vpop.eup %5435 }
0x11c8   :  { %v4028_v24 = vadd.f32 1.0, %v5436_v45 }
0x11ca   :  { %5437 = vrcp.f32 %v4028_v24 }
0x11d7   :  { %v5438_v18 = vpop.eup %5437 }
0x11d8   :  { %v4031_v38 = vmul.f32 %v5438_v18, %v3858_v28 }
0x11da   :  { %5330 = vmatmul.mubr.msk.f32.vlgmr.msra.gmra.mxu1 %vm2285_vm3, %v4031_v38 }
0x11db   :  { %5344 = vmatpush3.msra.mxu1 %v4266_v8  ;;  %5351 = vmatprep.mubr.msk.f32.mxu1 %vm5516_vm5, %v5515_v44 }
0x11dc   :  { %5345 = vmatprep.subr.mxu1 %v5515_v44 }
0x11dd   :  { %5346 = vmatpush3.msra.mxu1 %v4265_v27 }
0x11de   :  { %5347 = vmatprep.subr.mxu1 %v5515_v44 }
0x11df   :  { %5348 = vmatpush3.msra.mxu1 %v4264_v34 }
0x11e0   :  { %5349 = vmatprep.subr.mxu1 %v5515_v44 }
0x11e1   :  { %5350 = vmatpush3.msra.mxu1 %v4263_v47 }
0x11e2   :  { %5352 = vmatmul.mubr.msk.f32.vlgmr.msra.gmra.mxu1 %vm63_vm0, %v5964_v1 }
0x129a   :  { %v4181_v37 = vpop.f32.mrf.mxu1 }
0x129b   :  { %v4182_v50 = vadd.f32 %v4181_v37, %v6189_v25 }
0x129c   :  { %v5331_v49 = vpop.f32.mrf.mxu1 }
0x129d   :  { %v4262_v51 = vadd.f32 %v6204_v46, %v4182_v50 }
0x12a2   :  { %v4336_v52 = vpop.f32.mrf.mxu1 }
0x12a3   :  { %v4340_v53 = vadd.f32 %v4336_v52, %v4262_v51 }
0x12a4   :  { %v5353_v54 = vpop.f32.mrf.mxu1 }
0x12a5   :  { %v4346_v55 = vadd.f32 %v4546_v10, %v4340_v53 }
0x12a7   :  { %4347 = vst [vmem:[#allocation7] sm:$0x3] %v4346_v55 }
0x12a8   :  { %5494 = shalt.err (!%p5491_p0)
}
0x12a9   :  { %4357 = dma.vmem_to_hbm [thread:$0]  %s4355_s24, 32, %s6241_s4, [#allocation4]  }
0x12aa   :  { %5507 = dma.done.wait [#allocation4], 32  }
0x12ab   :  { %5508 = vsyncadd [#allocation4], 4294967264 }
0x12ac   :  { %4361 = vsyncpa [#allocation3], 1 }
0x12ad   :  { %4362 = vsyncpa [#allocation6], 1 }
0x12ae   :  { %4363 = vsyncpa [#allocation4], 1 }

</bundles_post_ra>
